<compile_context>
chip_gen: v5e
topology: v5e:2x2
jax: 0.10.0
libtpu: 0.0.40
codegen_flags: <defaults>
</compile_context>

<pallas_src>
import math

import jax
import jax.numpy as jnp
from jax.experimental import pallas as pl
from jax.experimental.pallas import tpu as pltpu


def _round_up(x, m):
    return -(-x // m) * m


def _padded_tile_bytes(rows, cols, itemsize):
    """VMEM footprint of a (rows, cols) tile after (8, 128) layout padding."""
    return _round_up(rows, 8) * _round_up(cols, 128) * itemsize


def _vmem_capacity_bytes():
    """Per-TensorCore VMEM capacity; conservative fallback is v7x's 64 MiB."""
    try:
        info = pltpu.get_tpu_info()
        for attr in ("vmem_capacity_bytes", "vmem_bytes", "vmem_size_bytes"):
            val = getattr(info, attr, None)
            if val:
                return int(val)
    except Exception:
        pass
    return 64 << 20


def _pick_g_tile(G, per_g_bytes, budget_bytes):
    """Pick heads-per-step (g_tile) and head-axis padding.

    Guarantees: g_tile * per_g_bytes <= budget (unless g_tile == G already fits),
    g_tile is a multiple of 8 or equal to G (output-block sublane constraint), and the
    grid has >= 2 steps whenever G >= 16 so both v7x TensorCores get work.
    """
    cap = max(8, (budget_bytes // max(1, per_g_bytes)) // 8 * 8)
    if G >= 16:
        cap = min(cap, max(8, (G // 2) // 8 * 8))
    start = (min(cap, G) // 8) * 8
    for cand in range(start, 7, -8):          # multiple-of-8 divisor of G: no padding
        if G % cand == 0:
            return cand, 0
    if G <= cap:                              # block dim == full array dim is legal
        return G, 0
    g_tile = cap                              # otherwise pad G up to a multiple of cap
    return g_tile, (-G) % g_tile


def _make_part_attention_kernel(L):
    def kernel(*refs):
        # layers 0..L-2: (g_tile, N, N); layer L-1: (g_tile, row_blk, N); out: (g_tile, N)
        x_refs = refs[:L]
        out_ref = refs[L]
        # Row-vector chain: row0(x[L-1] @ ... @ x[0]) == ((e0^T x[L-1]) x[L-2]) ... x[0]
        v = x_refs[L - 1][:, 0:1, :]                           # (g_tile, 1, N)
        for i in range(L - 2, -1, -1):                         # static unroll; serial chain
            v = jnp.einsum("gik,gkj->gij", v, x_refs[i][...],
                           precision=jax.lax.Precision.HIGHEST,
                           preferred_element_type=jnp.float32)
        out_ref[...] = v[:, 0, :].astype(out_ref.dtype)
    return kernel


def part_attention_forward(xs):
    """xs: sequence of L attention maps, each (B, C, N, N).
    Returns (last_map (B, C, N-1), attention_map (B, C, H, H))."""
    xs = list(xs)
    L = len(xs)
    B, C, N, N2 = xs[0].shape
    assert N == N2
    G = B * C
    dtype = xs[0].dtype
    itemsize = jnp.dtype(dtype).itemsize

    # Merge (B, C) -> G: metadata-only reshape, no HBM copy.
    xg = [x.reshape(G, N, N) for x in xs]

    # Only the CLS row of the last layer is read: fetch an 8-row (sublane-aligned) strip.
    row_blk = 8 if N >= 8 else N

    # VMEM sizing with (8,128)-padded tile bytes, x2 for BlockSpec double buffering of each
    # input, plus a small per-head allowance for the (1, N) state and output blocks.
    full_blk = _padded_tile_bytes(N, N, itemsize)
    last_blk = _padded_tile_bytes(row_blk, N, itemsize)
    per_g_bytes = 2 * ((L - 1) * full_blk + last_blk) + (8 << 10)

    vmem_cap = _vmem_capacity_bytes()          # 64 MiB on v7x, 128 MiB on v5e/v6e
    budget_bytes = vmem_cap // 2               # headroom for compiler scratch etc.
    vmem_limit = int(vmem_cap * 0.8)

    g_tile, pad = _pick_g_tile(G, per_g_bytes, budget_bytes)
    if pad:
        # Zero-pad the head axis so every grid step is a full, budget-respecting tile;
        # padded heads produce zero rows that are sliced off below.
        xg = [jnp.pad(x, ((0, pad), (0, 0), (0, 0))) for x in xg]
    G_pad = G + pad
    grid = (G_pad // g_tile,)

    in_specs = [pl.BlockSpec((g_tile, N, N), lambda g: (g, 0, 0)) for _ in range(L - 1)]
    in_specs.append(pl.BlockSpec((g_tile, row_blk, N), lambda g: (g, 0, 0)))

    # Note: the output block's last dim is N (full extent). After the row-vector rewrite
    # the output is ~L*N x smaller than the input stream, so the masked-store cost of the
    # non-128 lane width is negligible; the [:, 1:] slice / view below is pure metadata.
    row0 = pl.pallas_call(
        _make_part_attention_kernel(L),
        out_shape=jax.ShapeDtypeStruct((G_pad, N), dtype),
        grid=grid,
        in_specs=in_specs,
        out_specs=pl.BlockSpec((g_tile, N), lambda g: (g, 0)),
        compiler_params=pltpu.CompilerParams(
            dimension_semantics=("parallel",),
            vmem_limit_bytes=vmem_limit,
        ),
    )(*xg)

    patch_num = N - 1
    H = int(math.isqrt(patch_num))
    assert H * H == patch_num, "Part_Attention assumes a square patch grid"
    last_map = row0[:G, 1:].reshape(B, C, patch_num)
    attention_map = last_map.reshape(B, C, H, H)
    return last_map, attention_map


def reference_forward(xs):
    """Pure-JAX reference mirroring the PyTorch module exactly."""
    hp = jax.lax.Precision.HIGHEST
    last = xs[0]
    for i in range(1, len(xs)):
        last = jnp.matmul(xs[i], last, precision=hp)
    last_map = last[:, :, 0, 1:]
    B, C = last_map.shape[0], last_map.shape[1]
    patch_num = last_map.shape[-1]
    H = int(math.isqrt(patch_num))
    attention_map = last_map.reshape(B, C, H, H)
    return last_map, attention_map


if __name__ == "__main__":
    # Small ViT-like shapes: B=2 images, C=4 heads, L=4 transformer layers,
    # N = 1 CLS token + 8*8 patches = 65 tokens.
    B, C, L = 2, 4, 4
    H = 8
    patch_num = H * H
    N = patch_num + 1

    key = jax.random.PRNGKey(0)
    keys = jax.random.split(key, L)
    # Attention-map-like inputs: softmax over the last axis (rows sum to 1).
    xs = [jax.nn.softmax(jax.random.normal(k, (B, C, N, N), jnp.float32), axis=-1)
          for k in keys]

    last_map, attention_map = part_attention_forward(xs)
    last_map = jax.block_until_ready(last_map)
    attention_map = jax.block_until_ready(attention_map)

    ref_last, ref_attn = reference_forward(xs)

    assert last_map.shape == (B, C, patch_num), last_map.shape
    assert attention_map.shape == (B, C, H, H), attention_map.shape
    assert jnp.allclose(last_map, ref_last, atol=1e-5, rtol=1e-5), (
        f"max abs err {jnp.max(jnp.abs(last_map - ref_last))}")
    assert jnp.allclose(attention_map, ref_attn, atol=1e-5, rtol=1e-5), (
        f"max abs err {jnp.max(jnp.abs(attention_map - ref_attn))}")

    print("KERNEL_OK")
</pallas_src>

<mosaic_0001>
module attributes {stable_mosaic.version = 11 : i64} {
  func.func @kernel(%arg0: i32, %arg1: memref<8x65x65xf32, #tpu.memory_space<vmem>>, %arg2: memref<8x65x65xf32, #tpu.memory_space<vmem>>, %arg3: memref<8x65x65xf32, #tpu.memory_space<vmem>>, %arg4: memref<8x8x65xf32, #tpu.memory_space<vmem>>, %arg5: memref<8x65xf32, #tpu.memory_space<vmem>>) attributes {dimension_semantics = [#tpu.dimension_semantics<parallel>], iteration_bounds = array<i64: 1>, scalar_prefetch = 0 : i64, scratch_operands = 0 : i64, tpu.core_type = #tpu.core_type<tc>, window_params = [{transform_indices = @transform_0, window_bounds = array<i64: 8, 65, 65>}, {transform_indices = @transform_1, window_bounds = array<i64: 8, 65, 65>}, {transform_indices = @transform_2, window_bounds = array<i64: 8, 65, 65>}, {transform_indices = @transform_3, window_bounds = array<i64: 8, 8, 65>}, {transform_indices = @transform_4, window_bounds = array<i64: 8, 65>}]} {
    %c0 = arith.constant 0 : index
    %c0_0 = arith.constant 0 : index
    %c0_1 = arith.constant 0 : index
    %0 = vector.load %arg4[%c0, %c0_0, %c0_1] : memref<8x8x65xf32, #tpu.memory_space<vmem>>, vector<8x1x65xf32>
    %c0_2 = arith.constant 0 : index
    %c0_3 = arith.constant 0 : index
    %c0_4 = arith.constant 0 : index
    %1 = vector.load %arg3[%c0_2, %c0_3, %c0_4] : memref<8x65x65xf32, #tpu.memory_space<vmem>>, vector<8x65x65xf32>
    "tpu.trace_start"() <{level = 10 : i32, message = "gik,gkj->gij"}> : () -> ()
    %cst = arith.constant dense<0.000000e+00> : vector<8x1x65xf32>
    %2 = tpu.matmul %0, %1, %cst {dimension_numbers = #tpu.dot_dimension_numbers<[2], [1], [1], [2], [0, 0, 0, 1, 1, 2], [0], [0]>, precision = #tpu.contract_precision<fp32>} : vector<8x1x65xf32>, vector<8x65x65xf32>, vector<8x1x65xf32> -> vector<8x1x65xf32>
    "tpu.trace_stop"() : () -> ()
    %c0_5 = arith.constant 0 : index
    %c0_6 = arith.constant 0 : index
    %c0_7 = arith.constant 0 : index
    %3 = vector.load %arg2[%c0_5, %c0_6, %c0_7] : memref<8x65x65xf32, #tpu.memory_space<vmem>>, vector<8x65x65xf32>
    "tpu.trace_start"() <{level = 10 : i32, message = "gik,gkj->gij"}> : () -> ()
    %cst_8 = arith.constant dense<0.000000e+00> : vector<8x1x65xf32>
    %4 = tpu.matmul %2, %3, %cst_8 {dimension_numbers = #tpu.dot_dimension_numbers<[2], [1], [1], [2], [0, 0, 0, 1, 1, 2], [0], [0]>, precision = #tpu.contract_precision<fp32>} : vector<8x1x65xf32>, vector<8x65x65xf32>, vector<8x1x65xf32> -> vector<8x1x65xf32>
    "tpu.trace_stop"() : () -> ()
    %c0_9 = arith.constant 0 : index
    %c0_10 = arith.constant 0 : index
    %c0_11 = arith.constant 0 : index
    %5 = vector.load %arg1[%c0_9, %c0_10, %c0_11] : memref<8x65x65xf32, #tpu.memory_space<vmem>>, vector<8x65x65xf32>
    "tpu.trace_start"() <{level = 10 : i32, message = "gik,gkj->gij"}> : () -> ()
    %cst_12 = arith.constant dense<0.000000e+00> : vector<8x1x65xf32>
    %6 = tpu.matmul %4, %5, %cst_12 {dimension_numbers = #tpu.dot_dimension_numbers<[2], [1], [1], [2], [0, 0, 0, 1, 1, 2], [0], [0]>, precision = #tpu.contract_precision<fp32>} : vector<8x1x65xf32>, vector<8x65x65xf32>, vector<8x1x65xf32> -> vector<8x1x65xf32>
    "tpu.trace_stop"() : () -> ()
    %7 = vector.shape_cast %6 : vector<8x1x65xf32> to vector<8x65xf32>
    %c0_13 = arith.constant 0 : index
    %c0_14 = arith.constant 0 : index
    %8 = vector.load %arg5[%c0_13, %c0_14] : memref<8x65xf32, #tpu.memory_space<vmem>>, vector<8x65xf32>
    tpu.vector_store %arg5[%c0_13, %c0_14], %7 {strides = array<i32>} : memref<8x65xf32, #tpu.memory_space<vmem>>, vector<8x65xf32>,
    return
  }
  func.func @transform_0(%arg0: i32) -> (i32, i32, i32) {
    %c0_i32 = arith.constant 0 : i32
    %c0_i32_0 = arith.constant 0 : i32
    %c0_i32_1 = arith.constant 0 : i32
    return %arg0, %c0_i32, %c0_i32_0 : i32, i32, i32
  }
  func.func @transform_1(%arg0: i32) -> (i32, i32, i32) {
    %c0_i32 = arith.constant 0 : i32
    %c0_i32_0 = arith.constant 0 : i32
    %c0_i32_1 = arith.constant 0 : i32
    return %arg0, %c0_i32, %c0_i32_0 : i32, i32, i32
  }
  func.func @transform_2(%arg0: i32) -> (i32, i32, i32) {
    %c0_i32 = arith.constant 0 : i32
    %c0_i32_0 = arith.constant 0 : i32
    %c0_i32_1 = arith.constant 0 : i32
    return %arg0, %c0_i32, %c0_i32_0 : i32, i32, i32
  }
  func.func @transform_3(%arg0: i32) -> (i32, i32, i32) {
    %c0_i32 = arith.constant 0 : i32
    %c0_i32_0 = arith.constant 0 : i32
    %c0_i32_1 = arith.constant 0 : i32
    return %arg0, %c0_i32, %c0_i32_0 : i32, i32, i32
  }
  func.func @transform_4(%arg0: i32) -> (i32, i32) {
    %c0_i32 = arith.constant 0 : i32
    %c0_i32_0 = arith.constant 0 : i32
    return %arg0, %c0_i32 : i32, i32
  }
}

</mosaic_0001>

<bundles_post_ra>
// kernel: tpu_custom_call.1
= control target key start
LH: loop header
LB: loop body
LE: loop exit
PB: predicated region body
PF: predicated region fallthrough
CT: control target
= control target key end

     0   :  { %vm165_vm0 = vcmask 1040384   ;;  %s10898_s0 = inlined_call_operand.vmem [shape: f32[8,65,65], index: 0, kind: input, shape index: {}]   ;;  %s10899_s1 = inlined_call_operand.vmem [shape: f32[8,65,65], index: 1, kind: input, shape index: {}]   ;;  %s10900_s2 = inlined_call_operand.vmem [shape: f32[8,65,65], index: 2, kind: input, shape index: {}]   ;;  %s10901_s3 = inlined_call_operand.vmem [shape: f32[8,65,65], index: 3, kind: input, shape index: {}]   ;;  %s10902_s4 = inlined_call_operand.hbm [shape: f32[8,65], index: 4, kind: output, shape index: {}]  }
   0x1   :  { %v97_v0 = vld [vmem:[%s10900_s2 + $0x40] sm:$0x1]  ;;  %v96_v1 = vld [vmem:[%s10900_s2 + $0x38] sm:$0xff]  ;;  %v95_v2 = vld [vmem:[%s10900_s2 + $0x30] sm:$0xff] }
   0x2   :  { %v167_v3 = vsel %vm165_vm0, %v97_v0, 0  ;;  %v6565_v4 = vand.u32 4294901760, %v96_v1  ;;  %v6567_v5 = vand.u32 4294901760, %v95_v2  ;;  %v94_v6 = vld [vmem:[%s10900_s2 + $0x28] sm:$0xff]  ;;  %v93_v7 = vld [vmem:[%s10900_s2 + $0x20] sm:$0xff]  ;;  %v92_v8 = vld [vmem:[%s10900_s2 + $0x18] sm:$0xff] }
   0x3   :  { %v6578_v9 = vand.u32 4294901760, %v167_v3  ;;  %v6580_v10 = vand.u32 4294901760, %v94_v6  ;;  %v6582_v11 = vand.u32 4294901760, %v93_v7  ;;  %v6584_v12 = vand.u32 4294901760, %v92_v8  ;;  %v91_v13 = vld [vmem:[%s10900_s2 + $0x10] sm:$0xff]  ;;  %v90_v14 = vld [vmem:[%s10900_s2 + $0x8] sm:$0xff] }
   0x4   :  { %v6593_v15 = vsub.f32 %v96_v1, %v6565_v4  ;;  %v6596_v16 = vsub.f32 %v95_v2, %v6567_v5  ;;  %v6598_v17 = vand.u32 4294901760, %v91_v13  ;;  %v106_v21 = vld [vmem:[%s10900_s2 + $0x88] sm:$0x1]  ;;  %v6619_v25 = vand.u32 4294901760, %v90_v14  ;;  %v89_v26 = vld [vmem:[%s10900_s2] sm:$0xff] }
   0x5   :  { %177 = vmatpush.msra.mxu0 %v6578_v9  ;;  %317 = vmatpush.msra.mxu3 %v6578_v9  ;;  %v6603_v18 = vsub.f32 %v167_v3, %v6578_v9  ;;  %v6606_v19 = vsub.f32 %v94_v6, %v6580_v10  ;;  %v6609_v20 = vsub.f32 %v93_v7, %v6582_v11  ;;  %v60_v30 = vld [vmem:[%s10901_s3] sm:$0xff]  ;;  %v423_v34 = vsel %vm165_vm0, %v106_v21, 0  ;;  %v62_v35 = vld [vmem:[%s10901_s3 + $0x48] sm:$0xff] }
   0x6   :  { %v218_v22 = vand.u32 4294901760, %v6593_v15  ;;  %v224_v23 = vand.u32 4294901760, %v6596_v16  ;;  %v6617_v24 = vsub.f32 %v92_v8, %v6584_v12  ;;  %v6640_v33 = vsub.f32 %v91_v13, %v6598_v17  ;;  %61 = vst [vmem:[#allocation2 + $0x30] sm:$0xff] %v60_v30 }
   0x7   :  { %179 = vmatpush.msra.mxu0 %v6565_v4  ;;  %278 = vmatpush.msra.mxu2 %v6603_v18  ;;  %v212_v27 = vand.u32 4294901760, %v6603_v18  ;;  %v230_v28 = vand.u32 4294901760, %v6606_v19  ;;  %v236_v29 = vand.u32 4294901760, %v6609_v20 }
   0x8   :  { %319 = vmatpush.msra.mxu3 %v6565_v4  ;;  %v219_v31 = vsub.f32 %v6593_v15, %v218_v22  ;;  %v225_v32 = vsub.f32 %v6596_v16, %v224_v23 }
   0x9   :  { %9 = vsyncpa [#allocation4], 0  ;;  %181 = vmatpush.msra.mxu0 %v6567_v5  ;;  %281 = vmatpush.msra.mxu2 %v6593_v15  ;;  %v213_v36 = vsub.f32 %v6603_v18, %v212_v27  ;;  %v6651_v37 = vand.u32 4294901760, %v89_v26  ;;  %v6653_v38 = vand.u32 4294901760, %v423_v34  ;;  %v242_v39 = vand.u32 4294901760, %v6617_v24  ;;  %v105_v40 = vld [vmem:[%s10900_s2 + $0x80] sm:$0xff] }
   0xa   :  { %v104_v41 = vld [vmem:[%s10900_s2 + $0x78] sm:$0xff]  ;;  %321 = vmatpush.msra.mxu3 %v6567_v5  ;;  %v231_v42 = vsub.f32 %v6606_v19, %v230_v28  ;;  %v6667_v43 = vsub.f32 %v90_v14, %v6619_v25  ;;  %v103_v44 = vld [vmem:[%s10900_s2 + $0x70] sm:$0xff]  ;;  %63 = vst [vmem:[#allocation2] sm:$0xff] %v62_v35  ;;  %v220_v46 = vand.u32 4294901760, %v219_v31  ;;  %v237_v47 = vsub.f32 %v6609_v20, %v236_v29  ;;  %v102_v49 = vld [vmem:[%s10900_s2 + $0x68] sm:$0xff]  ;;  %s6489_s22 = sshll.u32 %s10902_s4, 4  ;;  %s6490_s22 = int_to_ptr.hbm [resolvable:$true] %s6489_s22 }
   0xb   :  { %183 = vmatpush.msra.mxu0 %v6580_v10  ;;  %284 = vmatpush.msra.mxu2 %v6596_v16  ;;  %v214_v45 = vand.u32 4294901760, %v213_v36  ;;  %v6678_v48 = vsub.f32 %v423_v34, %v6653_v38  ;;  %v226_v50 = vand.u32 4294901760, %v225_v32  ;;  %v6684_v51 = vand.u32 4294901760, %v105_v40  ;;  %v101_v54 = vld [vmem:[%s10900_s2 + $0x60] sm:$0xff]  ;;  %v100_v8 = vld [vmem:[%s10900_s2 + $0x58] sm:$0xff]  ;;  %v99_v13 = vld [vmem:[%s10900_s2 + $0x50] sm:$0xff] }
   0xc   :  { %323 = vmatpush.msra.mxu3 %v6580_v10  ;;  %v248_v52 = vand.u32 4294901760, %v6640_v33  ;;  %v6687_v53 = vand.u32 4294901760, %v104_v41  ;;  %v243_v56 = vsub.f32 %v6617_v24, %v242_v39  ;;  %v6698_v57 = vsub.f32 %v89_v26, %v6651_v37 }
   0xd   :  { %185 = vmatpush.msra.mxu0 %v6582_v11  ;;  %215 = vmatpush.msra.mxu1 %v214_v45  ;;  %v468_v55 = vand.u32 4294901760, %v6678_v48  ;;  %v6700_v58 = vand.u32 4294901760, %v103_v44  ;;  %v232_v59 = vand.u32 4294901760, %v231_v42  ;;  %v6705_v60 = vsub.f32 %v105_v40, %v6684_v51  ;;  %v81_v31 = vld [vmem:[#allocation2 + $0x30] sm:$0x1] }
   0xe   :  { %287 = vmatpush.msra.mxu2 %v6606_v19  ;;  %325 = vmatpush.msra.mxu3 %v6582_v11  ;;  %v6708_v61 = vsub.f32 %v104_v41, %v6687_v53  ;;  %v6710_v62 = vand.u32 4294901760, %v102_v49  ;;  %v254_v0 = vand.u32 4294901760, %v6667_v43  ;;  %v6720_v2 = vand.u32 4294901760, %v101_v54 }
   0xf   :  { %187 = vmatpush.msra.mxu0 %v6584_v12  ;;  %221 = vmatpush.msra.mxu1 %v220_v46  ;;  %v469_v63 = vsub.f32 %v6678_v48, %v468_v55  ;;  %v6718_v1 = vsub.f32 %v103_v44, %v6700_v58  ;;  %v474_v3 = vand.u32 4294901760, %v6705_v60  ;;  %v249_v6 = vsub.f32 %v6640_v33, %v248_v52  ;;  %v98_v44 = vld [vmem:[%s10900_s2 + $0x48] sm:$0xff] }
  0x10   :  { %290 = vmatpush.msra.mxu2 %v6609_v20  ;;  %327 = vmatpush.msra.mxu3 %v6584_v12  ;;  %v480_v7 = vand.u32 4294901760, %v6708_v61  ;;  %vm161_vm1 = vcmask 531456   ;;  %v238_v14 = vand.u32 4294901760, %v237_v47  ;;  %v260_v26 = vand.u32 4294901760, %v6698_v57 }
  0x11   :  { %189 = vmatpush.msra.mxu0 %v6598_v17  ;;  %227 = vmatpush.msra.mxu1 %v226_v50  ;;  %v10903_v21 = vand.u32 4294901760, %v6718_v1  ;;  %v6739_v30 = vsub.f32 %v102_v49, %v6710_v62  ;;  %v244_v32 = vand.u32 4294901760, %v243_v56  ;;  %v475_v34 = vsub.f32 %v6705_v60, %v474_v3 }
  0x12   :  { %293 = vmatpush.msra.mxu2 %v6617_v24  ;;  %329 = vmatpush.msra.mxu3 %v6598_v17  ;;  %v6747_v35 = vsub.f32 %v101_v54, %v6720_v2  ;;  %v470_v36 = vand.u32 4294901760, %v469_v63  ;;  %v255_v40 = vsub.f32 %v6667_v43, %v254_v0  ;;  %v6753_v41 = vand.u32 4294901760, %v100_v8 }
  0x13   :  { %191 = vmatpush.msra.mxu0 %v6619_v25  ;;  %233 = vmatpush.msra.mxu1 %v232_v59  ;;  %v6755_v42 = vand.u32 4294901760, %v99_v13  ;;  %v250_v45 = vand.u32 4294901760, %v249_v6  ;;  %v481_v46 = vsub.f32 %v6708_v61, %v480_v7  ;;  %v492_v47 = vand.u32 4294901760, %v6739_v30 }
  0x14   :  { %296 = vmatpush.msra.mxu2 %v6640_v33  ;;  %331 = vmatpush.msra.mxu3 %v6619_v25  ;;  %v163_v49 = vsel %vm161_vm1, %v81_v31, 0  ;;  %v476_v50 = vand.u32 4294901760, %v475_v34  ;;  %v487_v54 = vsub.f32 %v6718_v1, %v10903_v21  ;;  %v261_v56 = vsub.f32 %v6698_v57, %v260_v26  ;;  %v64_v33 = vld [vmem:[%s10901_s3 + $0x90] sm:$0xff] }
  0x15   :  { %193 = vmatpush.msra.mxu0 %v6651_v37  ;;  %239 = vmatpush.msra.mxu1 %v238_v14  ;;  %v6775_v59 = vsub.f32 %v100_v8, %v6753_v41  ;;  %v498_v63 = vand.u32 4294901760, %v6747_v35  ;;  %v6781_v6 = vsub.f32 %v99_v13, %v6755_v42  ;;  %v6783_v14 = vand.u32 4294901760, %v163_v49  ;;  %65 = vst [vmem:[#allocation2 + $0x18] sm:$0xff] %v64_v33 }
  0x16   :  { %299 = vmatpush.msra.mxu2 %v6667_v43  ;;  %333 = vmatpush.msra.mxu3 %v6651_v37  ;;  %v6785_v31 = vand.u32 4294901760, %v98_v44  ;;  %v482_v8 = vand.u32 4294901760, %v481_v46  ;;  %v256_v34 = vand.u32 4294901760, %v255_v40  ;;  %v493_v21 = vsub.f32 %v6739_v30, %v492_v47 }
  0x17   :  { %351 = vmatpush.msrb.mxu0 %v212_v27  ;;  %245 = vmatpush.msra.mxu1 %v244_v32  ;;  %v504_v13 = vand.u32 4294901760, %v6775_v59  ;;  %v195_v18 = vsub.f32 %v163_v49, %v6783_v14  ;;  %v488_v32 = vand.u32 4294901760, %v487_v54  ;;  %v499_v40 = vsub.f32 %v6747_v35, %v498_v63 }
  0x18   :  { %471 = vmatpush.msrb.mxu3 %v470_v36  ;;  %302 = vmatpush.msra.mxu2 %v6698_v57  ;;  %v6799_v27 = vsub.f32 %v98_v44, %v6785_v31  ;;  %v262_v36 = vand.u32 4294901760, %v261_v56  ;;  %v510_v46 = vand.u32 4294901760, %v6781_v6  ;;  %v494_v15 = vand.u32 4294901760, %v493_v21 }
  0x19   :  { %355 = vmatpush.msrb.mxu0 %v218_v22  ;;  %251 = vmatpush.msra.mxu1 %v250_v45  ;;  %v505_v22 = vsub.f32 %v6775_v59, %v504_v13  ;;  %v196_v45 = vand.u32 4294901760, %v195_v18  ;;  %v500_v16 = vand.u32 4294901760, %v499_v40  ;;  %vm6460_vm2 = vcmask 1041409  }
  0x1a   :  { %433 = vmatpush.msrb.mxu2 %v6653_v38  ;;  %477 = vmatpush.msrb.mxu3 %v476_v50  ;;  %v516_v44 = vand.u32 4294901760, %v6799_v27  ;;  %vm6463_vm3 = vcmask 1042434   ;;  %vm6466_vm4 = vcmask 1043459   ;;  %vm6469_vm5 = vcmask 1044484  }
  0x1b   :  { %359 = vmatpush.msrb.mxu0 %v224_v23  ;;  %257 = vmatpush.msra.mxu1 %v256_v34  ;;  %v511_v23 = vsub.f32 %v6781_v6, %v510_v46  ;;  %v506_v19 = vand.u32 4294901760, %v505_v22  ;;  %v197_v21 = vsub.f32 %v195_v18, %v196_v45  ;;  %vm6472_vm6 = vcmask 1045509  }
  0x1c   :  { %435 = vmatpush.msrb.mxu2 %v6684_v51  ;;  %483 = vmatpush.msrb.mxu3 %v482_v8  ;;  %v107_v8 = vld [vmem:[%s10900_s2 + $0x90] sm:$0xff]  ;;  %vm6475_vm7 = vcmask 1046534   ;;  %vm6478_vm8 = vcmask 1047559  }
  0x1d   :  { %363 = vmatpush.msrb.mxu0 %v230_v28  ;;  %263 = vmatpush.msra.mxu1 %v262_v36  ;;  %v517_v28 = vsub.f32 %v6799_v27, %v516_v44  ;;  %v512_v20 = vand.u32 4294901760, %v511_v23 }
  0x1e   :  { %437 = vmatpush.msrb.mxu2 %v6687_v53  ;;  %489 = vmatpush.msrb.mxu3 %v488_v32 }
  0x1f   :  { %367 = vmatpush.msrb.mxu0 %v236_v29  ;;  %397 = vmatpush.msrb.mxu1 %v6578_v9  ;;  %v82_v29 = vld [vmem:[#allocation2] sm:$0x1]  ;;  %v198_v9 = vand.u32 4294901760, %v197_v21 }
  0x20   :  { %439 = vmatpush.msrb.mxu2 %v6700_v58  ;;  %495 = vmatpush.msrb.mxu3 %v494_v15  ;;  %v420_v24 = vsel %vm161_vm1, %v82_v29, 0  ;;  %v66_v15 = vld [vmem:[%s10901_s3 + $0xd8] sm:$0xff]  ;;  %v119_v29 = vld [vmem:[%s10900_s2 + $0xf0] sm:$0xff] }
  0x21   :  { %371 = vmatpush.msrb.mxu0 %v242_v39  ;;  %399 = vmatpush.msrb.mxu1 %v6565_v4  ;;  %v518_v4 = vand.u32 4294901760, %v517_v28  ;;  %67 = vst [vmem:[#allocation2 + $0x10] sm:$0xff] %v66_v15 }
  0x22   :  { %441 = vmatpush.msrb.mxu2 %v6710_v62  ;;  %501 = vmatpush.msrb.mxu3 %v500_v16  ;;  %v120_v16 = vld [vmem:[%s10900_s2 + $0xf8] sm:$0xff] }
  0x23   :  { %375 = vmatpush.msrb.mxu0 %v248_v52  ;;  %401 = vmatpush.msrb.mxu1 %v6567_v5  ;;  %v6842_v5 = vand.u32 4294901760, %v420_v24 }
  0x24   :  { %443 = vmatpush.msrb.mxu2 %v6720_v2  ;;  %507 = vmatpush.msrb.mxu3 %v506_v19 }
  0x25   :  { %379 = vmatpush.msrb.mxu0 %v254_v0  ;;  %403 = vmatpush.msrb.mxu1 %v6580_v10  ;;  %v6850_v10 = vsub.f32 %v420_v24, %v6842_v5  ;;  %v7051_v24 = vand.u32 4294901760, %v120_v16 }
  0x26   :  { %445 = vmatpush.msrb.mxu2 %v6753_v41  ;;  %513 = vmatpush.msrb.mxu3 %v512_v20 }
  0x27   :  { %305 = vmatmul.f32.vlgmr.msra.gmra.mxu2 %v195_v18  ;;  %383 = vmatpush.msrb.mxu0 %v260_v26 }
  0x28   :  { %405 = vmatpush.msrb.mxu1 %v6582_v11  ;;  %447 = vmatpush.msrb.mxu2 %v6755_v42  ;;  %v115_v11 = vld [vmem:[%s10900_s2 + $0xd0] sm:$0x1] }
  0x29   :  { %519 = vmatpush.msrb.mxu3 %v518_v4  ;;  %199 = vmatmul.f32.vlgmr.msra.gmra.mxu0 %v198_v9 }
  0x2a   :  { %337 = vmatmul.f32.vlgmr.msra.gmra.mxu3 %v196_v45  ;;  %534 = vmatpush.msra.mxu0 %v6678_v48 }
  0x2b   :  { %653 = vmatpush.msra.mxu3 %v6653_v38  ;;  %407 = vmatpush.msrb.mxu1 %v6584_v12  ;;  %v452_v12 = vand.u32 4294901760, %v6850_v10 }
  0x2c   :  { %449 = vmatpush.msrb.mxu2 %v6785_v31  ;;  %265 = vmatmul.f32.vlgmr.msra.gmra.mxu1 %v6783_v14 }
  0x2d   :  { %537 = vmatpush.msra.mxu0 %v6705_v60  ;;  %655 = vmatpush.msra.mxu3 %v6684_v51  ;;  %v453_v39 = vsub.f32 %v6850_v10, %v452_v12  ;;  %v124_v60 = vld [vmem:[%s10900_s2 + $0x118] sm:$0x1] }
  0x2e   :  { %607 = vmatpush.msra.mxu2 %v468_v55  ;;  %409 = vmatpush.msrb.mxu1 %v6598_v17  ;;  %v679_v17 = vsel %vm165_vm0, %v115_v11, 0 }
  0x2f   :  { %540 = vmatpush.msra.mxu0 %v6708_v61  ;;  %657 = vmatpush.msra.mxu3 %v6687_v53  ;;  %v6883_v43 = vand.u32 4294901760, %v679_v17  ;;  %v454_v52 = vand.u32 4294901760, %v453_v39 }
  0x30   :  { %611 = vmatpush.msra.mxu2 %v474_v3  ;;  %411 = vmatpush.msrb.mxu1 %v6619_v25  ;;  %v10937_v25 = vand.u32 4294901760, %v6718_v1  ;;  %v110_v3 = vld [vmem:[%s10900_s2 + $0xa8] sm:$0xff] }
  0x31   :  { %543 = vmatpush.msra.mxu0 %v6718_v1  ;;  %659 = vmatpush.msra.mxu3 %v6700_v58  ;;  %v6903_v55 = vsub.f32 %v679_v17, %v6883_v43 }
  0x32   :  { %615 = vmatpush.msra.mxu2 %v480_v7  ;;  %413 = vmatpush.msrb.mxu1 %v6651_v37  ;;  %v114_v37 = vld [vmem:[%s10900_s2 + $0xc8] sm:$0xff]  ;;  %v935_v7 = vsel %vm165_vm0, %v124_v60, 0 }
  0x33   :  { %385 = vmatmul.f32.vlgmr.msrb.gmra.mxu0 %v6783_v14  ;;  %661 = vmatpush.msra.mxu3 %v6710_v62  ;;  %v6898_v48 = vand.u32 4294901760, %v114_v37  ;;  %v6959_v50 = vand.u32 4294901760, %v935_v7 }
  0x34   :  { %573 = vmatpush.msra.mxu1 %v6653_v38  ;;  %546 = vmatpush.msra.mxu0 %v6739_v30  ;;  %v113_v38 = vld [vmem:[%s10900_s2 + $0xc0] sm:$0xff] }
  0x35   :  { %619 = vmatpush.msra.mxu2 %v10937_v25  ;;  %415 = vmatmul.f32.vlgmr.msrb.gmra.mxu1 %v6783_v14  ;;  %v6905_v57 = vand.u32 4294901760, %v113_v38  ;;  %v6925_v61 = vsub.f32 %v114_v37, %v6898_v48  ;;  %v109_v30 = vld [vmem:[%s10900_s2 + $0xa0] sm:$0xff]  ;;  %v122_v14 = vld [vmem:[%s10900_s2 + $0x108] sm:$0xff]  ;;  %v7071_v37 = vand.u32 4294901760, %v119_v29 }
  0x36   :  { %549 = vmatpush.msra.mxu0 %v6747_v35  ;;  %575 = vmatpush.msra.mxu1 %v6684_v51  ;;  %v112_v51 = vld [vmem:[%s10900_s2 + $0xb8] sm:$0xff]  ;;  %v123_v35 = vld [vmem:[%s10900_s2 + $0x110] sm:$0xff]  ;;  %v118_v25 = vld [vmem:[%s10900_s2 + $0xe8] sm:$0xff] }
  0x37   :  { %623 = vmatpush.msra.mxu2 %v492_v47  ;;  %663 = vmatpush.msra.mxu3 %v6720_v2  ;;  %v6927_v0 = vand.u32 4294901760, %v112_v51  ;;  %v6931_v1 = vsub.f32 %v113_v38, %v6905_v57  ;;  %v6956_v47 = vand.u32 4294901760, %v110_v3  ;;  %v730_v49 = vand.u32 4294901760, %v6925_v61 }
  0x38   :  { %552 = vmatpush.msra.mxu0 %v6775_v59  ;;  %577 = vmatpush.msra.mxu1 %v6687_v53  ;;  %v111_v53 = vld [vmem:[%s10900_s2 + $0xb0] sm:$0xff]  ;;  %v6973_v59 = vand.u32 4294901760, %v109_v30 }
  0x39   :  { %627 = vmatpush.msra.mxu2 %v498_v63  ;;  %665 = vmatpush.msra.mxu3 %v6753_v41  ;;  %v6941_v26 = vand.u32 4294901760, %v111_v53  ;;  %v108_v63 = vld [vmem:[%s10900_s2 + $0x98] sm:$0xff]  ;;  %v731_v34 = vsub.f32 %v6925_v61, %v730_v49 }
  0x3a   :  { %555 = vmatpush.msra.mxu0 %v6781_v6  ;;  %579 = vmatpush.msra.mxu1 %v6700_v58  ;;  %v724_v58 = vand.u32 4294901760, %v6903_v55  ;;  %v6978_v6 = vand.u32 4294901760, %v123_v35  ;;  %v7008_v40 = vand.u32 4294901760, %v108_v63  ;;  %v7018_v22 = vsub.f32 %v109_v30, %v6973_v59 }
  0x3b   :  { %631 = vmatpush.msra.mxu2 %v504_v13  ;;  %667 = vmatpush.msra.mxu3 %v6755_v42  ;;  %v6971_v56 = vsub.f32 %v111_v53, %v6941_v26  ;;  %v6994_v13 = vsub.f32 %v110_v3, %v6956_v47  ;;  %v732_v19 = vand.u32 4294901760, %v731_v34  ;;  %v7088_v3 = vsub.f32 %v120_v16, %v7051_v24 }
  0x3c   :  { %455 = vmatmul.f32.vlgmr.msrb.gmra.mxu2 %v454_v52  ;;  %558 = vmatpush.msra.mxu0 %v6799_v27  ;;  %v725_v54 = vsub.f32 %v6903_v55, %v724_v58  ;;  %v6998_v27 = vsub.f32 %v935_v7, %v6959_v50  ;;  %v7024_v45 = vsub.f32 %v123_v35, %v6978_v6  ;;  %v760_v33 = vand.u32 4294901760, %v7018_v22 }
  0x3d   :  { %581 = vmatpush.msra.mxu1 %v6710_v62  ;;  %635 = vmatpush.msra.mxu2 %v510_v46  ;;  %v6954_v62 = vsub.f32 %v112_v51, %v6927_v0  ;;  %v7010_v46 = vand.u32 4294901760, %v122_v14  ;;  %v754_v20 = vand.u32 4294901760, %v6994_v13  ;;  %v7046_v4 = vsub.f32 %v108_v63, %v7008_v40 }
  0x3e   :  { %669 = vmatpush.msra.mxu3 %v6785_v31  ;;  %689 = vmatpush.msrb.mxu0 %v6883_v43  ;;  %v726_v32 = vand.u32 4294901760, %v725_v54  ;;  %v980_v21 = vand.u32 4294901760, %v6998_v27  ;;  %v986_v17 = vand.u32 4294901760, %v7024_v45  ;;  %v7090_v7 = vand.u32 4294901760, %v118_v25 }
  0x3f   :  { %521 = vmatmul.f32.vlgmr.msrb.gmra.mxu3 %v6842_v5  ;;  %583 = vmatpush.msra.mxu1 %v6720_v2  ;;  %v736_v2 = vand.u32 4294901760, %v6931_v1  ;;  %v742_v18 = vand.u32 4294901760, %v6954_v62  ;;  %v7049_v9 = vsub.f32 %v122_v14, %v7010_v46  ;;  %v755_v51 = vsub.f32 %v6994_v13, %v754_v20 }
  0x40   :  { %829 = vmatpush.msrb.mxu3 %v6883_v43  ;;  %639 = vmatpush.msra.mxu2 %v516_v44  ;;  %v748_v44 = vand.u32 4294901760, %v6971_v56  ;;  %v981_v52 = vsub.f32 %v6998_v27, %v980_v21  ;;  %v766_v53 = vand.u32 4294901760, %v7046_v4  ;;  %v987_v35 = vsub.f32 %v7024_v45, %v986_v17 }
  0x41   :  { %691 = vmatpush.msrb.mxu0 %v6898_v48  ;;  %585 = vmatpush.msra.mxu1 %v6753_v41  ;;  %v121_v41 = vld [vmem:[%s10900_s2 + $0x100] sm:$0xff]  ;;  %v737_v36 = vsub.f32 %v6931_v1, %v736_v2  ;;  %v743_v28 = vsub.f32 %v6954_v62, %v742_v18  ;;  %v10905_v60 = vand.u32 4294901760, %v7049_v9  ;;  %v761_v54 = vsub.f32 %v7018_v22, %v760_v33 }
  0x42   :  { %790 = vmatpush.msrb.mxu2 %v6903_v55  ;;  %831 = vmatpush.msrb.mxu3 %v6898_v48  ;;  %v7031_v23 = vand.u32 4294901760, %v121_v41  ;;  %v749_v11 = vsub.f32 %v6971_v56, %v748_v44  ;;  %v756_v15 = vand.u32 4294901760, %v755_v51 }
  0x43   :  { %693 = vmatpush.msrb.mxu0 %v6905_v57  ;;  %587 = vmatpush.msra.mxu1 %v6755_v42  ;;  %v7020_v42 = vand.u32 4294901760, %v107_v8  ;;  %v744_v38 = vand.u32 4294901760, %v743_v28  ;;  %v993_v16 = vsub.f32 %v7049_v9, %v10905_v60  ;;  %v1004_v28 = vand.u32 4294901760, %v7088_v3 }
  0x44   :  { %793 = vmatpush.msrb.mxu2 %v6925_v61  ;;  %833 = vmatpush.msrb.mxu3 %v6905_v57  ;;  %v7069_v39 = vsub.f32 %v121_v41, %v7031_v23  ;;  %v750_v30 = vand.u32 4294901760, %v749_v11  ;;  %v762_v11 = vand.u32 4294901760, %v761_v54 }
  0x45   :  { %641 = vmatmul.f32.vlgmr.msra.gmra.mxu2 %v6842_v5  ;;  %695 = vmatpush.msrb.mxu0 %v6927_v0 }
  0x46   :  { %796 = vmatpush.msrb.mxu2 %v6931_v1  ;;  %835 = vmatpush.msrb.mxu3 %v6927_v0  ;;  %v10904_v14 = vand.u32 4294901760, %v7069_v39 }
  0x47   :  { %589 = vmatpush.msra.mxu1 %v6785_v31  ;;  %561 = vmatmul.f32.vlgmr.msra.gmra.mxu0 %v6850_v10  ;;  %v738_v31 = vand.u32 4294901760, %v737_v36  ;;  %v117_v10 = vld [vmem:[%s10900_s2 + $0xe0] sm:$0xff]  ;;  %v982_v36 = vand.u32 4294901760, %v981_v52 }
  0x48   :  { %671 = vmatmul.f32.vlgmr.msra.gmra.mxu3 %v6842_v5  ;;  %697 = vmatpush.msrb.mxu0 %v6941_v26  ;;  %v7058_v5 = vsub.f32 %v107_v8, %v7020_v42  ;;  %v7104_v8 = vsub.f32 %v119_v29, %v7071_v37  ;;  %v7106_v34 = vand.u32 4294901760, %v117_v10  ;;  %v7123_v29 = vsub.f32 %v118_v25, %v7090_v7 }
  0x49   :  { %727 = vmatpush.msrb.mxu1 %v726_v32  ;;  %799 = vmatpush.msrb.mxu2 %v6954_v62  ;;  %v116_v32 = vld [vmem:[%s10900_s2 + $0xd8] sm:$0xff]  ;;  %v999_v51 = vsub.f32 %v7069_v39, %v10904_v14  ;;  %v1005_v14 = vsub.f32 %v7088_v3, %v1004_v28 }
  0x4a   :  { %837 = vmatpush.msrb.mxu3 %v6941_v26  ;;  %593 = vmatmul.f32.vlgmr.msra.gmra.mxu1 %v452_v12  ;;  %v83_v12 = vld [vmem:[#allocation2 + $0x18] sm:$0x1]  ;;  %v772_v63 = vand.u32 4294901760, %v7058_v5  ;;  %v7128_v52 = vand.u32 4294901760, %v116_v32  ;;  %v1016_v60 = vand.u32 4294901760, %v7123_v29 }
  0x4b   :  { %699 = vmatpush.msrb.mxu0 %v6956_v47  ;;  %733 = vmatpush.msrb.mxu1 %v732_v19  ;;  %v676_v41 = vsel %vm161_vm1, %v83_v12, 0  ;;  %v767_v19 = vsub.f32 %v7046_v4, %v766_v53  ;;  %v1010_v12 = vand.u32 4294901760, %v7104_v8  ;;  %v1006_v61 = vand.u32 4294901760, %v1005_v14 }
  0x4c   :  { %802 = vmatpush.msrb.mxu2 %v6971_v56  ;;  %839 = vmatpush.msrb.mxu3 %v6956_v47  ;;  %v773_v25 = vsub.f32 %v7058_v5, %v772_v63 }
  0x4d   :  { %701 = vmatpush.msrb.mxu0 %v6973_v59  ;;  %739 = vmatpush.msrb.mxu1 %v738_v31  ;;  %v988_v31 = vand.u32 4294901760, %v987_v35  ;;  %v994_v35 = vand.u32 4294901760, %v993_v16  ;;  %v768_v54 = vand.u32 4294901760, %v767_v19  ;;  %v141_v19 = vld [vmem:[%s10900_s2 + $0x1a0] sm:$0xff] }
  0x4e   :  { %805 = vmatpush.msrb.mxu2 %v6994_v13  ;;  %841 = vmatpush.msrb.mxu3 %v6973_v59 }
  0x4f   :  { %703 = vmatpush.msrb.mxu0 %v7008_v40  ;;  %745 = vmatpush.msrb.mxu1 %v744_v38  ;;  %v7126_v38 = vand.u32 4294901760, %v676_v41 }
  0x50   :  { %808 = vmatpush.msrb.mxu2 %v7018_v22  ;;  %843 = vmatpush.msrb.mxu3 %v7008_v40  ;;  %v68_v22 = vld [vmem:[%s10901_s3 + $0x120] sm:$0xff] }
  0x51   :  { %705 = vmatpush.msrb.mxu0 %v7020_v42  ;;  %751 = vmatpush.msrb.mxu1 %v750_v30  ;;  %v7140_v30 = vsub.f32 %v117_v10, %v7106_v34  ;;  %v707_v55 = vsub.f32 %v676_v41, %v7126_v38  ;;  %v1000_v10 = vand.u32 4294901760, %v999_v51  ;;  %69 = vst [vmem:[#allocation2 + $0x8] sm:$0xff] %v68_v22 }
  0x52   :  { %811 = vmatpush.msrb.mxu2 %v7046_v4  ;;  %845 = vmatpush.msrb.mxu3 %v7020_v42 }
  0x53   :  { %863 = vmatpush.msra.mxu0 %v724_v58  ;;  %757 = vmatpush.msrb.mxu1 %v756_v15  ;;  %v7154_v58 = vsub.f32 %v116_v32, %v7128_v52  ;;  %v1011_v15 = vsub.f32 %v7104_v8, %v1010_v12  ;;  %v1022_v16 = vand.u32 4294901760, %v7140_v30  ;;  %v708_v32 = vand.u32 4294901760, %v707_v55 }
  0x54   :  { %983 = vmatpush.msra.mxu3 %v982_v36  ;;  %814 = vmatpush.msrb.mxu2 %v7058_v5  ;;  %v774_v36 = vand.u32 4294901760, %v773_v25  ;;  %v126_v25 = vld [vmem:[%s10900_s2 + $0x128] sm:$0xff] }
  0x55   :  { %867 = vmatpush.msra.mxu0 %v730_v49  ;;  %763 = vmatpush.msrb.mxu1 %v762_v11  ;;  %v1017_v49 = vsub.f32 %v7123_v29, %v1016_v60  ;;  %v1028_v41 = vand.u32 4294901760, %v7154_v58  ;;  %v1012_v1 = vand.u32 4294901760, %v1011_v15  ;;  %v709_v14 = vsub.f32 %v707_v55, %v708_v32 }
  0x56   :  { %945 = vmatpush.msra.mxu2 %v6959_v50  ;;  %989 = vmatpush.msra.mxu3 %v988_v31 }
  0x57   :  { %871 = vmatpush.msra.mxu0 %v736_v2  ;;  %769 = vmatpush.msrb.mxu1 %v768_v54  ;;  %v1023_v2 = vsub.f32 %v7140_v30, %v1022_v16  ;;  %v1018_v62 = vand.u32 4294901760, %v1017_v49  ;;  %v70_v49 = vld [vmem:[%s10901_s3 + $0x168] sm:$0xff] }
  0x58   :  { %947 = vmatpush.msra.mxu2 %v6978_v6  ;;  %995 = vmatpush.msra.mxu3 %v994_v35  ;;  %v125_v35 = vld [vmem:[%s10900_s2 + $0x120] sm:$0xff]  ;;  %71 = vst [vmem:[#allocation2 + $0x20] sm:$0xff] %v70_v49 }
  0x59   :  { %875 = vmatpush.msra.mxu0 %v742_v18  ;;  %775 = vmatpush.msrb.mxu1 %v774_v36  ;;  %v1029_v18 = vsub.f32 %v7154_v58, %v1028_v41  ;;  %v1024_v56 = vand.u32 4294901760, %v1023_v2  ;;  %v138_v2 = vld [vmem:[%s10900_s2 + $0x188] sm:$0xff] }
  0x5a   :  { %949 = vmatpush.msra.mxu2 %v7010_v46  ;;  %1001 = vmatpush.msra.mxu3 %v1000_v10 }
  0x5b   :  { %879 = vmatpush.msra.mxu0 %v748_v44  ;;  %909 = vmatpush.msra.mxu1 %v6883_v43  ;;  %v84_v44 = vld [vmem:[#allocation2 + $0x10] sm:$0x1]  ;;  %v1030_v43 = vand.u32 4294901760, %v1029_v18 }
  0x5c   :  { %951 = vmatpush.msra.mxu2 %v7031_v23  ;;  %1007 = vmatpush.msra.mxu3 %v1006_v61  ;;  %v932_v13 = vsel %vm161_vm1, %v84_v44, 0 }
  0x5d   :  { %883 = vmatpush.msra.mxu0 %v754_v20  ;;  %911 = vmatpush.msra.mxu1 %v6898_v48  ;;  %v710_v48 = vand.u32 4294901760, %v709_v14 }
  0x5e   :  { %953 = vmatpush.msra.mxu2 %v7051_v24  ;;  %1013 = vmatpush.msra.mxu3 %v1012_v1 }
  0x5f   :  { %887 = vmatpush.msra.mxu0 %v760_v33  ;;  %913 = vmatpush.msra.mxu1 %v6905_v57  ;;  %v7197_v57 = vand.u32 4294901760, %v932_v13 }
  0x60   :  { %955 = vmatpush.msra.mxu2 %v7071_v37  ;;  %1019 = vmatpush.msra.mxu3 %v1018_v62 }
  0x61   :  { %891 = vmatpush.msra.mxu0 %v766_v53  ;;  %915 = vmatpush.msra.mxu1 %v6927_v0  ;;  %v7205_v0 = vsub.f32 %v932_v13, %v7197_v57 }
  0x62   :  { %957 = vmatpush.msra.mxu2 %v7090_v7  ;;  %1025 = vmatpush.msra.mxu3 %v1024_v56 }
  0x63   :  { %817 = vmatmul.f32.vlgmr.msrb.gmra.mxu2 %v707_v55  ;;  %895 = vmatpush.msra.mxu0 %v772_v63 }
  0x64   :  { %917 = vmatpush.msra.mxu1 %v6941_v26  ;;  %959 = vmatpush.msra.mxu2 %v7106_v34  ;;  %v133_v26 = vld [vmem:[%s10900_s2 + $0x160] sm:$0x1] }
  0x65   :  { %1031 = vmatpush.msra.mxu3 %v1030_v43  ;;  %711 = vmatmul.f32.vlgmr.msrb.gmra.mxu0 %v710_v48  ;;  %v137_v43 = vld [vmem:[%s10900_s2 + $0x180] sm:$0xff] }
  0x66   :  { %849 = vmatmul.f32.vlgmr.msrb.gmra.mxu3 %v708_v32  ;;  %1046 = vmatpush.msrb.mxu0 %v6998_v27  ;;  %v10938_v27 = vand.u32 4294901760, %v7049_v9 }
  0x67   :  { %1165 = vmatpush.msrb.mxu3 %v6959_v50  ;;  %919 = vmatpush.msra.mxu1 %v6956_v47  ;;  %v964_v47 = vand.u32 4294901760, %v7205_v0 }
  0x68   :  { %961 = vmatpush.msra.mxu2 %v7128_v52  ;;  %777 = vmatmul.f32.vlgmr.msrb.gmra.mxu1 %v7126_v38 }
  0x69   :  { %1049 = vmatpush.msrb.mxu0 %v7024_v45  ;;  %1167 = vmatpush.msrb.mxu3 %v6978_v6  ;;  %v965_v45 = vsub.f32 %v7205_v0, %v964_v47 }
  0x6a   :  { %1119 = vmatpush.msrb.mxu2 %v980_v21  ;;  %921 = vmatpush.msra.mxu1 %v6973_v59  ;;  %v1191_v59 = vsel %vm165_vm0, %v133_v26, 0  ;;  %v7406_v26 = vand.u32 4294901760, %v138_v2 }
  0x6b   :  { %1052 = vmatpush.msrb.mxu0 %v7049_v9  ;;  %1169 = vmatpush.msrb.mxu3 %v7010_v46  ;;  %v7238_v21 = vand.u32 4294901760, %v1191_v59  ;;  %v966_v4 = vand.u32 4294901760, %v965_v45 }
  0x6c   :  { %1123 = vmatpush.msrb.mxu2 %v986_v17  ;;  %923 = vmatpush.msra.mxu1 %v7008_v40  ;;  %v10939_v40 = vand.u32 4294901760, %v7069_v39  ;;  %v142_v17 = vld [vmem:[%s10900_s2 + $0x1a8] sm:$0x1] }
  0x6d   :  { %1055 = vmatpush.msrb.mxu0 %v7069_v39  ;;  %1171 = vmatpush.msrb.mxu3 %v7031_v23  ;;  %v7258_v9 = vsub.f32 %v1191_v59, %v7238_v21 }
  0x6e   :  { %1127 = vmatpush.msrb.mxu2 %v10938_v27  ;;  %925 = vmatpush.msra.mxu1 %v7020_v42  ;;  %v132_v42 = vld [vmem:[%s10900_s2 + $0x158] sm:$0xff] }
  0x6f   :  { %897 = vmatmul.f32.vlgmr.msra.gmra.mxu0 %v7126_v38  ;;  %1173 = vmatpush.msrb.mxu3 %v7051_v24  ;;  %v7253_v20 = vand.u32 4294901760, %v132_v42 }
  0x70   :  { %1085 = vmatpush.msrb.mxu1 %v6959_v50  ;;  %1058 = vmatpush.msrb.mxu0 %v7088_v3  ;;  %v131_v50 = vld [vmem:[%s10900_s2 + $0x150] sm:$0xff]  ;;  %v128_v3 = vld [vmem:[%s10900_s2 + $0x138] sm:$0xff] }
  0x71   :  { %1131 = vmatpush.msrb.mxu2 %v10939_v40  ;;  %927 = vmatmul.f32.vlgmr.msra.gmra.mxu1 %v7126_v38  ;;  %v7260_v5 = vand.u32 4294901760, %v131_v50  ;;  %v7280_v33 = vsub.f32 %v132_v42, %v7253_v20  ;;  %v136_v40 = vld [vmem:[%s10900_s2 + $0x178] sm:$0xff]  ;;  %v7426_v42 = vand.u32 4294901760, %v137_v43 }
  0x72   :  { %1061 = vmatpush.msrb.mxu0 %v7104_v8  ;;  %1087 = vmatpush.msrb.mxu1 %v6978_v6  ;;  %v130_v6 = vld [vmem:[%s10900_s2 + $0x148] sm:$0xff]  ;;  %v127_v8 = vld [vmem:[%s10900_s2 + $0x130] sm:$0xff] }
  0x73   :  { %1135 = vmatpush.msrb.mxu2 %v1004_v28  ;;  %1175 = vmatpush.msrb.mxu3 %v7071_v37  ;;  %v7282_v39 = vand.u32 4294901760, %v130_v6  ;;  %v7286_v53 = vsub.f32 %v131_v50, %v7260_v5  ;;  %v7311_v28 = vand.u32 4294901760, %v128_v3  ;;  %v7328_v51 = vand.u32 4294901760, %v127_v8 }
  0x74   :  { %1064 = vmatpush.msrb.mxu0 %v7123_v29  ;;  %1089 = vmatpush.msrb.mxu1 %v7010_v46  ;;  %v129_v46 = vld [vmem:[%s10900_s2 + $0x140] sm:$0xff]  ;;  %v1242_v29 = vand.u32 4294901760, %v7280_v33 }
  0x75   :  { %1139 = vmatpush.msrb.mxu2 %v1010_v12  ;;  %1177 = vmatpush.msrb.mxu3 %v7090_v7  ;;  %v7296_v63 = vand.u32 4294901760, %v129_v46  ;;  %v7333_v12 = vand.u32 4294901760, %v141_v19  ;;  %v7349_v55 = vsub.f32 %v128_v3, %v7311_v28  ;;  %v7443_v3 = vsub.f32 %v138_v2, %v7406_v26 }
  0x76   :  { %1067 = vmatpush.msrb.mxu0 %v7140_v30  ;;  %1091 = vmatpush.msrb.mxu1 %v7031_v23  ;;  %v1236_v23 = vand.u32 4294901760, %v7258_v9  ;;  %v140_v30 = vld [vmem:[%s10900_s2 + $0x198] sm:$0xff]  ;;  %v1243_v54 = vsub.f32 %v7280_v33, %v1242_v29 }
  0x77   :  { %1143 = vmatpush.msrb.mxu2 %v1016_v60  ;;  %1179 = vmatpush.msrb.mxu3 %v7106_v34  ;;  %v1447_v60 = vsel %vm165_vm0, %v142_v17, 0  ;;  %v7326_v38 = vsub.f32 %v129_v46, %v7296_v63  ;;  %v7365_v61 = vand.u32 4294901760, %v140_v30  ;;  %v7379_v1 = vsub.f32 %v141_v19, %v7333_v12 }
  0x78   :  { %967 = vmatmul.f32.vlgmr.msra.gmra.mxu2 %v966_v4  ;;  %1070 = vmatpush.msrb.mxu0 %v7154_v58  ;;  %v7314_v31 = vand.u32 4294901760, %v1447_v60  ;;  %v1237_v11 = vsub.f32 %v7258_v9, %v1236_v23  ;;  %v1244_v18 = vand.u32 4294901760, %v1243_v54  ;;  %v1266_v44 = vand.u32 4294901760, %v7349_v55 }
  0x79   :  { %1093 = vmatpush.msrb.mxu1 %v7051_v24  ;;  %1147 = vmatpush.msrb.mxu2 %v1022_v16  ;;  %v7309_v24 = vsub.f32 %v130_v6, %v7282_v39  ;;  %v7363_v16 = vand.u32 4294901760, %v126_v25  ;;  %v1260_v32 = vand.u32 4294901760, %v7326_v38  ;;  %v7404_v13 = vsub.f32 %v140_v30, %v7365_v61 }
  0x7a   :  { %1181 = vmatpush.msrb.mxu3 %v7128_v52  ;;  %1201 = vmatpush.msra.mxu0 %v7238_v21  ;;  %v7353_v10 = vsub.f32 %v1447_v60, %v7314_v31  ;;  %v1238_v36 = vand.u32 4294901760, %v1237_v11  ;;  %v1498_v59 = vand.u32 4294901760, %v7379_v1  ;;  %v1267_v6 = vsub.f32 %v7349_v55, %v1266_v44 }
  0x7b   :  { %1033 = vmatmul.f32.vlgmr.msra.gmra.mxu3 %v7197_v57  ;;  %1095 = vmatpush.msrb.mxu1 %v7071_v37  ;;  %v1248_v37 = vand.u32 4294901760, %v7286_v53  ;;  %v1254_v58 = vand.u32 4294901760, %v7309_v24  ;;  %v7401_v48 = vsub.f32 %v126_v25, %v7363_v16  ;;  %v1261_v27 = vsub.f32 %v7326_v38, %v1260_v32 }
  0x7c   :  { %1341 = vmatpush.msra.mxu3 %v7238_v21  ;;  %1151 = vmatpush.msrb.mxu2 %v1028_v41  ;;  %v7373_v41 = vsub.f32 %v127_v8, %v7328_v51  ;;  %v1492_v56 = vand.u32 4294901760, %v7353_v10  ;;  %v10907_v17 = vand.u32 4294901760, %v7404_v13  ;;  %v7445_v60 = vand.u32 4294901760, %v136_v40 }
  0x7d   :  { %1203 = vmatpush.msra.mxu0 %v7253_v20  ;;  %1097 = vmatpush.msrb.mxu1 %v7090_v7  ;;  %v139_v7 = vld [vmem:[%s10900_s2 + $0x190] sm:$0xff]  ;;  %v1249_v15 = vsub.f32 %v7286_v53, %v1248_v37  ;;  %v1255_v14 = vsub.f32 %v7309_v24, %v1254_v58  ;;  %v1278_v46 = vand.u32 4294901760, %v7401_v48  ;;  %v1262_v8 = vand.u32 4294901760, %v1261_v27 }
  0x7e   :  { %1302 = vmatpush.msra.mxu2 %v7258_v9  ;;  %1343 = vmatpush.msra.mxu3 %v7253_v20  ;;  %v7386_v62 = vand.u32 4294901760, %v139_v7  ;;  %v1272_v22 = vand.u32 4294901760, %v7373_v41  ;;  %v1493_v4 = vsub.f32 %v7353_v10, %v1492_v56  ;;  %v1499_v19 = vsub.f32 %v7379_v1, %v1498_v59 }
  0x7f   :  { %1205 = vmatpush.msra.mxu0 %v7260_v5  ;;  %1099 = vmatpush.msrb.mxu1 %v7106_v34  ;;  %v7375_v34 = vand.u32 4294901760, %v125_v35  ;;  %v1256_v50 = vand.u32 4294901760, %v1255_v14  ;;  %v1268_v49 = vand.u32 4294901760, %v1267_v6  ;;  %v1505_v2 = vsub.f32 %v7404_v13, %v10907_v17 }
  0x80   :  { %1305 = vmatpush.msra.mxu2 %v7280_v33  ;;  %1345 = vmatpush.msra.mxu3 %v7260_v5  ;;  %v7424_v45 = vsub.f32 %v139_v7, %v7386_v62  ;;  %v1273_v11 = vsub.f32 %v7373_v41, %v1272_v22  ;;  %v1516_v14 = vand.u32 4294901760, %v7443_v3 }
  0x81   :  { %1153 = vmatmul.f32.vlgmr.msrb.gmra.mxu2 %v7197_v57  ;;  %1207 = vmatpush.msra.mxu0 %v7282_v39 }
  0x82   :  { %1308 = vmatpush.msra.mxu2 %v7286_v53  ;;  %1347 = vmatpush.msra.mxu3 %v7282_v39  ;;  %v10906_v30 = vand.u32 4294901760, %v7424_v45  ;;  %v1274_v27 = vand.u32 4294901760, %v1273_v11 }
  0x83   :  { %1101 = vmatpush.msrb.mxu1 %v7128_v52  ;;  %1073 = vmatmul.f32.vlgmr.msrb.gmra.mxu0 %v7205_v0  ;;  %v1250_v52 = vand.u32 4294901760, %v1249_v15  ;;  %v135_v0 = vld [vmem:[%s10900_s2 + $0x170] sm:$0xff]  ;;  %v1494_v15 = vand.u32 4294901760, %v1493_v4 }
  0x84   :  { %1183 = vmatmul.f32.vlgmr.msrb.gmra.mxu3 %v7197_v57  ;;  %1209 = vmatpush.msra.mxu0 %v7296_v63  ;;  %v7413_v57 = vsub.f32 %v125_v35, %v7375_v34  ;;  %v7459_v35 = vsub.f32 %v137_v43, %v7426_v42  ;;  %v7461_v54 = vand.u32 4294901760, %v135_v0  ;;  %v7478_v43 = vsub.f32 %v136_v40, %v7445_v60 }
  0x85   :  { %1239 = vmatpush.msra.mxu1 %v1238_v36  ;;  %1311 = vmatpush.msra.mxu2 %v7309_v24  ;;  %v134_v36 = vld [vmem:[%s10900_s2 + $0x168] sm:$0xff]  ;;  %v1511_v6 = vsub.f32 %v7424_v45, %v10906_v30  ;;  %v1517_v30 = vsub.f32 %v7443_v3, %v1516_v14 }
  0x86   :  { %1349 = vmatpush.msra.mxu3 %v7296_v63  ;;  %1105 = vmatmul.f32.vlgmr.msrb.gmra.mxu1 %v964_v47  ;;  %v85_v47 = vld [vmem:[#allocation2 + $0x8] sm:$0x1]  ;;  %v1284_v25 = vand.u32 4294901760, %v7413_v57  ;;  %v7483_v4 = vand.u32 4294901760, %v134_v36  ;;  %v1528_v17 = vand.u32 4294901760, %v7478_v43 }
  0x87   :  { %1211 = vmatpush.msra.mxu0 %v7311_v28  ;;  %1245 = vmatpush.msra.mxu1 %v1244_v18  ;;  %v1188_v7 = vsel %vm161_vm1, %v85_v47, 0  ;;  %v1279_v18 = vsub.f32 %v7401_v48, %v1278_v46  ;;  %v1522_v47 = vand.u32 4294901760, %v7459_v35  ;;  %v1518_v33 = vand.u32 4294901760, %v1517_v30 }
  0x88   :  { %1314 = vmatpush.msra.mxu2 %v7326_v38  ;;  %1351 = vmatpush.msra.mxu3 %v7311_v28  ;;  %v1285_v40 = vsub.f32 %v7413_v57, %v1284_v25 }
  0x89   :  { %1213 = vmatpush.msra.mxu0 %v7328_v51  ;;  %1251 = vmatpush.msra.mxu1 %v1250_v52  ;;  %v1500_v52 = vand.u32 4294901760, %v1499_v19  ;;  %v1506_v19 = vand.u32 4294901760, %v1505_v2  ;;  %v1280_v11 = vand.u32 4294901760, %v1279_v18  ;;  %v159_v18 = vld [vmem:[%s10900_s2 + $0x230] sm:$0xff] }
  0x8a   :  { %1317 = vmatpush.msra.mxu2 %v7349_v55  ;;  %1353 = vmatpush.msra.mxu3 %v7328_v51 }
  0x8b   :  { %1215 = vmatpush.msra.mxu0 %v7363_v16  ;;  %1257 = vmatpush.msra.mxu1 %v1256_v50  ;;  %v7481_v50 = vand.u32 4294901760, %v1188_v7 }
  0x8c   :  { %1320 = vmatpush.msra.mxu2 %v7373_v41  ;;  %1355 = vmatpush.msra.mxu3 %v7363_v16  ;;  %v72_v41 = vld [vmem:[%s10901_s3 + $0x1b0] sm:$0xff] }
  0x8d   :  { %1217 = vmatpush.msra.mxu0 %v7375_v34  ;;  %1263 = vmatpush.msra.mxu1 %v1262_v8  ;;  %v7495_v8 = vsub.f32 %v135_v0, %v7461_v54  ;;  %v1219_v9 = vsub.f32 %v1188_v7, %v7481_v50  ;;  %v1512_v0 = vand.u32 4294901760, %v1511_v6  ;;  %73 = vst [vmem:[#allocation2 + $0x28] sm:$0xff] %v72_v41 }
  0x8e   :  { %1323 = vmatpush.msra.mxu2 %v7401_v48  ;;  %1357 = vmatpush.msra.mxu3 %v7375_v34 }
  0x8f   :  { %1375 = vmatpush.msrb.mxu0 %v1236_v23  ;;  %1269 = vmatpush.msra.mxu1 %v1268_v49  ;;  %v7509_v23 = vsub.f32 %v134_v36, %v7483_v4  ;;  %v1523_v49 = vsub.f32 %v7459_v35, %v1522_v47  ;;  %v1534_v2 = vand.u32 4294901760, %v7495_v8  ;;  %v1220_v36 = vand.u32 4294901760, %v1219_v9 }
  0x90   :  { %1495 = vmatpush.msrb.mxu3 %v1494_v15  ;;  %1326 = vmatpush.msra.mxu2 %v7413_v57  ;;  %v1286_v15 = vand.u32 4294901760, %v1285_v40  ;;  %v144_v40 = vld [vmem:[%s10900_s2 + $0x1b8] sm:$0xff] }
  0x91   :  { %1379 = vmatpush.msrb.mxu0 %v1242_v29  ;;  %1275 = vmatpush.msra.mxu1 %v1274_v27  ;;  %v1529_v29 = vsub.f32 %v7478_v43, %v1528_v17  ;;  %v1540_v7 = vand.u32 4294901760, %v7509_v23  ;;  %v1524_v53 = vand.u32 4294901760, %v1523_v49  ;;  %v1221_v30 = vsub.f32 %v1219_v9, %v1220_v36 }
  0x92   :  { %1457 = vmatpush.msrb.mxu2 %v7314_v31  ;;  %1501 = vmatpush.msrb.mxu3 %v1500_v52 }
  0x93   :  { %1383 = vmatpush.msrb.mxu0 %v1248_v37  ;;  %1281 = vmatpush.msra.mxu1 %v1280_v11  ;;  %v1535_v37 = vsub.f32 %v7495_v8, %v1534_v2  ;;  %v1530_v24 = vand.u32 4294901760, %v1529_v29  ;;  %v74_v29 = vld [vmem:[%s10901_s3 + $0x1f8] sm:$0xff] }
  0x94   :  { %1459 = vmatpush.msrb.mxu2 %v7333_v12  ;;  %1507 = vmatpush.msrb.mxu3 %v1506_v19  ;;  %v143_v19 = vld [vmem:[%s10900_s2 + $0x1b0] sm:$0xff]  ;;  %75 = vst [vmem:[#allocation2 + $0x38] sm:$0xff] %v74_v29 }
  0x95   :  { %1387 = vmatpush.msrb.mxu0 %v1254_v58  ;;  %1287 = vmatpush.msra.mxu1 %v1286_v15  ;;  %v1541_v58 = vsub.f32 %v7509_v23, %v1540_v7  ;;  %v1536_v38 = vand.u32 4294901760, %v1535_v37  ;;  %v156_v37 = vld [vmem:[%s10900_s2 + $0x218] sm:$0xff] }
  0x96   :  { %1461 = vmatpush.msrb.mxu2 %v7365_v61  ;;  %1513 = vmatpush.msrb.mxu3 %v1512_v0 }
  0x97   :  { %1391 = vmatpush.msrb.mxu0 %v1260_v32  ;;  %1421 = vmatpush.msrb.mxu1 %v7238_v21  ;;  %v86_v32 = vld [vmem:[#allocation2 + $0x20] sm:$0x1]  ;;  %v1542_v21 = vand.u32 4294901760, %v1541_v58 }
  0x98   :  { %1463 = vmatpush.msrb.mxu2 %v7386_v62  ;;  %1519 = vmatpush.msrb.mxu3 %v1518_v33  ;;  %v1444_v55 = vsel %vm161_vm1, %v86_v32, 0 }
  0x99   :  { %1395 = vmatpush.msrb.mxu0 %v1266_v44  ;;  %1423 = vmatpush.msrb.mxu1 %v7253_v20  ;;  %v1222_v20 = vand.u32 4294901760, %v1221_v30 }
  0x9a   :  { %1465 = vmatpush.msrb.mxu2 %v7406_v26  ;;  %1525 = vmatpush.msrb.mxu3 %v1524_v53 }
  0x9b   :  { %1399 = vmatpush.msrb.mxu0 %v1272_v22  ;;  %1425 = vmatpush.msrb.mxu1 %v7260_v5  ;;  %v7552_v5 = vand.u32 4294901760, %v1444_v55 }
  0x9c   :  { %1467 = vmatpush.msrb.mxu2 %v7426_v42  ;;  %1531 = vmatpush.msrb.mxu3 %v1530_v24 }
  0x9d   :  { %1403 = vmatpush.msrb.mxu0 %v1278_v46  ;;  %1427 = vmatpush.msrb.mxu1 %v7282_v39  ;;  %v7560_v39 = vsub.f32 %v1444_v55, %v7552_v5 }
  0x9e   :  { %1469 = vmatpush.msrb.mxu2 %v7445_v60  ;;  %1537 = vmatpush.msrb.mxu3 %v1536_v38 }
  0x9f   :  { %1329 = vmatmul.f32.vlgmr.msra.gmra.mxu2 %v1219_v9  ;;  %1407 = vmatpush.msrb.mxu0 %v1284_v25 }
  0xa0   :  { %1429 = vmatpush.msrb.mxu1 %v7296_v63  ;;  %1471 = vmatpush.msrb.mxu2 %v7461_v54  ;;  %v151_v63 = vld [vmem:[%s10900_s2 + $0x1f0] sm:$0x1] }
  0xa1   :  { %1543 = vmatpush.msrb.mxu3 %v1542_v21  ;;  %1223 = vmatmul.f32.vlgmr.msra.gmra.mxu0 %v1222_v20  ;;  %v155_v21 = vld [vmem:[%s10900_s2 + $0x210] sm:$0xff] }
  0xa2   :  { %1361 = vmatmul.f32.vlgmr.msra.gmra.mxu3 %v1220_v36  ;;  %1558 = vmatpush.msra.mxu0 %v7353_v10  ;;  %v10940_v10 = vand.u32 4294901760, %v7404_v13 }
  0xa3   :  { %1677 = vmatpush.msra.mxu3 %v7314_v31  ;;  %1431 = vmatpush.msrb.mxu1 %v7311_v28  ;;  %v1476_v28 = vand.u32 4294901760, %v7560_v39 }
  0xa4   :  { %1473 = vmatpush.msrb.mxu2 %v7483_v4  ;;  %1289 = vmatmul.f32.vlgmr.msra.gmra.mxu1 %v7481_v50 }
  0xa5   :  { %1561 = vmatpush.msra.mxu0 %v7379_v1  ;;  %1679 = vmatpush.msra.mxu3 %v7333_v12  ;;  %v1477_v1 = vsub.f32 %v7560_v39, %v1476_v28 }
  0xa6   :  { %1631 = vmatpush.msra.mxu2 %v1492_v56  ;;  %1433 = vmatpush.msrb.mxu1 %v7328_v51  ;;  %v1703_v51 = vsel %vm165_vm0, %v151_v63, 0  ;;  %v7761_v63 = vand.u32 4294901760, %v156_v37 }
  0xa7   :  { %1564 = vmatpush.msra.mxu0 %v7404_v13  ;;  %1681 = vmatpush.msra.mxu3 %v7365_v61  ;;  %v7593_v56 = vand.u32 4294901760, %v1703_v51  ;;  %v1478_v48 = vand.u32 4294901760, %v1477_v1 }
  0xa8   :  { %1635 = vmatpush.msra.mxu2 %v1498_v59  ;;  %1435 = vmatpush.msrb.mxu1 %v7363_v16  ;;  %v10941_v16 = vand.u32 4294901760, %v7424_v45  ;;  %v160_v59 = vld [vmem:[%s10900_s2 + $0x238] sm:$0x1] }
  0xa9   :  { %1567 = vmatpush.msra.mxu0 %v7424_v45  ;;  %1683 = vmatpush.msra.mxu3 %v7386_v62  ;;  %v7613_v13 = vsub.f32 %v1703_v51, %v7593_v56 }
  0xaa   :  { %1639 = vmatpush.msra.mxu2 %v10940_v10  ;;  %1437 = vmatpush.msrb.mxu1 %v7375_v34  ;;  %v150_v34 = vld [vmem:[%s10900_s2 + $0x1e8] sm:$0xff] }
  0xab   :  { %1409 = vmatmul.f32.vlgmr.msrb.gmra.mxu0 %v7481_v50  ;;  %1685 = vmatpush.msra.mxu3 %v7406_v26  ;;  %v7608_v44 = vand.u32 4294901760, %v150_v34 }
  0xac   :  { %1597 = vmatpush.msra.mxu1 %v7314_v31  ;;  %1570 = vmatpush.msra.mxu0 %v7443_v3  ;;  %v149_v31 = vld [vmem:[%s10900_s2 + $0x1e0] sm:$0xff]  ;;  %v146_v3 = vld [vmem:[%s10900_s2 + $0x1c8] sm:$0xff] }
  0xad   :  { %1643 = vmatpush.msra.mxu2 %v10941_v16  ;;  %1439 = vmatmul.f32.vlgmr.msrb.gmra.mxu1 %v7481_v50  ;;  %v7615_v57 = vand.u32 4294901760, %v149_v31  ;;  %v7635_v22 = vsub.f32 %v150_v34, %v7608_v44  ;;  %v154_v16 = vld [vmem:[%s10900_s2 + $0x208] sm:$0xff]  ;;  %v7781_v34 = vand.u32 4294901760, %v155_v21 }
  0xae   :  { %1573 = vmatpush.msra.mxu0 %v7459_v35  ;;  %1599 = vmatpush.msra.mxu1 %v7333_v12  ;;  %v148_v12 = vld [vmem:[%s10900_s2 + $0x1d8] sm:$0xff]  ;;  %v145_v35 = vld [vmem:[%s10900_s2 + $0x1c0] sm:$0xff] }
  0xaf   :  { %1647 = vmatpush.msra.mxu2 %v1516_v14  ;;  %1687 = vmatpush.msra.mxu3 %v7426_v42  ;;  %v7637_v45 = vand.u32 4294901760, %v148_v12  ;;  %v7641_v46 = vsub.f32 %v149_v31, %v7615_v57  ;;  %v7666_v14 = vand.u32 4294901760, %v146_v3  ;;  %v7683_v6 = vand.u32 4294901760, %v145_v35 }
  0xb0   :  { %1576 = vmatpush.msra.mxu0 %v7478_v43  ;;  %1601 = vmatpush.msra.mxu1 %v7365_v61  ;;  %v147_v61 = vld [vmem:[%s10900_s2 + $0x1d0] sm:$0xff]  ;;  %v1754_v43 = vand.u32 4294901760, %v7635_v22 }
  0xb1   :  { %1651 = vmatpush.msra.mxu2 %v1522_v47  ;;  %1689 = vmatpush.msra.mxu3 %v7445_v60  ;;  %v7651_v25 = vand.u32 4294901760, %v147_v61  ;;  %v7688_v47 = vand.u32 4294901760, %v159_v18  ;;  %v7704_v9 = vsub.f32 %v146_v3, %v7666_v14  ;;  %v7798_v3 = vsub.f32 %v156_v37, %v7761_v63 }
  0xb2   :  { %1579 = vmatpush.msra.mxu0 %v7495_v8  ;;  %1603 = vmatpush.msra.mxu1 %v7386_v62  ;;  %v1748_v62 = vand.u32 4294901760, %v7613_v13  ;;  %v158_v8 = vld [vmem:[%s10900_s2 + $0x228] sm:$0xff]  ;;  %v1755_v11 = vsub.f32 %v7635_v22, %v1754_v43 }
  0xb3   :  { %1655 = vmatpush.msra.mxu2 %v1528_v17  ;;  %1691 = vmatpush.msra.mxu3 %v7461_v54  ;;  %v1959_v17 = vsel %vm165_vm0, %v160_v59, 0  ;;  %v7681_v50 = vsub.f32 %v147_v61, %v7651_v25  ;;  %v7720_v33 = vand.u32 4294901760, %v158_v8  ;;  %v7734_v53 = vsub.f32 %v159_v18, %v7688_v47 }
  0xb4   :  { %1479 = vmatmul.f32.vlgmr.msrb.gmra.mxu2 %v1478_v48  ;;  %1582 = vmatpush.msra.mxu0 %v7509_v23  ;;  %v7669_v52 = vand.u32 4294901760, %v1959_v17  ;;  %v1749_v27 = vsub.f32 %v7613_v13, %v1748_v62  ;;  %v1756_v58 = vand.u32 4294901760, %v1755_v11  ;;  %v1778_v32 = vand.u32 4294901760, %v7704_v9 }
  0xb5   :  { %1605 = vmatpush.msra.mxu1 %v7406_v26  ;;  %1659 = vmatpush.msra.mxu2 %v1534_v2  ;;  %v7664_v26 = vsub.f32 %v148_v12, %v7637_v45  ;;  %v7718_v2 = vand.u32 4294901760, %v144_v40  ;;  %v1772_v36 = vand.u32 4294901760, %v7681_v50  ;;  %v7759_v55 = vsub.f32 %v158_v8, %v7720_v33 }
  0xb6   :  { %1693 = vmatpush.msra.mxu3 %v7483_v4  ;;  %1713 = vmatpush.msrb.mxu0 %v7593_v56  ;;  %v7708_v0 = vsub.f32 %v1959_v17, %v7669_v52  ;;  %v1750_v15 = vand.u32 4294901760, %v1749_v27  ;;  %v2010_v51 = vand.u32 4294901760, %v7734_v53  ;;  %v1779_v12 = vsub.f32 %v7704_v9, %v1778_v32 }
  0xb7   :  { %1545 = vmatmul.f32.vlgmr.msrb.gmra.mxu3 %v7552_v5  ;;  %1607 = vmatpush.msra.mxu1 %v7426_v42  ;;  %v1760_v42 = vand.u32 4294901760, %v7641_v46  ;;  %v1766_v23 = vand.u32 4294901760, %v7664_v26  ;;  %v7756_v20 = vsub.f32 %v144_v40, %v7718_v2  ;;  %v1773_v10 = vsub.f32 %v7681_v50, %v1772_v36 }
  0xb8   :  { %1853 = vmatpush.msrb.mxu3 %v7593_v56  ;;  %1663 = vmatpush.msra.mxu2 %v1540_v7  ;;  %v7728_v7 = vsub.f32 %v145_v35, %v7683_v6  ;;  %v2004_v38 = vand.u32 4294901760, %v7708_v0  ;;  %v10909_v59 = vand.u32 4294901760, %v7759_v55  ;;  %v7800_v17 = vand.u32 4294901760, %v154_v16 }
  0xb9   :  { %1715 = vmatpush.msrb.mxu0 %v7608_v44  ;;  %1609 = vmatpush.msra.mxu1 %v7445_v60  ;;  %v157_v60 = vld [vmem:[%s10900_s2 + $0x220] sm:$0xff]  ;;  %v1761_v49 = vsub.f32 %v7641_v46, %v1760_v42  ;;  %v1767_v30 = vsub.f32 %v7664_v26, %v1766_v23  ;;  %v1790_v61 = vand.u32 4294901760, %v7756_v20  ;;  %v1774_v35 = vand.u32 4294901760, %v1773_v10 }
  0xba   :  { %1814 = vmatpush.msrb.mxu2 %v7613_v13  ;;  %1855 = vmatpush.msrb.mxu3 %v7608_v44  ;;  %v7741_v24 = vand.u32 4294901760, %v157_v60  ;;  %v1784_v41 = vand.u32 4294901760, %v7728_v7  ;;  %v2005_v48 = vsub.f32 %v7708_v0, %v2004_v38  ;;  %v2011_v18 = vsub.f32 %v7734_v53, %v2010_v51 }
  0xbb   :  { %1717 = vmatpush.msrb.mxu0 %v7615_v57  ;;  %1611 = vmatpush.msra.mxu1 %v7461_v54  ;;  %v7730_v54 = vand.u32 4294901760, %v143_v19  ;;  %v1768_v31 = vand.u32 4294901760, %v1767_v30  ;;  %v1780_v29 = vand.u32 4294901760, %v1779_v12  ;;  %v2017_v37 = vsub.f32 %v7759_v55, %v10909_v59 }
  0xbc   :  { %1817 = vmatpush.msrb.mxu2 %v7635_v22  ;;  %1857 = vmatpush.msrb.mxu3 %v7615_v57  ;;  %v7779_v1 = vsub.f32 %v157_v60, %v7741_v24  ;;  %v1785_v27 = vsub.f32 %v7728_v7, %v1784_v41  ;;  %v2028_v30 = vand.u32 4294901760, %v7798_v3 }
  0xbd   :  { %1665 = vmatmul.f32.vlgmr.msra.gmra.mxu2 %v7552_v5  ;;  %1719 = vmatpush.msrb.mxu0 %v7637_v45 }
  0xbe   :  { %1820 = vmatpush.msrb.mxu2 %v7641_v46  ;;  %1859 = vmatpush.msrb.mxu3 %v7637_v45  ;;  %v10908_v8 = vand.u32 4294901760, %v7779_v1  ;;  %v1786_v10 = vand.u32 4294901760, %v1785_v27 }
  0xbf   :  { %1613 = vmatpush.msra.mxu1 %v7483_v4  ;;  %1585 = vmatmul.f32.vlgmr.msra.gmra.mxu0 %v7560_v39  ;;  %v1762_v4 = vand.u32 4294901760, %v1761_v49  ;;  %v153_v39 = vld [vmem:[%s10900_s2 + $0x200] sm:$0xff]  ;;  %v2006_v49 = vand.u32 4294901760, %v2005_v48 }
  0xc0   :  { %1695 = vmatmul.f32.vlgmr.msra.gmra.mxu3 %v7552_v5  ;;  %1721 = vmatpush.msrb.mxu0 %v7651_v25  ;;  %v7768_v5 = vsub.f32 %v143_v19, %v7730_v54  ;;  %v7814_v19 = vsub.f32 %v155_v21, %v7781_v34  ;;  %v7816_v11 = vand.u32 4294901760, %v153_v39  ;;  %v7833_v21 = vsub.f32 %v154_v16, %v7800_v17 }
  0xc1   :  { %1751 = vmatpush.msrb.mxu1 %v1750_v15  ;;  %1823 = vmatpush.msrb.mxu2 %v7664_v26  ;;  %v152_v15 = vld [vmem:[%s10900_s2 + $0x1f8] sm:$0xff]  ;;  %v2023_v12 = vsub.f32 %v7779_v1, %v10908_v8  ;;  %v2029_v8 = vsub.f32 %v7798_v3, %v2028_v30 }
  0xc2   :  { %1861 = vmatpush.msrb.mxu3 %v7651_v25  ;;  %1617 = vmatmul.f32.vlgmr.msra.gmra.mxu1 %v1476_v28  ;;  %v87_v28 = vld [vmem:[#allocation2 + $0x28] sm:$0x1]  ;;  %v1796_v40 = vand.u32 4294901760, %v7768_v5  ;;  %v7838_v48 = vand.u32 4294901760, %v152_v15  ;;  %v2040_v59 = vand.u32 4294901760, %v7833_v21 }
  0xc3   :  { %1723 = vmatpush.msrb.mxu0 %v7666_v14  ;;  %1757 = vmatpush.msrb.mxu1 %v1756_v58  ;;  %v1700_v60 = vsel %vm161_vm1, %v87_v28, 0  ;;  %v1791_v58 = vsub.f32 %v7756_v20, %v1790_v61  ;;  %v2034_v28 = vand.u32 4294901760, %v7814_v19  ;;  %v2030_v22 = vand.u32 4294901760, %v2029_v8 }
  0xc4   :  { %1826 = vmatpush.msrb.mxu2 %v7681_v50  ;;  %1863 = vmatpush.msrb.mxu3 %v7666_v14  ;;  %v1797_v16 = vsub.f32 %v7768_v5, %v1796_v40 }
  0xc5   :  { %1725 = vmatpush.msrb.mxu0 %v7683_v6  ;;  %1763 = vmatpush.msrb.mxu1 %v1762_v4  ;;  %v2012_v4 = vand.u32 4294901760, %v2011_v18  ;;  %v2018_v18 = vand.u32 4294901760, %v2017_v37  ;;  %v1792_v27 = vand.u32 4294901760, %v1791_v58 }
  0xc6   :  { %1829 = vmatpush.msrb.mxu2 %v7704_v9  ;;  %1865 = vmatpush.msrb.mxu3 %v7683_v6 }
  0xc7   :  { %1727 = vmatpush.msrb.mxu0 %v7718_v2  ;;  %1769 = vmatpush.msrb.mxu1 %v1768_v31  ;;  %v7836_v31 = vand.u32 4294901760, %v1700_v60 }
  0xc8   :  { %1832 = vmatpush.msrb.mxu2 %v7728_v7  ;;  %1867 = vmatpush.msrb.mxu3 %v7718_v2 }
  0xc9   :  { %1729 = vmatpush.msrb.mxu0 %v7730_v54  ;;  %1775 = vmatpush.msrb.mxu1 %v1774_v35  ;;  %v7850_v35 = vsub.f32 %v153_v39, %v7816_v11  ;;  %v1731_v13 = vsub.f32 %v1700_v60, %v7836_v31  ;;  %v2024_v39 = vand.u32 4294901760, %v2023_v12 }
  0xca   :  { %1835 = vmatpush.msrb.mxu2 %v7756_v20  ;;  %1869 = vmatpush.msrb.mxu3 %v7730_v54  ;;  %v306_v20 = vpop.f32.mrf.mxu2 }
  0xcb   :  { %1887 = vmatpush.msra.mxu0 %v1748_v62  ;;  %1781 = vmatpush.msrb.mxu1 %v1780_v29  ;;  %v7864_v62 = vsub.f32 %v152_v15, %v7838_v48  ;;  %v2035_v29 = vsub.f32 %v7814_v19, %v2034_v28  ;;  %v2046_v37 = vand.u32 4294901760, %v7850_v35  ;;  %v1732_v15 = vand.u32 4294901760, %v1731_v13 }
  0xcc   :  { %2007 = vmatpush.msra.mxu3 %v2006_v49  ;;  %1838 = vmatpush.msrb.mxu2 %v7768_v5  ;;  %v1798_v49 = vand.u32 4294901760, %v1797_v16 }
  0xcd   :  { %1891 = vmatpush.msra.mxu0 %v1754_v43  ;;  %1787 = vmatpush.msrb.mxu1 %v1786_v10  ;;  %v2041_v43 = vsub.f32 %v7833_v21, %v2040_v59  ;;  %v2052_v60 = vand.u32 4294901760, %v7864_v62  ;;  %v2036_v46 = vand.u32 4294901760, %v2035_v29  ;;  %v1733_v8 = vsub.f32 %v1731_v13, %v1732_v15 }
  0xce   :  { %1969 = vmatpush.msra.mxu2 %v7669_v52  ;;  %2013 = vmatpush.msra.mxu3 %v2012_v4 }
  0xcf   :  { %1895 = vmatpush.msra.mxu0 %v1760_v42  ;;  %1793 = vmatpush.msrb.mxu1 %v1792_v27  ;;  %v2047_v42 = vsub.f32 %v7850_v35, %v2046_v37  ;;  %v2042_v26 = vand.u32 4294901760, %v2041_v43  ;;  %v2214_v27 = vld [vmem:[%s10899_s1 + $0x18] sm:$0xff] }
  0xd0   :  { %1971 = vmatpush.msra.mxu2 %v7688_v47  ;;  %2019 = vmatpush.msra.mxu3 %v2018_v18  ;;  %v8029_v43 = vand.u32 4294901760, %v2214_v27 }
  0xd1   :  { %1899 = vmatpush.msra.mxu0 %v1766_v23  ;;  %1799 = vmatpush.msrb.mxu1 %v1798_v49  ;;  %v2053_v23 = vsub.f32 %v7864_v62, %v2052_v60  ;;  %v2048_v50 = vand.u32 4294901760, %v2047_v42  ;;  %v2226_v42 = vld [vmem:[%s10899_s1 + $0x78] sm:$0xff] }
  0xd2   :  { %1973 = vmatpush.msra.mxu2 %v7720_v33  ;;  %2025 = vmatpush.msra.mxu3 %v2024_v39  ;;  %v456_v39 = vpop.f32.mrf.mxu2 }
  0xd3   :  { %1903 = vmatpush.msra.mxu0 %v1772_v36  ;;  %1933 = vmatpush.msra.mxu1 %v7593_v56  ;;  %v88_v36 = vld [vmem:[#allocation2 + $0x38] sm:$0x1]  ;;  %v2054_v56 = vand.u32 4294901760, %v2053_v23 }
  0xd4   :  { %1975 = vmatpush.msra.mxu2 %v7741_v24  ;;  %2031 = vmatpush.msra.mxu3 %v2030_v22  ;;  %v1956_v9 = vsel %vm161_vm1, %v88_v36, 0 }
  0xd5   :  { %1907 = vmatpush.msra.mxu0 %v1778_v32  ;;  %1935 = vmatpush.msra.mxu1 %v7608_v44  ;;  %v1734_v44 = vand.u32 4294901760, %v1733_v8  ;;  %v266_v32 = vpop.f32.mrf.mxu1  ;;  %v7907_v7 = vand.u32 4294901760, %v1956_v9 }
  0xd6   :  { %1977 = vmatpush.msra.mxu2 %v7761_v63  ;;  %2037 = vmatpush.msra.mxu3 %v2036_v46 }
  0xd7   :  { %1911 = vmatpush.msra.mxu0 %v1784_v41  ;;  %1937 = vmatpush.msra.mxu1 %v7615_v57  ;;  %v200_v57 = vpop.f32.mrf.mxu0  ;;  %v338_v41 = vpop.f32.mrf.mxu3 }
  0xd8   :  { %1979 = vmatpush.msra.mxu2 %v7781_v34  ;;  %2043 = vmatpush.msra.mxu3 %v2042_v26  ;;  %v2212_v26 = vld [vmem:[%s10899_s1 + $0x8] sm:$0xff] }
  0xd9   :  { %1915 = vmatpush.msra.mxu0 %v1790_v61  ;;  %1939 = vmatpush.msra.mxu1 %v7637_v45  ;;  %v267_v45 = vadd.f32 %v266_v32, %v200_v57 }
  0xda   :  { %1981 = vmatpush.msra.mxu2 %v7800_v17  ;;  %2049 = vmatpush.msra.mxu3 %v2048_v50 }
  0xdb   :  { %1841 = vmatmul.f32.vlgmr.msrb.gmra.mxu2 %v1731_v13  ;;  %1919 = vmatpush.msra.mxu0 %v1796_v40  ;;  %v307_v5 = vadd.f32 %v306_v20, %v267_v45  ;;  %v8073_v45 = vsub.f32 %v2214_v27, %v8029_v43 }
  0xdc   :  { %1941 = vmatpush.msra.mxu1 %v7651_v25  ;;  %1983 = vmatpush.msra.mxu2 %v7816_v11  ;;  %v7915_v25 = vsub.f32 %v1956_v9, %v7907_v7  ;;  %v2225_v9 = vld [vmem:[%s10899_s1 + $0x70] sm:$0xff] }
  0xdd   :  { %2055 = vmatpush.msra.mxu3 %v2054_v56  ;;  %1735 = vmatmul.f32.vlgmr.msrb.gmra.mxu0 %v1734_v44 }
  0xde   :  { %1873 = vmatmul.f32.vlgmr.msrb.gmra.mxu3 %v1732_v15  ;;  %2070 = vmatpush.msrb.mxu0 %v7708_v0  ;;  %v1988_v0 = vand.u32 4294901760, %v7915_v25 }
  0xdf   :  { %2189 = vmatpush.msrb.mxu3 %v7669_v52  ;;  %1943 = vmatpush.msra.mxu1 %v7666_v14  ;;  %v2219_v14 = vld [vmem:[%s10899_s1 + $0x40] sm:$0x1]  ;;  %v386_v40 = vpop.f32.mrf.mxu0  ;;  %v522_v18 = vpop.f32.mrf.mxu3 }
  0xe0   :  { %1985 = vmatpush.msra.mxu2 %v7838_v48  ;;  %1801 = vmatmul.f32.vlgmr.msrb.gmra.mxu1 %v7836_v31  ;;  %v2287_v61 = vsel %vm165_vm0, %v2219_v14, 0  ;;  %v523_v29 = vadd.f32 %v522_v18, %v456_v39  ;;  %v8083_v14 = vand.u32 4294901760, %v2212_v26 }
  0xe1   :  { %2073 = vmatpush.msrb.mxu0 %v7734_v53  ;;  %2191 = vmatpush.msrb.mxu3 %v7688_v47  ;;  %v10943_v53 = vand.u32 4294901760, %v7779_v1 }
  0xe2   :  { %2143 = vmatpush.msrb.mxu2 %v2004_v38  ;;  %1945 = vmatpush.msra.mxu1 %v7683_v6  ;;  %v339_v38 = vadd.f32 %v338_v41, %v307_v5  ;;  %v10942_v6 = vand.u32 4294901760, %v7759_v55  ;;  %v8079_v5 = vand.u32 4294901760, %v2226_v42 }
  0xe3   :  { %2076 = vmatpush.msrb.mxu0 %v7759_v55  ;;  %2193 = vmatpush.msrb.mxu3 %v7720_v33  ;;  %v1989_v55 = vsub.f32 %v7915_v25, %v1988_v0 }
  0xe4   :  { %2147 = vmatpush.msrb.mxu2 %v2010_v51  ;;  %1947 = vmatpush.msra.mxu1 %v7718_v2  ;;  %v2218_v2 = vld [vmem:[%s10899_s1 + $0x38] sm:$0xff]  ;;  %v7948_v51 = vand.u32 4294901760, %v2287_v61 }
  0xe5   :  { %2079 = vmatpush.msrb.mxu0 %v7779_v1  ;;  %2195 = vmatpush.msrb.mxu3 %v7741_v24  ;;  %v7954_v58 = vand.u32 4294901760, %v2218_v2  ;;  %v2217_v1 = vld [vmem:[%s10899_s1 + $0x30] sm:$0xff]  ;;  %v1990_v4 = vand.u32 4294901760, %v1989_v55 }
  0xe6   :  { %2151 = vmatpush.msrb.mxu2 %v10942_v6  ;;  %1949 = vmatpush.msra.mxu1 %v7730_v54  ;;  %v387_v54 = vadd.f32 %v386_v40, %v339_v38  ;;  %v7965_v10 = vsub.f32 %v2287_v61, %v7948_v51  ;;  %v8094_v40 = vand.u32 4294901760, %v2225_v9 }
  0xe7   :  { %1921 = vmatmul.f32.vlgmr.msra.gmra.mxu0 %v7836_v31  ;;  %2197 = vmatpush.msrb.mxu3 %v7761_v63  ;;  %v562_v22 = vpop.f32.mrf.mxu0 }
  0xe8   :  { %2109 = vmatpush.msrb.mxu1 %v7669_v52  ;;  %2082 = vmatpush.msrb.mxu0 %v7798_v3  ;;  %v416_v52 = vpop.f32.mrf.mxu1  ;;  %v7973_v3 = vand.u32 4294901760, %v2217_v1  ;;  %v2332_v16 = vand.u32 4294901760, %v7965_v10  ;;  %v563_v36 = vadd.f32 %v562_v22, %v523_v29  ;;  %v8132_v27 = vsub.f32 %v2225_v9, %v8094_v40 }
  0xe9   :  { %2155 = vmatpush.msrb.mxu2 %v10943_v53  ;;  %1951 = vmatmul.f32.vlgmr.msra.gmra.mxu1 %v7836_v31  ;;  %v417_v31 = vadd.f32 %v416_v52, %v387_v54 }
  0xea   :  { %2085 = vmatpush.msrb.mxu0 %v7814_v19  ;;  %2111 = vmatpush.msrb.mxu1 %v7688_v47  ;;  %v2216_v47 = vld [vmem:[%s10899_s1 + $0x28] sm:$0xff]  ;;  %v2215_v19 = vld [vmem:[%s10899_s1 + $0x20] sm:$0xff] }
  0xeb   :  { %2159 = vmatpush.msrb.mxu2 %v2028_v30  ;;  %2199 = vmatpush.msrb.mxu3 %v7781_v34  ;;  %v7981_v30 = vsub.f32 %v2218_v2, %v7954_v58  ;;  %v7989_v12 = vand.u32 4294901760, %v2216_v47  ;;  %v2224_v2 = vld [vmem:[%s10899_s1 + $0x68] sm:$0xff] }
  0xec   :  { %2088 = vmatpush.msrb.mxu0 %v7833_v21  ;;  %2113 = vmatpush.msrb.mxu1 %v7720_v33  ;;  %v2228_v33 = vld [vmem:[%s10899_s1 + $0x88] sm:$0x1]  ;;  %v8001_v21 = vand.u32 4294901760, %v2215_v19 }
  0xed   :  { %2163 = vmatpush.msrb.mxu2 %v2034_v28  ;;  %2201 = vmatpush.msrb.mxu3 %v7800_v17  ;;  %v2284_v28 = vsel %vm161_vm1, %v417_v31, 0  ;;  %v2338_v13 = vand.u32 4294901760, %v7981_v30  ;;  %v642_v31 = vpop.f32.mrf.mxu2 }
  0xee   :  { %2091 = vmatpush.msrb.mxu0 %v7850_v35  ;;  %2115 = vmatpush.msrb.mxu1 %v7741_v24  ;;  %v2543_v24 = vsel %vm165_vm0, %v2228_v33, 0  ;;  %v8016_v49 = vand.u32 4294901760, %v2284_v28  ;;  %v8032_v15 = vsub.f32 %v2215_v19, %v8001_v21  ;;  %v8122_v33 = vsub.f32 %v2212_v26, %v8083_v14  ;;  %v672_v26 = vpop.f32.mrf.mxu3 }
  0xef   :  { %2167 = vmatpush.msrb.mxu2 %v2040_v59  ;;  %2203 = vmatpush.msrb.mxu3 %v7816_v11  ;;  %v7999_v59 = vsub.f32 %v2217_v1, %v7973_v3  ;;  %v8014_v35 = vand.u32 4294901760, %v2543_v24  ;;  %v2339_v46 = vsub.f32 %v7981_v30, %v2338_v13  ;;  %v8124_v19 = vand.u32 4294901760, %v2224_v2 }
  0xf0   :  { %1991 = vmatmul.f32.vlgmr.msra.gmra.mxu2 %v1990_v4  ;;  %2094 = vmatpush.msrb.mxu0 %v7864_v62  ;;  %v2213_v62 = vld [vmem:[%s10899_s1 + $0x10] sm:$0xff]  ;;  %v8058_v50 = vsub.f32 %v2284_v28, %v8016_v49  ;;  %v594_v32 = vpop.f32.mrf.mxu1  ;;  %v2356_v20 = vand.u32 4294901760, %v8032_v15  ;;  %v2362_v4 = vand.u32 4294901760, %v8073_v45 }
  0xf1   :  { %2117 = vmatpush.msrb.mxu1 %v7761_v63  ;;  %2171 = vmatpush.msrb.mxu2 %v2046_v37  ;;  %v8012_v63 = vsub.f32 %v2216_v47, %v7989_v12  ;;  %v2333_v37 = vsub.f32 %v7965_v10, %v2332_v16  ;;  %v8062_v44 = vand.u32 4294901760, %v2213_v62  ;;  %v2340_v41 = vand.u32 4294901760, %v2339_v46 }
  0xf2   :  { %2205 = vmatpush.msrb.mxu3 %v7838_v48  ;;  %2297 = vmatpush.msra.mxu0 %v7948_v51  ;;  %v2316_v53 = vand.u32 4294901760, %v8058_v50  ;;  %v2357_v1 = vsub.f32 %v8032_v15, %v2356_v20  ;;  %v8113_v47 = vsub.f32 %v2226_v42, %v8079_v5  ;;  %v2221_v42 = vld [vmem:[%s10899_s1 + $0x50] sm:$0xff] }
  0xf3   :  { %2057 = vmatmul.f32.vlgmr.msra.gmra.mxu3 %v7907_v7  ;;  %2119 = vmatpush.msrb.mxu1 %v7781_v34  ;;  %v2227_v34 = vld [vmem:[%s10899_s1 + $0x80] sm:$0xff]  ;;  %v2350_v23 = vand.u32 4294901760, %v8012_v63  ;;  %v2334_v56 = vand.u32 4294901760, %v2333_v37  ;;  %v8103_v55 = vsub.f32 %v2213_v62, %v8062_v44  ;;  %v2363_v62 = vsub.f32 %v8073_v45, %v2362_v4 }
  0xf4   :  { %2437 = vmatpush.msra.mxu3 %v7948_v51  ;;  %2175 = vmatpush.msrb.mxu2 %v2052_v60  ;;  %v2344_v60 = vand.u32 4294901760, %v7999_v59  ;;  %v8055_v8 = vand.u32 4294901760, %v2227_v34  ;;  %v2358_v22 = vand.u32 4294901760, %v2357_v1  ;;  %v10911_v46 = vand.u32 4294901760, %v8113_v47 }
  0xf5   :  { %2299 = vmatpush.msra.mxu0 %v7954_v58  ;;  %2121 = vmatpush.msrb.mxu1 %v7800_v17  ;;  %v8053_v17 = vsub.f32 %v2543_v24, %v8014_v35  ;;  %v2351_v38 = vsub.f32 %v8012_v63, %v2350_v23  ;;  %v2368_v29 = vand.u32 4294901760, %v8103_v55 }
  0xf6   :  { %2398 = vmatpush.msra.mxu2 %v7965_v10  ;;  %2439 = vmatpush.msra.mxu3 %v7954_v58  ;;  %v2345_v57 = vsub.f32 %v7999_v59, %v2344_v60  ;;  %v8092_v61 = vsub.f32 %v2227_v34, %v8055_v8 }
  0xf7   :  { %2301 = vmatpush.msra.mxu0 %v7973_v3  ;;  %2123 = vmatpush.msrb.mxu1 %v7816_v11  ;;  %v2211_v11 = vld [vmem:[%s10899_s1] sm:$0xff]  ;;  %v2588_v6 = vand.u32 4294901760, %v8053_v17  ;;  %v2352_v24 = vand.u32 4294901760, %v2351_v38  ;;  %v2369_v38 = vsub.f32 %v8103_v55, %v2368_v29 }
  0xf8   :  { %2401 = vmatpush.msra.mxu2 %v7981_v30  ;;  %2441 = vmatpush.msra.mxu3 %v7973_v3  ;;  %v8105_v54 = vand.u32 4294901760, %v2211_v11  ;;  %v2346_v52 = vand.u32 4294901760, %v2345_v57  ;;  %v10910_v18 = vand.u32 4294901760, %v8092_v61 }
  0xf9   :  { %2177 = vmatmul.f32.vlgmr.msrb.gmra.mxu2 %v7907_v7  ;;  %2303 = vmatpush.msra.mxu0 %v7989_v12  ;;  %v2589_v28 = vsub.f32 %v8053_v17, %v2588_v6 }
  0xfa   :  { %2404 = vmatpush.msra.mxu2 %v7999_v59  ;;  %2443 = vmatpush.msra.mxu3 %v7989_v12  ;;  %v8143_v39 = vsub.f32 %v2211_v11, %v8105_v54  ;;  %v2595_v57 = vsub.f32 %v8092_v61, %v10910_v18  ;;  %v2606_v11 = vand.u32 4294901760, %v8132_v27 }
  0xfb   :  { %2125 = vmatpush.msrb.mxu1 %v7838_v48  ;;  %2097 = vmatmul.f32.vlgmr.msrb.gmra.mxu0 %v7915_v25  ;;  %v595_v48 = vadd.f32 %v594_v32, %v563_v36  ;;  %v2222_v25 = vld [vmem:[%s10899_s1 + $0x58] sm:$0xff]  ;;  %v2374_v36 = vand.u32 4294901760, %v8122_v33  ;;  %v2590_v32 = vand.u32 4294901760, %v2589_v28  ;;  %v2601_v28 = vsub.f32 %v8113_v47, %v10911_v46 }
  0xfc   :  { %2207 = vmatmul.f32.vlgmr.msrb.gmra.mxu3 %v7907_v7  ;;  %2305 = vmatpush.msra.mxu0 %v8001_v21  ;;  %v2223_v7 = vld [vmem:[%s10899_s1 + $0x60] sm:$0xff]  ;;  %v8162_v9 = vand.u32 4294901760, %v2222_v25 }
  0xfd   :  { %2335 = vmatpush.msra.mxu1 %v2334_v56  ;;  %2407 = vmatpush.msra.mxu2 %v8012_v63  ;;  %v8146_v37 = vand.u32 4294901760, %v2223_v7  ;;  %v643_v34 = vadd.f32 %v642_v31, %v595_v48  ;;  %v8160_v56 = vsub.f32 %v2224_v2, %v8124_v19  ;;  %v2380_v2 = vand.u32 4294901760, %v8143_v39 }
  0xfe   :  { %2445 = vmatpush.msra.mxu3 %v8001_v21  ;;  %2129 = vmatmul.f32.vlgmr.msrb.gmra.mxu1 %v1988_v0  ;;  %v2317_v0 = vsub.f32 %v8058_v50, %v2316_v53 }
  0xff   :  { %2307 = vmatpush.msra.mxu0 %v8029_v43  ;;  %2341 = vmatpush.msra.mxu1 %v2340_v41  ;;  %v2220_v41 = vld [vmem:[%s10899_s1 + $0x48] sm:$0xff]  ;;  %v8179_v48 = vsub.f32 %v2223_v7, %v8146_v37  ;;  %v673_v1 = vadd.f32 %v672_v26, %v643_v34  ;;  %v2375_v7 = vsub.f32 %v8122_v33, %v2374_v36  ;;  %v2612_v18 = vand.u32 4294901760, %v8160_v56 }
 0x100   :  { %2410 = vmatpush.msra.mxu2 %v8032_v15  ;;  %2447 = vmatpush.msra.mxu3 %v8029_v43  ;;  %v2318_v31 = vand.u32 4294901760, %v2317_v0  ;;  %v8194_v34 = vsub.f32 %v2222_v25, %v8162_v9  ;;  %v2596_v0 = vand.u32 4294901760, %v2595_v57  ;;  %v2370_v26 = vand.u32 4294901760, %v2369_v38 }
 0x101   :  { %2309 = vmatpush.msra.mxu0 %v8062_v44  ;;  %2347 = vmatpush.msra.mxu1 %v2346_v52  ;;  %v8181_v52 = vand.u32 4294901760, %v2221_v42  ;;  %v2381_v25 = vsub.f32 %v8143_v39, %v2380_v2  ;;  %v2618_v46 = vand.u32 4294901760, %v8179_v48  ;;  %v2602_v57 = vand.u32 4294901760, %v2601_v28 }
 0x102   :  { %2413 = vmatpush.msra.mxu2 %v8073_v45  ;;  %2449 = vmatpush.msra.mxu3 %v8062_v44  ;;  %v2376_v10 = vand.u32 4294901760, %v2375_v7  ;;  %v712_v45 = vpop.f32.mrf.mxu0 }
 0x103   :  { %2311 = vmatpush.msra.mxu0 %v8083_v14  ;;  %2353 = vmatpush.msra.mxu1 %v2352_v24  ;;  %v2364_v24 = vand.u32 4294901760, %v2363_v62  ;;  %v2607_v62 = vsub.f32 %v8132_v27, %v2606_v11  ;;  %v2382_v30 = vand.u32 4294901760, %v2381_v25 }
 0x104   :  { %2416 = vmatpush.msra.mxu2 %v8103_v55  ;;  %2451 = vmatpush.msra.mxu3 %v8083_v14  ;;  %v818_v55 = vpop.f32.mrf.mxu2 }
 0x105   :  { %2313 = vmatpush.msra.mxu0 %v8105_v54  ;;  %2359 = vmatpush.msra.mxu1 %v2358_v22  ;;  %v8196_v22 = vand.u32 4294901760, %v2220_v41  ;;  %v2608_v38 = vand.u32 4294901760, %v2607_v62 }
 0x106   :  { %2419 = vmatpush.msra.mxu2 %v8122_v33  ;;  %2453 = vmatpush.msra.mxu3 %v8105_v54  ;;  %v10944_v33 = vand.u32 4294901760, %v8092_v61 }
 0x107   :  { %2319 = vmatmul.f32.vlgmr.msra.gmra.mxu0 %v2318_v31  ;;  %2457 = vmatmul.f32.vlgmr.msra.gmra.mxu3 %v2316_v53  ;;  %v8210_v31 = vsub.f32 %v2221_v42, %v8181_v52  ;;  %v2540_v53 = vsel %vm161_vm1, %v673_v1, 0  ;;  %v8222_v42 = vsub.f32 %v2220_v41, %v8196_v22 }
 0x108   :  { %2471 = vmatpush.msrb.mxu0 %v2332_v16  ;;  %2591 = vmatpush.msrb.mxu3 %v2590_v32  ;;  %v2613_v16 = vsub.f32 %v8160_v56, %v2612_v18  ;;  %v2624_v32 = vand.u32 4294901760, %v8194_v34  ;;  %v8225_v1 = vand.u32 4294901760, %v2540_v53 }
 0x109   :  { %2365 = vmatpush.msra.mxu1 %v2364_v24  ;;  %2422 = vmatpush.msra.mxu2 %v8143_v39 }
 0x10a   :  { %2425 = vmatmul.f32.vlgmr.msra.gmra.mxu2 %v8058_v50  ;;  %2475 = vmatpush.msrb.mxu0 %v2338_v13  ;;  %v2619_v13 = vsub.f32 %v8179_v48, %v2618_v46  ;;  %v2630_v50 = vand.u32 4294901760, %v8210_v31  ;;  %v2614_v41 = vand.u32 4294901760, %v2613_v16  ;;  %v2625_v59 = vsub.f32 %v8194_v34, %v2624_v32 }
 0x10b   :  { %2553 = vmatpush.msrb.mxu2 %v8014_v35  ;;  %2597 = vmatpush.msrb.mxu3 %v2596_v0  ;;  %v8242_v24 = vsub.f32 %v2540_v53, %v8225_v1  ;;  %v778_v0 = vpop.f32.mrf.mxu1 }
 0x10c   :  { %2371 = vmatpush.msra.mxu1 %v2370_v26  ;;  %2479 = vmatpush.msrb.mxu0 %v2344_v60  ;;  %v2636_v60 = vand.u32 4294901760, %v8222_v42  ;;  %v2620_v28 = vand.u32 4294901760, %v2619_v13  ;;  %v2631_v63 = vsub.f32 %v8210_v31, %v2630_v50  ;;  %v2232_v26 = vld [vmem:[%s10899_s1 + $0xa8] sm:$0xff] }
 0x10d   :  { %2555 = vmatpush.msrb.mxu2 %v8055_v8  ;;  %2603 = vmatpush.msrb.mxu3 %v2602_v57  ;;  %v2572_v15 = vand.u32 4294901760, %v8242_v24  ;;  %v2245_v57 = vld [vmem:[%s10899_s1 + $0x110] sm:$0xff] }
 0x10e   :  { %2377 = vmatpush.msra.mxu1 %v2376_v10  ;;  %2483 = vmatpush.msrb.mxu0 %v2350_v23  ;;  %v2626_v23 = vand.u32 4294901760, %v2625_v59  ;;  %v2637_v7 = vsub.f32 %v8222_v42, %v2636_v60  ;;  %v8409_v59 = vand.u32 4294901760, %v2245_v57 }
 0x10f   :  { %2557 = vmatpush.msrb.mxu2 %v8079_v5  ;;  %2609 = vmatpush.msrb.mxu3 %v2608_v38  ;;  %v2231_v38 = vld [vmem:[%s10899_s1 + $0xa0] sm:$0xff] }
 0x110   :  { %2383 = vmatpush.msra.mxu1 %v2382_v30  ;;  %2487 = vmatpush.msrb.mxu0 %v2356_v20  ;;  %v2632_v20 = vand.u32 4294901760, %v2631_v63 }
 0x111   :  { %2385 = vmatmul.f32.vlgmr.msra.gmra.mxu1 %v8016_v49  ;;  %2559 = vmatpush.msrb.mxu2 %v8094_v40 }
 0x112   :  { %2517 = vmatpush.msrb.mxu1 %v7948_v51  ;;  %2615 = vmatpush.msrb.mxu3 %v2614_v41  ;;  %v2638_v51 = vand.u32 4294901760, %v2637_v7 }
 0x113   :  { %2491 = vmatpush.msrb.mxu0 %v2362_v4  ;;  %2561 = vmatpush.msrb.mxu2 %v8124_v19 }
 0x114   :  { %2519 = vmatpush.msrb.mxu1 %v7954_v58  ;;  %2621 = vmatpush.msrb.mxu3 %v2620_v28  ;;  %v2573_v58 = vsub.f32 %v8242_v24, %v2572_v15  ;;  %v8416_v28 = vand.u32 4294901760, %v2231_v38 }
 0x115   :  { %2495 = vmatpush.msrb.mxu0 %v2368_v29  ;;  %2563 = vmatpush.msrb.mxu2 %v8146_v37  ;;  %v928_v29 = vpop.f32.mrf.mxu1 }
 0x116   :  { %2521 = vmatpush.msrb.mxu1 %v7973_v3  ;;  %2627 = vmatpush.msrb.mxu3 %v2626_v23  ;;  %v779_v3 = vadd.f32 %v778_v0, %v712_v45  ;;  %v2243_v23 = vld [vmem:[%s10899_s1 + $0x100] sm:$0xff] }
 0x117   :  { %2499 = vmatpush.msrb.mxu0 %v2374_v36  ;;  %2565 = vmatpush.msrb.mxu2 %v8162_v9 }
 0x118   :  { %2523 = vmatpush.msrb.mxu1 %v7989_v12  ;;  %2633 = vmatpush.msrb.mxu3 %v2632_v20  ;;  %v2574_v12 = vand.u32 4294901760, %v2573_v58  ;;  %v819_v4 = vadd.f32 %v818_v55, %v779_v3 }
 0x119   :  { %2503 = vmatpush.msrb.mxu0 %v2380_v2  ;;  %2567 = vmatpush.msrb.mxu2 %v8181_v52 }
 0x11a   :  { %2525 = vmatpush.msrb.mxu1 %v8001_v21  ;;  %2639 = vmatpush.msrb.mxu3 %v2638_v51  ;;  %v850_v21 = vpop.f32.mrf.mxu3  ;;  %v2229_v51 = vld [vmem:[%s10899_s1 + $0x90] sm:$0xff] }
 0x11b   :  { %2505 = vmatmul.f32.vlgmr.msrb.gmra.mxu0 %v8016_v49  ;;  %2641 = vmatmul.f32.vlgmr.msrb.gmra.mxu3 %v8225_v1  ;;  %v851_v39 = vadd.f32 %v850_v21, %v819_v4  ;;  %v8447_v21 = vsub.f32 %v2245_v57, %v8409_v59 }
 0x11c   :  { %2654 = vmatpush.msra.mxu0 %v8053_v17  ;;  %2773 = vmatpush.msra.mxu3 %v8014_v35  ;;  %v898_v17 = vpop.f32.mrf.mxu0 }
 0x11d   :  { %2527 = vmatpush.msrb.mxu1 %v8029_v43  ;;  %2569 = vmatpush.msrb.mxu2 %v8196_v22  ;;  %v2237_v43 = vld [vmem:[%s10899_s1 + $0xd0] sm:$0x1]  ;;  %v1106_v58 = vpop.f32.mrf.mxu1 }
 0x11e   :  { %2575 = vmatmul.f32.vlgmr.msrb.gmra.mxu2 %v2574_v12  ;;  %2657 = vmatpush.msra.mxu0 %v8092_v61  ;;  %v899_v61 = vadd.f32 %v898_v17, %v851_v39  ;;  %v8460_v17 = vsub.f32 %v2231_v38, %v8416_v28 }
 0x11f   :  { %2727 = vmatpush.msra.mxu2 %v2588_v6  ;;  %2775 = vmatpush.msra.mxu3 %v8055_v8  ;;  %v10945_v6 = vand.u32 4294901760, %v8113_v47 }
 0x120   :  { %2529 = vmatpush.msrb.mxu1 %v8062_v44  ;;  %2660 = vmatpush.msra.mxu0 %v8113_v47  ;;  %v2799_v44 = vsel %vm165_vm0, %v2237_v43, 0  ;;  %v2242_v43 = vld [vmem:[%s10899_s1 + $0xf8] sm:$0xff] }
 0x121   :  { %2731 = vmatpush.msra.mxu2 %v10944_v33  ;;  %2777 = vmatpush.msra.mxu3 %v8079_v5  ;;  %v8309_v47 = vand.u32 4294901760, %v2799_v44 }
 0x122   :  { %2531 = vmatpush.msrb.mxu1 %v8083_v14  ;;  %2663 = vmatpush.msra.mxu0 %v8132_v27  ;;  %v2236_v14 = vld [vmem:[%s10899_s1 + $0xc8] sm:$0xff]  ;;  %v929_v27 = vadd.f32 %v928_v29, %v899_v61  ;;  %v2241_v29 = vld [vmem:[%s10899_s1 + $0xf0] sm:$0xff] }
 0x123   :  { %2735 = vmatpush.msra.mxu2 %v10945_v6  ;;  %2779 = vmatpush.msra.mxu3 %v8094_v40  ;;  %v8462_v6 = vand.u32 4294901760, %v2229_v51  ;;  %v8501_v57 = vand.u32 4294901760, %v2241_v29 }
 0x124   :  { %2533 = vmatpush.msrb.mxu1 %v8105_v54  ;;  %2666 = vmatpush.msra.mxu0 %v8160_v56  ;;  %v8319_v54 = vand.u32 4294901760, %v2236_v14  ;;  %v2796_v2 = vsel %vm161_vm1, %v929_v27, 0  ;;  %v1074_v30 = vpop.f32.mrf.mxu0 }
 0x125   :  { %2535 = vmatmul.f32.vlgmr.msrb.gmra.mxu1 %v8016_v49  ;;  %2739 = vmatpush.msra.mxu2 %v2606_v11  ;;  %v2235_v49 = vld [vmem:[%s10899_s1 + $0xc0] sm:$0xff]  ;;  %v8379_v10 = vand.u32 4294901760, %v2796_v2 }
 0x126   :  { %2693 = vmatpush.msra.mxu1 %v8014_v35  ;;  %2781 = vmatpush.msra.mxu3 %v8124_v19  ;;  %v2234_v35 = vld [vmem:[%s10899_s1 + $0xb8] sm:$0xff]  ;;  %v8335_v36 = vand.u32 4294901760, %v2235_v49 }
 0x127   :  { %2669 = vmatpush.msra.mxu0 %v8179_v48  ;;  %2743 = vmatpush.msra.mxu2 %v2612_v18  ;;  %v2246_v18 = vld [vmem:[%s10899_s1 + $0x118] sm:$0x1]  ;;  %v8348_v56 = vand.u32 4294901760, %v2234_v35  ;;  %v1034_v48 = vpop.f32.mrf.mxu3  ;;  %v8423_v7 = vsub.f32 %v2796_v2, %v8379_v10  ;;  %v2240_v2 = vld [vmem:[%s10899_s1 + $0xe8] sm:$0xff] }
 0x128   :  { %2695 = vmatpush.msra.mxu1 %v8055_v8  ;;  %2783 = vmatpush.msra.mxu3 %v8146_v37  ;;  %v8333_v8 = vsub.f32 %v2799_v44, %v8309_v47  ;;  %v3055_v11 = vsel %vm165_vm0, %v2246_v18, 0  ;;  %v8482_v18 = vand.u32 4294901760, %v2242_v43 }
 0x129   :  { %2672 = vmatpush.msra.mxu0 %v8194_v34  ;;  %2747 = vmatpush.msra.mxu2 %v2618_v46  ;;  %v2233_v46 = vld [vmem:[%s10899_s1 + $0xb0] sm:$0xff]  ;;  %v8368_v25 = vand.u32 4294901760, %v3055_v11  ;;  %v2828_v44 = vand.u32 4294901760, %v8423_v7 }
 0x12a   :  { %2697 = vmatpush.msra.mxu1 %v8079_v5  ;;  %2785 = vmatpush.msra.mxu3 %v8162_v9  ;;  %v8346_v5 = vsub.f32 %v2236_v14, %v8319_v54  ;;  %v8360_v34 = vand.u32 4294901760, %v2233_v46  ;;  %v2844_v62 = vand.u32 4294901760, %v8333_v8 }
 0x12b   :  { %2675 = vmatpush.msra.mxu0 %v8210_v31  ;;  %2751 = vmatpush.msra.mxu2 %v2624_v32  ;;  %v8373_v31 = vsub.f32 %v2234_v35, %v8348_v56  ;;  %v8384_v32 = vand.u32 4294901760, %v2232_v26  ;;  %v8407_v41 = vsub.f32 %v3055_v11, %v8368_v25  ;;  %v2829_v38 = vsub.f32 %v8423_v7, %v2828_v44 }
 0x12c   :  { %2699 = vmatpush.msra.mxu1 %v8094_v40  ;;  %2787 = vmatpush.msra.mxu3 %v8181_v52  ;;  %v8358_v40 = vsub.f32 %v2235_v49, %v8335_v36  ;;  %v2850_v53 = vand.u32 4294901760, %v8346_v5  ;;  %v2845_v13 = vsub.f32 %v8333_v8, %v2844_v62 }
 0x12d   :  { %2678 = vmatpush.msra.mxu0 %v8222_v42  ;;  %2755 = vmatpush.msra.mxu2 %v2630_v50  ;;  %v2244_v50 = vld [vmem:[%s10899_s1 + $0x108] sm:$0xff]  ;;  %v2862_v63 = vand.u32 4294901760, %v8373_v31  ;;  %v3100_v4 = vand.u32 4294901760, %v8407_v41 }
 0x12e   :  { %2701 = vmatpush.msra.mxu1 %v8124_v19  ;;  %2789 = vmatpush.msra.mxu3 %v8196_v22  ;;  %v968_v19 = vpop.f32.mrf.mxu2  ;;  %v2856_v42 = vand.u32 4294901760, %v8358_v40  ;;  %v8433_v0 = vand.u32 4294901760, %v2244_v50  ;;  %v2846_v45 = vand.u32 4294901760, %v2845_v13 }
 0x12f   :  { %2681 = vmatmul.f32.vlgmr.msra.gmra.mxu0 %v8242_v24  ;;  %2791 = vmatmul.f32.vlgmr.msra.gmra.mxu3 %v8225_v1  ;;  %v1035_v16 = vadd.f32 %v1034_v48, %v968_v19  ;;  %v2863_v39 = vsub.f32 %v8373_v31, %v2862_v63  ;;  %v3101_v27 = vsub.f32 %v8407_v41, %v3100_v4  ;;  %v2880_v19 = vand.u32 4294901760, %v8460_v17 }
 0x130   :  { %2809 = vmatpush.msrb.mxu0 %v8309_v47  ;;  %2949 = vmatpush.msrb.mxu3 %v8309_v47  ;;  %v2857_v3 = vsub.f32 %v8358_v40, %v2856_v42  ;;  %v8470_v61 = vsub.f32 %v2244_v50, %v8433_v0  ;;  %v2239_v50 = vld [vmem:[%s10899_s1 + $0xe0] sm:$0xff] }
 0x131   :  { %2703 = vmatpush.msra.mxu1 %v8146_v37  ;;  %2759 = vmatpush.msra.mxu2 %v2636_v60  ;;  %v8395_v37 = vsub.f32 %v2233_v46, %v8360_v34  ;;  %v2851_v60 = vsub.f32 %v8346_v5, %v2850_v53  ;;  %v1075_v20 = vadd.f32 %v1074_v30, %v1035_v16  ;;  %v10912_v46 = vand.u32 4294901760, %v8447_v21 }
 0x132   :  { %2761 = vmatmul.f32.vlgmr.msra.gmra.mxu2 %v8225_v1  ;;  %2811 = vmatpush.msrb.mxu0 %v8319_v54  ;;  %v2230_v1 = vld [vmem:[%s10899_s1 + $0x98] sm:$0xff]  ;;  %v2858_v35 = vand.u32 4294901760, %v2857_v3  ;;  %v2864_v48 = vand.u32 4294901760, %v2863_v39  ;;  %v10913_v13 = vand.u32 4294901760, %v8470_v61 }
 0x133   :  { %2910 = vmatpush.msrb.mxu2 %v8333_v8  ;;  %2951 = vmatpush.msrb.mxu3 %v8319_v54  ;;  %v8440_v55 = vand.u32 4294901760, %v2230_v1  ;;  %v2868_v12 = vand.u32 4294901760, %v8395_v37  ;;  %v2852_v33 = vand.u32 4294901760, %v2851_v60  ;;  %v1107_v14 = vadd.f32 %v1106_v58, %v1075_v20 }
 0x134   :  { %2705 = vmatpush.msra.mxu1 %v8162_v9  ;;  %2813 = vmatpush.msrb.mxu0 %v8335_v36  ;;  %v8428_v9 = vsub.f32 %v2232_v26, %v8384_v32  ;;  %v8498_v26 = vsub.f32 %v2229_v51, %v8462_v6  ;;  %v8518_v20 = vsub.f32 %v2242_v43, %v8482_v18  ;;  %v8520_v51 = vand.u32 4294901760, %v2240_v2 }
 0x135   :  { %2913 = vmatpush.msrb.mxu2 %v8346_v5  ;;  %2953 = vmatpush.msrb.mxu3 %v8335_v36  ;;  %v2869_v24 = vsub.f32 %v8395_v37, %v2868_v12  ;;  %v3102_v58 = vand.u32 4294901760, %v3101_v27  ;;  %v2881_v43 = vsub.f32 %v8460_v17, %v2880_v19 }
 0x136   :  { %2707 = vmatpush.msra.mxu1 %v8181_v52  ;;  %2815 = vmatpush.msrb.mxu0 %v8348_v56  ;;  %v8449_v52 = vand.u32 4294901760, %v2243_v23  ;;  %v1154_v49 = vpop.f32.mrf.mxu2  ;;  %v2892_v39 = vand.u32 4294901760, %v8498_v26 }
 0x137   :  { %2916 = vmatpush.msrb.mxu2 %v8358_v40  ;;  %2955 = vmatpush.msrb.mxu3 %v8348_v56  ;;  %v1155_v16 = vadd.f32 %v1154_v49, %v1107_v14  ;;  %v2870_v60 = vand.u32 4294901760, %v2869_v24  ;;  %v8537_v14 = vsub.f32 %v2241_v29, %v8501_v57  ;;  %v8539_v49 = vand.u32 4294901760, %v2239_v50 }
 0x138   :  { %2709 = vmatpush.msra.mxu1 %v8196_v22  ;;  %2817 = vmatpush.msrb.mxu0 %v8360_v34  ;;  %v2874_v22 = vand.u32 4294901760, %v8428_v9  ;;  %v8491_v11 = vsub.f32 %v2243_v23, %v8449_v52  ;;  %v2830_v24 = vand.u32 4294901760, %v2829_v38 }
 0x139   :  { %2713 = vmatmul.f32.vlgmr.msra.gmra.mxu1 %v2572_v15  ;;  %2919 = vmatpush.msrb.mxu2 %v8373_v31  ;;  %v8480_v15 = vsub.f32 %v2230_v1, %v8440_v55  ;;  %v1184_v1 = vpop.f32.mrf.mxu3 }
 0x13a   :  { %2847 = vmatpush.msrb.mxu1 %v2846_v45  ;;  %2957 = vmatpush.msrb.mxu3 %v8360_v34  ;;  %v2875_v30 = vsub.f32 %v8428_v9, %v2874_v22  ;;  %v3107_v45 = vsub.f32 %v8447_v21, %v10912_v46  ;;  %v3118_v3 = vand.u32 4294901760, %v8491_v11  ;;  %v3124_v46 = vand.u32 4294901760, %v8518_v20 }
 0x13b   :  { %2819 = vmatpush.msrb.mxu0 %v8384_v32  ;;  %2922 = vmatpush.msrb.mxu2 %v8395_v37  ;;  %v2886_v23 = vand.u32 4294901760, %v8480_v15 }
 0x13c   :  { %2853 = vmatpush.msrb.mxu1 %v2852_v33  ;;  %2959 = vmatpush.msrb.mxu3 %v8384_v32  ;;  %v2238_v33 = vld [vmem:[%s10899_s1 + $0xd8] sm:$0xff]  ;;  %v2876_v27 = vand.u32 4294901760, %v2875_v30  ;;  %v3108_v38 = vand.u32 4294901760, %v3107_v45  ;;  %v3119_v30 = vsub.f32 %v8491_v11, %v3118_v3 }
 0x13d   :  { %2821 = vmatpush.msrb.mxu0 %v8416_v28  ;;  %2925 = vmatpush.msrb.mxu2 %v8428_v9  ;;  %v2887_v29 = vsub.f32 %v8480_v15, %v2886_v23  ;;  %v1224_v9 = vpop.f32.mrf.mxu0 }
 0x13e   :  { %2859 = vmatpush.msrb.mxu1 %v2858_v35  ;;  %2961 = vmatpush.msrb.mxu3 %v8416_v28  ;;  %v1185_v35 = vadd.f32 %v1184_v1, %v1155_v16  ;;  %v8552_v16 = vsub.f32 %v2240_v2, %v8520_v51  ;;  %v8554_v1 = vand.u32 4294901760, %v2238_v33  ;;  %v2893_v2 = vsub.f32 %v8498_v26, %v2892_v39 }
 0x13f   :  { %2823 = vmatpush.msrb.mxu0 %v8440_v55  ;;  %2928 = vmatpush.msrb.mxu2 %v8460_v17  ;;  %v2888_v8 = vand.u32 4294901760, %v2887_v29  ;;  %v1330_v17 = vpop.f32.mrf.mxu2 }
 0x140   :  { %2865 = vmatpush.msrb.mxu1 %v2864_v48  ;;  %2963 = vmatpush.msrb.mxu3 %v8440_v55  ;;  %v3113_v48 = vsub.f32 %v8470_v61, %v10913_v13  ;;  %v3130_v13 = vand.u32 4294901760, %v8537_v14  ;;  %v2894_v5 = vand.u32 4294901760, %v2893_v2 }
 0x141   :  { %2825 = vmatpush.msrb.mxu0 %v8462_v6  ;;  %2931 = vmatpush.msrb.mxu2 %v8480_v15  ;;  %v10946_v15 = vand.u32 4294901760, %v8447_v21 }
 0x142   :  { %2871 = vmatpush.msrb.mxu1 %v2870_v60  ;;  %2965 = vmatpush.msrb.mxu3 %v8462_v6  ;;  %v2882_v60 = vand.u32 4294901760, %v2881_v43  ;;  %v3114_v45 = vand.u32 4294901760, %v3113_v48  ;;  %v3120_v43 = vand.u32 4294901760, %v3119_v30 }
 0x143   :  { %2831 = vmatmul.f32.vlgmr.msrb.gmra.mxu0 %v2830_v24  ;;  %2969 = vmatmul.f32.vlgmr.msrb.gmra.mxu3 %v2828_v44  ;;  %v8568_v24 = vsub.f32 %v2239_v50, %v8539_v49  ;;  %v3052_v44 = vsel %vm161_vm1, %v1185_v35, 0  ;;  %v8580_v50 = vsub.f32 %v2238_v33, %v8554_v1 }
 0x144   :  { %2983 = vmatpush.msra.mxu0 %v2844_v62  ;;  %3103 = vmatpush.msra.mxu3 %v3102_v58  ;;  %v3125_v62 = vsub.f32 %v8518_v20, %v3124_v46  ;;  %v3136_v58 = vand.u32 4294901760, %v8552_v16  ;;  %v8583_v35 = vand.u32 4294901760, %v3052_v44 }
 0x145   :  { %2877 = vmatpush.msrb.mxu1 %v2876_v27  ;;  %2934 = vmatpush.msrb.mxu2 %v8498_v26 }
 0x146   :  { %2937 = vmatmul.f32.vlgmr.msrb.gmra.mxu2 %v8423_v7  ;;  %2987 = vmatpush.msra.mxu0 %v2850_v53  ;;  %v3131_v53 = vsub.f32 %v8537_v14, %v3130_v13  ;;  %v3142_v7 = vand.u32 4294901760, %v8568_v24  ;;  %v3126_v33 = vand.u32 4294901760, %v3125_v62  ;;  %v3137_v40 = vsub.f32 %v8552_v16, %v3136_v58 }
 0x147   :  { %3065 = vmatpush.msra.mxu2 %v8368_v25  ;;  %3109 = vmatpush.msra.mxu3 %v3108_v38  ;;  %v8600_v27 = vsub.f32 %v3052_v44, %v8583_v35  ;;  %v1290_v38 = vpop.f32.mrf.mxu1 }
 0x148   :  { %2883 = vmatpush.msrb.mxu1 %v2882_v60  ;;  %2991 = vmatpush.msra.mxu0 %v2856_v42  ;;  %v3148_v42 = vand.u32 4294901760, %v8580_v50  ;;  %v3132_v48 = vand.u32 4294901760, %v3131_v53  ;;  %v3143_v31 = vsub.f32 %v8568_v24, %v3142_v7  ;;  %v2250_v60 = vld [vmem:[%s10899_s1 + $0x138] sm:$0xff] }
 0x149   :  { %3067 = vmatpush.msra.mxu2 %v8409_v59  ;;  %3115 = vmatpush.msra.mxu3 %v3114_v45  ;;  %v3084_v37 = vand.u32 4294901760, %v8600_v27  ;;  %v2263_v45 = vld [vmem:[%s10899_s1 + $0x1a0] sm:$0xff] }
 0x14a   :  { %2889 = vmatpush.msrb.mxu1 %v2888_v8  ;;  %2995 = vmatpush.msra.mxu0 %v2862_v63  ;;  %v3138_v63 = vand.u32 4294901760, %v3137_v40  ;;  %v3149_v29 = vsub.f32 %v8580_v50, %v3148_v42  ;;  %v8767_v40 = vand.u32 4294901760, %v2263_v45 }
 0x14b   :  { %3069 = vmatpush.msra.mxu2 %v8433_v0  ;;  %3121 = vmatpush.msra.mxu3 %v3120_v43  ;;  %v2249_v43 = vld [vmem:[%s10899_s1 + $0x130] sm:$0xff] }
 0x14c   :  { %2895 = vmatpush.msrb.mxu1 %v2894_v5  ;;  %2999 = vmatpush.msra.mxu0 %v2868_v12  ;;  %v3144_v12 = vand.u32 4294901760, %v3143_v31 }
 0x14d   :  { %2897 = vmatmul.f32.vlgmr.msrb.gmra.mxu1 %v8379_v10  ;;  %3071 = vmatpush.msra.mxu2 %v8449_v52 }
 0x14e   :  { %3029 = vmatpush.msra.mxu1 %v8309_v47  ;;  %3127 = vmatpush.msra.mxu3 %v3126_v33  ;;  %v3150_v47 = vand.u32 4294901760, %v3149_v29 }
 0x14f   :  { %3003 = vmatpush.msra.mxu0 %v2874_v22  ;;  %3073 = vmatpush.msra.mxu2 %v8482_v18 }
 0x150   :  { %3031 = vmatpush.msra.mxu1 %v8319_v54  ;;  %3133 = vmatpush.msra.mxu3 %v3132_v48  ;;  %v3085_v54 = vsub.f32 %v8600_v27, %v3084_v37  ;;  %v8774_v48 = vand.u32 4294901760, %v2249_v43 }
 0x151   :  { %3007 = vmatpush.msra.mxu0 %v2880_v19  ;;  %3075 = vmatpush.msra.mxu2 %v8501_v57  ;;  %v1440_v19 = vpop.f32.mrf.mxu1 }
 0x152   :  { %3033 = vmatpush.msra.mxu1 %v8335_v36  ;;  %3139 = vmatpush.msra.mxu3 %v3138_v63  ;;  %v1291_v36 = vadd.f32 %v1290_v38, %v1224_v9  ;;  %v2261_v63 = vld [vmem:[%s10899_s1 + $0x190] sm:$0xff] }
 0x153   :  { %3011 = vmatpush.msra.mxu0 %v2886_v23  ;;  %3077 = vmatpush.msra.mxu2 %v8520_v51 }
 0x154   :  { %3035 = vmatpush.msra.mxu1 %v8348_v56  ;;  %3145 = vmatpush.msra.mxu3 %v3144_v12  ;;  %v3086_v56 = vand.u32 4294901760, %v3085_v54  ;;  %v1331_v22 = vadd.f32 %v1330_v17, %v1291_v36 }
 0x155   :  { %3015 = vmatpush.msra.mxu0 %v2892_v39  ;;  %3079 = vmatpush.msra.mxu2 %v8539_v49 }
 0x156   :  { %3037 = vmatpush.msra.mxu1 %v8360_v34  ;;  %3151 = vmatpush.msra.mxu3 %v3150_v47  ;;  %v1362_v34 = vpop.f32.mrf.mxu3  ;;  %v2247_v47 = vld [vmem:[%s10899_s1 + $0x120] sm:$0xff] }
 0x157   :  { %3017 = vmatmul.f32.vlgmr.msra.gmra.mxu0 %v8379_v10  ;;  %3153 = vmatmul.f32.vlgmr.msra.gmra.mxu3 %v8583_v35  ;;  %v1363_v26 = vadd.f32 %v1362_v34, %v1331_v22  ;;  %v8805_v34 = vsub.f32 %v2263_v45, %v8767_v40 }
 0x158   :  { %3166 = vmatpush.msrb.mxu0 %v8407_v41  ;;  %3285 = vmatpush.msrb.mxu3 %v8368_v25  ;;  %v1410_v41 = vpop.f32.mrf.mxu0 }
 0x159   :  { %3039 = vmatpush.msra.mxu1 %v8384_v32  ;;  %3081 = vmatpush.msra.mxu2 %v8554_v1  ;;  %v2255_v32 = vld [vmem:[%s10899_s1 + $0x160] sm:$0x1]  ;;  %v1618_v54 = vpop.f32.mrf.mxu1 }
 0x15a   :  { %3087 = vmatmul.f32.vlgmr.msra.gmra.mxu2 %v3086_v56  ;;  %3169 = vmatpush.msrb.mxu0 %v8447_v21  ;;  %v1411_v21 = vadd.f32 %v1410_v41, %v1363_v26  ;;  %v8818_v41 = vsub.f32 %v2249_v43, %v8774_v48 }
 0x15b   :  { %3239 = vmatpush.msrb.mxu2 %v3100_v4  ;;  %3287 = vmatpush.msrb.mxu3 %v8409_v59  ;;  %v10947_v4 = vand.u32 4294901760, %v8470_v61 }
 0x15c   :  { %3041 = vmatpush.msra.mxu1 %v8416_v28  ;;  %3172 = vmatpush.msrb.mxu0 %v8470_v61  ;;  %v3311_v28 = vsel %vm165_vm0, %v2255_v32, 0  ;;  %v2260_v32 = vld [vmem:[%s10899_s1 + $0x188] sm:$0xff] }
 0x15d   :  { %3243 = vmatpush.msrb.mxu2 %v10946_v15  ;;  %3289 = vmatpush.msrb.mxu3 %v8433_v0  ;;  %v8667_v61 = vand.u32 4294901760, %v3311_v28 }
 0x15e   :  { %3043 = vmatpush.msra.mxu1 %v8440_v55  ;;  %3175 = vmatpush.msrb.mxu0 %v8491_v11  ;;  %v2254_v55 = vld [vmem:[%s10899_s1 + $0x158] sm:$0xff]  ;;  %v1441_v11 = vadd.f32 %v1440_v19, %v1411_v21  ;;  %v2259_v19 = vld [vmem:[%s10899_s1 + $0x180] sm:$0xff] }
 0x15f   :  { %3247 = vmatpush.msrb.mxu2 %v10947_v4  ;;  %3291 = vmatpush.msrb.mxu3 %v8449_v52  ;;  %v8820_v4 = vand.u32 4294901760, %v2247_v47  ;;  %v8859_v45 = vand.u32 4294901760, %v2259_v19 }
 0x160   :  { %3045 = vmatpush.msra.mxu1 %v8462_v6  ;;  %3178 = vmatpush.msrb.mxu0 %v8518_v20  ;;  %v8677_v6 = vand.u32 4294901760, %v2254_v55  ;;  %v3308_v39 = vsel %vm161_vm1, %v1441_v11, 0  ;;  %v1586_v5 = vpop.f32.mrf.mxu0 }
 0x161   :  { %3047 = vmatmul.f32.vlgmr.msra.gmra.mxu1 %v8379_v10  ;;  %3251 = vmatpush.msrb.mxu2 %v3118_v3  ;;  %v2253_v10 = vld [vmem:[%s10899_s1 + $0x150] sm:$0xff]  ;;  %v8737_v8 = vand.u32 4294901760, %v3308_v39 }
 0x162   :  { %3205 = vmatpush.msrb.mxu1 %v8368_v25  ;;  %3293 = vmatpush.msrb.mxu3 %v8482_v18  ;;  %v2252_v25 = vld [vmem:[%s10899_s1 + $0x148] sm:$0xff]  ;;  %v8693_v23 = vand.u32 4294901760, %v2253_v10 }
 0x163   :  { %3181 = vmatpush.msrb.mxu0 %v8537_v14  ;;  %3255 = vmatpush.msrb.mxu2 %v3124_v46  ;;  %v2264_v46 = vld [vmem:[%s10899_s1 + $0x1a8] sm:$0x1]  ;;  %v8706_v20 = vand.u32 4294901760, %v2252_v25  ;;  %v1546_v14 = vpop.f32.mrf.mxu3  ;;  %v8781_v29 = vsub.f32 %v3308_v39, %v8737_v8  ;;  %v2258_v39 = vld [vmem:[%s10899_s1 + $0x178] sm:$0xff] }
 0x164   :  { %3207 = vmatpush.msrb.mxu1 %v8409_v59  ;;  %3295 = vmatpush.msrb.mxu3 %v8501_v57  ;;  %v8691_v59 = vsub.f32 %v3311_v28, %v8667_v61  ;;  %v3567_v3 = vsel %vm165_vm0, %v2264_v46, 0  ;;  %v8840_v46 = vand.u32 4294901760, %v2260_v32 }
 0x165   :  { %3184 = vmatpush.msrb.mxu0 %v8552_v16  ;;  %3259 = vmatpush.msrb.mxu2 %v3130_v13  ;;  %v2251_v13 = vld [vmem:[%s10899_s1 + $0x140] sm:$0xff]  ;;  %v8726_v2 = vand.u32 4294901760, %v3567_v3  ;;  %v3340_v28 = vand.u32 4294901760, %v8781_v29 }
 0x166   :  { %3209 = vmatpush.msrb.mxu1 %v8433_v0  ;;  %3297 = vmatpush.msrb.mxu3 %v8520_v51  ;;  %v8704_v0 = vsub.f32 %v2254_v55, %v8677_v6  ;;  %v8718_v16 = vand.u32 4294901760, %v2251_v13  ;;  %v3356_v30 = vand.u32 4294901760, %v8691_v59 }
 0x167   :  { %3187 = vmatpush.msrb.mxu0 %v8568_v24  ;;  %3263 = vmatpush.msrb.mxu2 %v3136_v58  ;;  %v8731_v24 = vsub.f32 %v2252_v25, %v8706_v20  ;;  %v8742_v58 = vand.u32 4294901760, %v2250_v60  ;;  %v8765_v33 = vsub.f32 %v3567_v3, %v8726_v2  ;;  %v3341_v43 = vsub.f32 %v8781_v29, %v3340_v28 }
 0x168   :  { %3211 = vmatpush.msrb.mxu1 %v8449_v52  ;;  %3299 = vmatpush.msrb.mxu3 %v8539_v49  ;;  %v8716_v52 = vsub.f32 %v2253_v10, %v8693_v23  ;;  %v3362_v44 = vand.u32 4294901760, %v8704_v0  ;;  %v3357_v53 = vsub.f32 %v8691_v59, %v3356_v30 }
 0x169   :  { %3190 = vmatpush.msrb.mxu0 %v8580_v50  ;;  %3267 = vmatpush.msrb.mxu2 %v3142_v7  ;;  %v2262_v7 = vld [vmem:[%s10899_s1 + $0x198] sm:$0xff]  ;;  %v3374_v31 = vand.u32 4294901760, %v8731_v24  ;;  %v3612_v22 = vand.u32 4294901760, %v8765_v33 }
 0x16a   :  { %3213 = vmatpush.msrb.mxu1 %v8482_v18  ;;  %3301 = vmatpush.msrb.mxu3 %v8554_v1  ;;  %v1480_v18 = vpop.f32.mrf.mxu2  ;;  %v3368_v50 = vand.u32 4294901760, %v8716_v52  ;;  %v8791_v38 = vand.u32 4294901760, %v2262_v7  ;;  %v3358_v9 = vand.u32 4294901760, %v3357_v53 }
 0x16b   :  { %3193 = vmatmul.f32.vlgmr.msrb.gmra.mxu0 %v8600_v27  ;;  %3303 = vmatmul.f32.vlgmr.msrb.gmra.mxu3 %v8583_v35  ;;  %v1547_v62 = vadd.f32 %v1546_v14, %v1480_v18  ;;  %v3375_v26 = vsub.f32 %v8731_v24, %v3374_v31  ;;  %v3613_v11 = vsub.f32 %v8765_v33, %v3612_v22  ;;  %v3392_v18 = vand.u32 4294901760, %v8818_v41 }
 0x16c   :  { %3321 = vmatpush.msra.mxu0 %v8667_v61  ;;  %3461 = vmatpush.msra.mxu3 %v8667_v61  ;;  %v3369_v36 = vsub.f32 %v8716_v52, %v3368_v50  ;;  %v8828_v21 = vsub.f32 %v2262_v7, %v8791_v38  ;;  %v2257_v7 = vld [vmem:[%s10899_s1 + $0x170] sm:$0xff] }
 0x16d   :  { %3215 = vmatpush.msrb.mxu1 %v8501_v57  ;;  %3271 = vmatpush.msrb.mxu2 %v3148_v42  ;;  %v8753_v57 = vsub.f32 %v2251_v13, %v8718_v16  ;;  %v3363_v42 = vsub.f32 %v8704_v0, %v3362_v44  ;;  %v1587_v12 = vadd.f32 %v1586_v5, %v1547_v62  ;;  %v10914_v13 = vand.u32 4294901760, %v8805_v34 }
 0x16e   :  { %3273 = vmatmul.f32.vlgmr.msrb.gmra.mxu2 %v8583_v35  ;;  %3323 = vmatpush.msra.mxu0 %v8677_v6  ;;  %v2248_v35 = vld [vmem:[%s10899_s1 + $0x128] sm:$0xff]  ;;  %v3370_v25 = vand.u32 4294901760, %v3369_v36  ;;  %v3376_v14 = vand.u32 4294901760, %v3375_v26  ;;  %v10915_v53 = vand.u32 4294901760, %v8828_v21 }
 0x16f   :  { %3422 = vmatpush.msra.mxu2 %v8691_v59  ;;  %3463 = vmatpush.msra.mxu3 %v8677_v6  ;;  %v8798_v17 = vand.u32 4294901760, %v2248_v35  ;;  %v3380_v56 = vand.u32 4294901760, %v8753_v57  ;;  %v3364_v15 = vand.u32 4294901760, %v3363_v42  ;;  %v1619_v55 = vadd.f32 %v1618_v54, %v1587_v12 }
 0x170   :  { %3217 = vmatpush.msrb.mxu1 %v8520_v51  ;;  %3325 = vmatpush.msra.mxu0 %v8693_v23  ;;  %v8786_v51 = vsub.f32 %v2250_v60, %v8742_v58  ;;  %v8856_v60 = vsub.f32 %v2247_v47, %v8820_v4  ;;  %v8876_v12 = vsub.f32 %v2260_v32, %v8840_v46  ;;  %v8878_v47 = vand.u32 4294901760, %v2258_v39 }
 0x171   :  { %3425 = vmatpush.msra.mxu2 %v8704_v0  ;;  %3465 = vmatpush.msra.mxu3 %v8693_v23  ;;  %v3381_v27 = vsub.f32 %v8753_v57, %v3380_v56  ;;  %v3614_v54 = vand.u32 4294901760, %v3613_v11  ;;  %v3393_v32 = vsub.f32 %v8818_v41, %v3392_v18 }
 0x172   :  { %3219 = vmatpush.msrb.mxu1 %v8539_v49  ;;  %3327 = vmatpush.msra.mxu0 %v8706_v20  ;;  %v8807_v49 = vand.u32 4294901760, %v2261_v63  ;;  %v1666_v10 = vpop.f32.mrf.mxu2  ;;  %v3404_v26 = vand.u32 4294901760, %v8856_v60 }
 0x173   :  { %3428 = vmatpush.msra.mxu2 %v8716_v52  ;;  %3467 = vmatpush.msra.mxu3 %v8706_v20  ;;  %v1667_v62 = vadd.f32 %v1666_v10, %v1619_v55  ;;  %v3382_v42 = vand.u32 4294901760, %v3381_v27  ;;  %v8895_v55 = vsub.f32 %v2259_v19, %v8859_v45  ;;  %v8897_v10 = vand.u32 4294901760, %v2257_v7 }
 0x174   :  { %3221 = vmatpush.msrb.mxu1 %v8554_v1  ;;  %3329 = vmatpush.msra.mxu0 %v8718_v16  ;;  %v3386_v1 = vand.u32 4294901760, %v8786_v51  ;;  %v8849_v3 = vsub.f32 %v2261_v63, %v8807_v49  ;;  %v3342_v27 = vand.u32 4294901760, %v3341_v43 }
 0x175   :  { %3225 = vmatmul.f32.vlgmr.msrb.gmra.mxu1 %v3084_v37  ;;  %3431 = vmatpush.msra.mxu2 %v8731_v24  ;;  %v8838_v37 = vsub.f32 %v2248_v35, %v8798_v17  ;;  %v1696_v35 = vpop.f32.mrf.mxu3 }
 0x176   :  { %3359 = vmatpush.msra.mxu1 %v3358_v9  ;;  %3469 = vmatpush.msra.mxu3 %v8718_v16  ;;  %v3387_v5 = vsub.f32 %v8786_v51, %v3386_v1  ;;  %v3619_v9 = vsub.f32 %v8805_v34, %v10914_v13  ;;  %v3630_v36 = vand.u32 4294901760, %v8849_v3  ;;  %v3636_v13 = vand.u32 4294901760, %v8876_v12 }
 0x177   :  { %3331 = vmatpush.msra.mxu0 %v8742_v58  ;;  %3434 = vmatpush.msra.mxu2 %v8753_v57  ;;  %v3398_v63 = vand.u32 4294901760, %v8838_v37 }
 0x178   :  { %3365 = vmatpush.msra.mxu1 %v3364_v15  ;;  %3471 = vmatpush.msra.mxu3 %v8742_v58  ;;  %v2256_v15 = vld [vmem:[%s10899_s1 + $0x168] sm:$0xff]  ;;  %v3388_v11 = vand.u32 4294901760, %v3387_v5  ;;  %v3620_v43 = vand.u32 4294901760, %v3619_v9  ;;  %v3631_v5 = vsub.f32 %v8849_v3, %v3630_v36 }
 0x179   :  { %3333 = vmatpush.msra.mxu0 %v8774_v48  ;;  %3437 = vmatpush.msra.mxu2 %v8786_v51  ;;  %v3399_v19 = vsub.f32 %v8838_v37, %v3398_v63  ;;  %v1736_v51 = vpop.f32.mrf.mxu0 }
 0x17a   :  { %3371 = vmatpush.msra.mxu1 %v3370_v25  ;;  %3473 = vmatpush.msra.mxu3 %v8774_v48  ;;  %v1697_v25 = vadd.f32 %v1696_v35, %v1667_v62  ;;  %v8910_v62 = vsub.f32 %v2258_v39, %v8878_v47  ;;  %v8912_v35 = vand.u32 4294901760, %v2256_v15  ;;  %v3405_v39 = vsub.f32 %v8856_v60, %v3404_v26 }
 0x17b   :  { %3335 = vmatpush.msra.mxu0 %v8798_v17  ;;  %3440 = vmatpush.msra.mxu2 %v8818_v41  ;;  %v3400_v59 = vand.u32 4294901760, %v3399_v19  ;;  %v1842_v41 = vpop.f32.mrf.mxu2 }
 0x17c   :  { %3377 = vmatpush.msra.mxu1 %v3376_v14  ;;  %3475 = vmatpush.msra.mxu3 %v8798_v17  ;;  %v3625_v14 = vsub.f32 %v8828_v21, %v10915_v53  ;;  %v3642_v53 = vand.u32 4294901760, %v8895_v55  ;;  %v3406_v0 = vand.u32 4294901760, %v3405_v39 }
 0x17d   :  { %3337 = vmatpush.msra.mxu0 %v8820_v4  ;;  %3443 = vmatpush.msra.mxu2 %v8838_v37  ;;  %v10948_v37 = vand.u32 4294901760, %v8805_v34 }
 0x17e   :  { %3383 = vmatpush.msra.mxu1 %v3382_v42  ;;  %3477 = vmatpush.msra.mxu3 %v8820_v4  ;;  %v3394_v42 = vand.u32 4294901760, %v3393_v32  ;;  %v3626_v9 = vand.u32 4294901760, %v3625_v14  ;;  %v3632_v32 = vand.u32 4294901760, %v3631_v5 }
 0x17f   :  { %3343 = vmatmul.f32.vlgmr.msra.gmra.mxu0 %v3342_v27  ;;  %3481 = vmatmul.f32.vlgmr.msra.gmra.mxu3 %v3340_v28  ;;  %v8926_v27 = vsub.f32 %v2257_v7, %v8897_v10  ;;  %v3564_v28 = vsel %vm161_vm1, %v1697_v25, 0  ;;  %v8938_v7 = vsub.f32 %v2256_v15, %v8912_v35 }
 0x180   :  { %3495 = vmatpush.msrb.mxu0 %v3356_v30  ;;  %3615 = vmatpush.msrb.mxu3 %v3614_v54  ;;  %v3637_v30 = vsub.f32 %v8876_v12, %v3636_v13  ;;  %v3648_v54 = vand.u32 4294901760, %v8910_v62  ;;  %v8941_v25 = vand.u32 4294901760, %v3564_v28 }
 0x181   :  { %3389 = vmatpush.msra.mxu1 %v3388_v11  ;;  %3446 = vmatpush.msra.mxu2 %v8856_v60 }
 0x182   :  { %3449 = vmatmul.f32.vlgmr.msra.gmra.mxu2 %v8781_v29  ;;  %3499 = vmatpush.msrb.mxu0 %v3362_v44  ;;  %v3643_v44 = vsub.f32 %v8895_v55, %v3642_v53  ;;  %v3654_v29 = vand.u32 4294901760, %v8926_v27  ;;  %v3638_v15 = vand.u32 4294901760, %v3637_v30  ;;  %v3649_v52 = vsub.f32 %v8910_v62, %v3648_v54 }
 0x183   :  { %3577 = vmatpush.msrb.mxu2 %v8726_v2  ;;  %3621 = vmatpush.msrb.mxu3 %v3620_v43  ;;  %v8958_v11 = vsub.f32 %v3564_v28, %v8941_v25  ;;  %v1802_v43 = vpop.f32.mrf.mxu1 }
 0x184   :  { %3395 = vmatpush.msra.mxu1 %v3394_v42  ;;  %3503 = vmatpush.msrb.mxu0 %v3368_v50  ;;  %v3660_v50 = vand.u32 4294901760, %v8938_v7  ;;  %v3644_v14 = vand.u32 4294901760, %v3643_v44  ;;  %v3655_v24 = vsub.f32 %v8926_v27, %v3654_v29  ;;  %v2268_v42 = vld [vmem:[%s10899_s1 + $0x1c8] sm:$0xff] }
 0x185   :  { %3579 = vmatpush.msrb.mxu2 %v8767_v40  ;;  %3627 = vmatpush.msrb.mxu3 %v3626_v9  ;;  %v3596_v57 = vand.u32 4294901760, %v8958_v11  ;;  %v2281_v9 = vld [vmem:[%s10899_s1 + $0x230] sm:$0xff] }
 0x186   :  { %3401 = vmatpush.msra.mxu1 %v3400_v59  ;;  %3507 = vmatpush.msrb.mxu0 %v3374_v31  ;;  %v3650_v31 = vand.u32 4294901760, %v3649_v52  ;;  %v3661_v19 = vsub.f32 %v8938_v7, %v3660_v50  ;;  %v9125_v52 = vand.u32 4294901760, %v2281_v9 }
 0x187   :  { %3581 = vmatpush.msrb.mxu2 %v8791_v38  ;;  %3633 = vmatpush.msrb.mxu3 %v3632_v32  ;;  %v2267_v32 = vld [vmem:[%s10899_s1 + $0x1c0] sm:$0xff] }
 0x188   :  { %3407 = vmatpush.msra.mxu1 %v3406_v0  ;;  %3511 = vmatpush.msrb.mxu0 %v3380_v56  ;;  %v3656_v56 = vand.u32 4294901760, %v3655_v24 }
 0x189   :  { %3409 = vmatmul.f32.vlgmr.msra.gmra.mxu1 %v8737_v8  ;;  %3583 = vmatpush.msrb.mxu2 %v8807_v49 }
 0x18a   :  { %3541 = vmatpush.msrb.mxu1 %v8667_v61  ;;  %3639 = vmatpush.msrb.mxu3 %v3638_v15  ;;  %v3662_v61 = vand.u32 4294901760, %v3661_v19 }
 0x18b   :  { %3515 = vmatpush.msrb.mxu0 %v3386_v1  ;;  %3585 = vmatpush.msrb.mxu2 %v8840_v46 }
 0x18c   :  { %3543 = vmatpush.msrb.mxu1 %v8677_v6  ;;  %3645 = vmatpush.msrb.mxu3 %v3644_v14  ;;  %v3597_v6 = vsub.f32 %v8958_v11, %v3596_v57  ;;  %v9132_v14 = vand.u32 4294901760, %v2267_v32 }
 0x18d   :  { %3519 = vmatpush.msrb.mxu0 %v3392_v18  ;;  %3587 = vmatpush.msrb.mxu2 %v8859_v45  ;;  %v1952_v18 = vpop.f32.mrf.mxu1 }
 0x18e   :  { %3545 = vmatpush.msrb.mxu1 %v8693_v23  ;;  %3651 = vmatpush.msrb.mxu3 %v3650_v31  ;;  %v1803_v23 = vadd.f32 %v1802_v43, %v1736_v51  ;;  %v2279_v31 = vld [vmem:[%s10899_s1 + $0x220] sm:$0xff] }
 0x18f   :  { %3523 = vmatpush.msrb.mxu0 %v3398_v63  ;;  %3589 = vmatpush.msrb.mxu2 %v8878_v47 }
 0x190   :  { %3547 = vmatpush.msrb.mxu1 %v8706_v20  ;;  %3657 = vmatpush.msrb.mxu3 %v3656_v56  ;;  %v3598_v20 = vand.u32 4294901760, %v3597_v6  ;;  %v1843_v1 = vadd.f32 %v1842_v41, %v1803_v23 }
 0x191   :  { %3527 = vmatpush.msrb.mxu0 %v3404_v26  ;;  %3591 = vmatpush.msrb.mxu2 %v8897_v10 }
 0x192   :  { %3549 = vmatpush.msrb.mxu1 %v8718_v16  ;;  %3663 = vmatpush.msrb.mxu3 %v3662_v61  ;;  %v1874_v16 = vpop.f32.mrf.mxu3  ;;  %v2265_v61 = vld [vmem:[%s10899_s1 + $0x1b0] sm:$0xff] }
 0x193   :  { %3529 = vmatmul.f32.vlgmr.msrb.gmra.mxu0 %v8737_v8  ;;  %3665 = vmatmul.f32.vlgmr.msrb.gmra.mxu3 %v8941_v25  ;;  %v1875_v60 = vadd.f32 %v1874_v16, %v1843_v1  ;;  %v9163_v16 = vsub.f32 %v2281_v9, %v9125_v52 }
 0x194   :  { %3678 = vmatpush.msra.mxu0 %v8765_v33  ;;  %3797 = vmatpush.msra.mxu3 %v8726_v2  ;;  %v1922_v33 = vpop.f32.mrf.mxu0 }
 0x195   :  { %3551 = vmatpush.msrb.mxu1 %v8742_v58  ;;  %3593 = vmatpush.msrb.mxu2 %v8912_v35  ;;  %v2273_v58 = vld [vmem:[%s10899_s1 + $0x1f0] sm:$0x1]  ;;  %v2130_v6 = vpop.f32.mrf.mxu1 }
 0x196   :  { %3599 = vmatmul.f32.vlgmr.msrb.gmra.mxu2 %v3598_v20  ;;  %3681 = vmatpush.msra.mxu0 %v8805_v34  ;;  %v1923_v34 = vadd.f32 %v1922_v33, %v1875_v60  ;;  %v9176_v33 = vsub.f32 %v2267_v32, %v9132_v14 }
 0x197   :  { %3751 = vmatpush.msra.mxu2 %v3612_v22  ;;  %3799 = vmatpush.msra.mxu3 %v8767_v40  ;;  %v10949_v22 = vand.u32 4294901760, %v8828_v21 }
 0x198   :  { %3553 = vmatpush.msrb.mxu1 %v8774_v48  ;;  %3684 = vmatpush.msra.mxu0 %v8828_v21  ;;  %v3823_v48 = vsel %vm165_vm0, %v2273_v58, 0  ;;  %v2278_v58 = vld [vmem:[%s10899_s1 + $0x218] sm:$0xff] }
 0x199   :  { %3755 = vmatpush.msra.mxu2 %v10948_v37  ;;  %3801 = vmatpush.msra.mxu3 %v8791_v38  ;;  %v9025_v21 = vand.u32 4294901760, %v3823_v48 }
 0x19a   :  { %3555 = vmatpush.msrb.mxu1 %v8798_v17  ;;  %3687 = vmatpush.msra.mxu0 %v8849_v3  ;;  %v2272_v17 = vld [vmem:[%s10899_s1 + $0x1e8] sm:$0xff]  ;;  %v1953_v3 = vadd.f32 %v1952_v18, %v1923_v34  ;;  %v2277_v18 = vld [vmem:[%s10899_s1 + $0x210] sm:$0xff] }
 0x19b   :  { %3759 = vmatpush.msra.mxu2 %v10949_v22  ;;  %3803 = vmatpush.msra.mxu3 %v8807_v49  ;;  %v9178_v22 = vand.u32 4294901760, %v2265_v61  ;;  %v9217_v9 = vand.u32 4294901760, %v2277_v18 }
 0x19c   :  { %3557 = vmatpush.msrb.mxu1 %v8820_v4  ;;  %3690 = vmatpush.msra.mxu0 %v8876_v12  ;;  %v9035_v4 = vand.u32 4294901760, %v2272_v17  ;;  %v3820_v26 = vsel %vm161_vm1, %v1953_v3, 0  ;;  %v2098_v0 = vpop.f32.mrf.mxu0 }
 0x19d   :  { %3559 = vmatmul.f32.vlgmr.msrb.gmra.mxu1 %v8737_v8  ;;  %3763 = vmatpush.msra.mxu2 %v3630_v36  ;;  %v2271_v8 = vld [vmem:[%s10899_s1 + $0x1e0] sm:$0xff]  ;;  %v9095_v59 = vand.u32 4294901760, %v3820_v26 }
 0x19e   :  { %3717 = vmatpush.msra.mxu1 %v8726_v2  ;;  %3805 = vmatpush.msra.mxu3 %v8840_v46  ;;  %v2270_v2 = vld [vmem:[%s10899_s1 + $0x1d8] sm:$0xff]  ;;  %v9051_v63 = vand.u32 4294901760, %v2271_v8 }
 0x19f   :  { %3693 = vmatpush.msra.mxu0 %v8895_v55  ;;  %3767 = vmatpush.msra.mxu2 %v3636_v13  ;;  %v2282_v13 = vld [vmem:[%s10899_s1 + $0x238] sm:$0x1]  ;;  %v9064_v12 = vand.u32 4294901760, %v2270_v2  ;;  %v2058_v55 = vpop.f32.mrf.mxu3  ;;  %v9139_v19 = vsub.f32 %v3820_v26, %v9095_v59  ;;  %v2276_v26 = vld [vmem:[%s10899_s1 + $0x208] sm:$0xff] }
 0x1a0   :  { %3719 = vmatpush.msra.mxu1 %v8767_v40  ;;  %3807 = vmatpush.msra.mxu3 %v8859_v45  ;;  %v9049_v40 = vsub.f32 %v3823_v48, %v9025_v21  ;;  %v4079_v36 = vsel %vm165_vm0, %v2282_v13, 0  ;;  %v9198_v13 = vand.u32 4294901760, %v2278_v58 }
 0x1a1   :  { %3696 = vmatpush.msra.mxu0 %v8910_v62  ;;  %3771 = vmatpush.msra.mxu2 %v3642_v53  ;;  %v2269_v53 = vld [vmem:[%s10899_s1 + $0x1d0] sm:$0xff]  ;;  %v9084_v39 = vand.u32 4294901760, %v4079_v36  ;;  %v3852_v48 = vand.u32 4294901760, %v9139_v19 }
 0x1a2   :  { %3721 = vmatpush.msra.mxu1 %v8791_v38  ;;  %3809 = vmatpush.msra.mxu3 %v8878_v47  ;;  %v9062_v38 = vsub.f32 %v2272_v17, %v9035_v4  ;;  %v9076_v62 = vand.u32 4294901760, %v2269_v53  ;;  %v3868_v5 = vand.u32 4294901760, %v9049_v40 }
 0x1a3   :  { %3699 = vmatpush.msra.mxu0 %v8926_v27  ;;  %3775 = vmatpush.msra.mxu2 %v3648_v54  ;;  %v9089_v27 = vsub.f32 %v2270_v2, %v9064_v12  ;;  %v9100_v54 = vand.u32 4294901760, %v2268_v42  ;;  %v9123_v15 = vsub.f32 %v4079_v36, %v9084_v39  ;;  %v3853_v32 = vsub.f32 %v9139_v19, %v3852_v48 }
 0x1a4   :  { %3723 = vmatpush.msra.mxu1 %v8807_v49  ;;  %3811 = vmatpush.msra.mxu3 %v8897_v10  ;;  %v9074_v49 = vsub.f32 %v2271_v8, %v9051_v63  ;;  %v3874_v28 = vand.u32 4294901760, %v9062_v38  ;;  %v3869_v44 = vsub.f32 %v9049_v40, %v3868_v5 }
 0x1a5   :  { %3702 = vmatpush.msra.mxu0 %v8938_v7  ;;  %3779 = vmatpush.msra.mxu2 %v3654_v29  ;;  %v2280_v29 = vld [vmem:[%s10899_s1 + $0x228] sm:$0xff]  ;;  %v3886_v24 = vand.u32 4294901760, %v9089_v27  ;;  %v4124_v1 = vand.u32 4294901760, %v9123_v15 }
 0x1a6   :  { %3725 = vmatpush.msra.mxu1 %v8840_v46  ;;  %3813 = vmatpush.msra.mxu3 %v8912_v35  ;;  %v1992_v46 = vpop.f32.mrf.mxu2  ;;  %v3880_v7 = vand.u32 4294901760, %v9074_v49  ;;  %v9149_v43 = vand.u32 4294901760, %v2280_v29  ;;  %v3870_v51 = vand.u32 4294901760, %v3869_v44 }
 0x1a7   :  { %3705 = vmatmul.f32.vlgmr.msra.gmra.mxu0 %v8958_v11  ;;  %3815 = vmatmul.f32.vlgmr.msra.gmra.mxu3 %v8941_v25  ;;  %v2059_v30 = vadd.f32 %v2058_v55, %v1992_v46  ;;  %v3887_v60 = vsub.f32 %v9089_v27, %v3886_v24  ;;  %v4125_v3 = vsub.f32 %v9123_v15, %v4124_v1  ;;  %v3904_v46 = vand.u32 4294901760, %v9176_v33 }
 0x1a8   :  { %3833 = vmatpush.msrb.mxu0 %v9025_v21  ;;  %3973 = vmatpush.msrb.mxu3 %v9025_v21  ;;  %v3881_v23 = vsub.f32 %v9074_v49, %v3880_v7  ;;  %v9186_v34 = vsub.f32 %v2280_v29, %v9149_v43  ;;  %v2275_v29 = vld [vmem:[%s10899_s1 + $0x200] sm:$0xff] }
 0x1a9   :  { %3727 = vmatpush.msra.mxu1 %v8859_v45  ;;  %3783 = vmatpush.msra.mxu2 %v3660_v50  ;;  %v9111_v45 = vsub.f32 %v2269_v53, %v9076_v62  ;;  %v3875_v50 = vsub.f32 %v9062_v38, %v3874_v28  ;;  %v2099_v56 = vadd.f32 %v2098_v0, %v2059_v30  ;;  %v10916_v53 = vand.u32 4294901760, %v9163_v16 }
 0x1aa   :  { %3785 = vmatmul.f32.vlgmr.msra.gmra.mxu2 %v8941_v25  ;;  %3835 = vmatpush.msrb.mxu0 %v9035_v4  ;;  %v2266_v25 = vld [vmem:[%s10899_s1 + $0x1b8] sm:$0xff]  ;;  %v3882_v2 = vand.u32 4294901760, %v3881_v23  ;;  %v3888_v55 = vand.u32 4294901760, %v3887_v60  ;;  %v10917_v44 = vand.u32 4294901760, %v9186_v34 }
 0x1ab   :  { %3934 = vmatpush.msrb.mxu2 %v9049_v40  ;;  %3975 = vmatpush.msrb.mxu3 %v9035_v4  ;;  %v9156_v41 = vand.u32 4294901760, %v2266_v25  ;;  %v3892_v20 = vand.u32 4294901760, %v9111_v45  ;;  %v3876_v37 = vand.u32 4294901760, %v3875_v50  ;;  %v2131_v17 = vadd.f32 %v2130_v6, %v2099_v56 }
 0x1ac   :  { %3729 = vmatpush.msra.mxu1 %v8878_v47  ;;  %3837 = vmatpush.msrb.mxu0 %v9051_v63  ;;  %v9144_v47 = vsub.f32 %v2268_v42, %v9100_v54  ;;  %v9214_v42 = vsub.f32 %v2265_v61, %v9178_v22  ;;  %v9234_v56 = vsub.f32 %v2278_v58, %v9198_v13  ;;  %v9236_v61 = vand.u32 4294901760, %v2276_v26 }
 0x1ad   :  { %3937 = vmatpush.msrb.mxu2 %v9062_v38  ;;  %3977 = vmatpush.msrb.mxu3 %v9051_v63  ;;  %v3893_v11 = vsub.f32 %v9111_v45, %v3892_v20  ;;  %v4126_v6 = vand.u32 4294901760, %v4125_v3  ;;  %v3905_v58 = vsub.f32 %v9176_v33, %v3904_v46 }
 0x1ae   :  { %3731 = vmatpush.msra.mxu1 %v8897_v10  ;;  %3839 = vmatpush.msrb.mxu0 %v9064_v12  ;;  %v9165_v10 = vand.u32 4294901760, %v2279_v31  ;;  %v2178_v8 = vpop.f32.mrf.mxu2  ;;  %v3916_v60 = vand.u32 4294901760, %v9214_v42 }
 0x1af   :  { %3940 = vmatpush.msrb.mxu2 %v9074_v49  ;;  %3979 = vmatpush.msrb.mxu3 %v9064_v12  ;;  %v2179_v30 = vadd.f32 %v2178_v8, %v2131_v17  ;;  %v3894_v50 = vand.u32 4294901760, %v3893_v11  ;;  %v9253_v17 = vsub.f32 %v2277_v18, %v9217_v9  ;;  %v9255_v8 = vand.u32 4294901760, %v2275_v29 }
 0x1b0   :  { %3733 = vmatpush.msra.mxu1 %v8912_v35  ;;  %3841 = vmatpush.msrb.mxu0 %v9076_v62  ;;  %v3898_v35 = vand.u32 4294901760, %v9144_v47  ;;  %v9207_v36 = vsub.f32 %v2279_v31, %v9165_v10  ;;  %v3854_v11 = vand.u32 4294901760, %v3853_v32 }
 0x1b1   :  { %3737 = vmatmul.f32.vlgmr.msra.gmra.mxu1 %v3596_v57  ;;  %3943 = vmatpush.msrb.mxu2 %v9089_v27  ;;  %v9196_v57 = vsub.f32 %v2266_v25, %v9156_v41  ;;  %v2208_v25 = vpop.f32.mrf.mxu3 }
 0x1b2   :  { %3871 = vmatpush.msrb.mxu1 %v3870_v51  ;;  %3981 = vmatpush.msrb.mxu3 %v9076_v62  ;;  %v3899_v0 = vsub.f32 %v9144_v47, %v3898_v35  ;;  %v4131_v51 = vsub.f32 %v9163_v16, %v10916_v53  ;;  %v4142_v23 = vand.u32 4294901760, %v9207_v36  ;;  %v4148_v53 = vand.u32 4294901760, %v9234_v56 }
 0x1b3   :  { %3843 = vmatpush.msrb.mxu0 %v9100_v54  ;;  %3946 = vmatpush.msrb.mxu2 %v9111_v45  ;;  %v3910_v31 = vand.u32 4294901760, %v9196_v57 }
 0x1b4   :  { %3877 = vmatpush.msrb.mxu1 %v3876_v37  ;;  %3983 = vmatpush.msrb.mxu3 %v9100_v54  ;;  %v2274_v37 = vld [vmem:[%s10899_s1 + $0x1f8] sm:$0xff]  ;;  %v3900_v3 = vand.u32 4294901760, %v3899_v0  ;;  %v4132_v32 = vand.u32 4294901760, %v4131_v51  ;;  %v4143_v0 = vsub.f32 %v9207_v36, %v4142_v23 }
 0x1b5   :  { %3845 = vmatpush.msrb.mxu0 %v9132_v14  ;;  %3949 = vmatpush.msrb.mxu2 %v9144_v47  ;;  %v3911_v18 = vsub.f32 %v9196_v57, %v3910_v31  ;;  %v2320_v47 = vpop.f32.mrf.mxu0 }
 0x1b6   :  { %3883 = vmatpush.msrb.mxu1 %v3882_v2  ;;  %3985 = vmatpush.msrb.mxu3 %v9132_v14  ;;  %v2209_v2 = vadd.f32 %v2208_v25, %v2179_v30  ;;  %v9268_v30 = vsub.f32 %v2276_v26, %v9236_v61  ;;  %v9270_v25 = vand.u32 4294901760, %v2274_v37  ;;  %v3917_v26 = vsub.f32 %v9214_v42, %v3916_v60 }
 0x1b7   :  { %3847 = vmatpush.msrb.mxu0 %v9156_v41  ;;  %3952 = vmatpush.msrb.mxu2 %v9176_v33  ;;  %v3912_v40 = vand.u32 4294901760, %v3911_v18 }
 0x1b8   :  { %3889 = vmatpush.msrb.mxu1 %v3888_v55  ;;  %3987 = vmatpush.msrb.mxu3 %v9156_v41  ;;  %v4137_v55 = vsub.f32 %v9186_v34, %v10917_v44  ;;  %v4154_v44 = vand.u32 4294901760, %v9253_v17  ;;  %v3918_v38 = vand.u32 4294901760, %v3917_v26 }
 0x1b9   :  { %3849 = vmatpush.msrb.mxu0 %v9178_v22  ;;  %3955 = vmatpush.msrb.mxu2 %v9196_v57 }
 0x1ba   :  { %3895 = vmatpush.msrb.mxu1 %v3894_v50  ;;  %3989 = vmatpush.msrb.mxu3 %v9178_v22  ;;  %v3906_v50 = vand.u32 4294901760, %v3905_v58  ;;  %v4138_v51 = vand.u32 4294901760, %v4137_v55  ;;  %v4144_v58 = vand.u32 4294901760, %v4143_v0  ;;  %v4334_v0 = vld [vmem:[%s10898_s0 + $0x18] sm:$0xff] }
 0x1bb   :  { %3855 = vmatmul.f32.vlgmr.msrb.gmra.mxu0 %v3854_v11  ;;  %3993 = vmatmul.f32.vlgmr.msrb.gmra.mxu3 %v3852_v48  ;;  %v9284_v11 = vsub.f32 %v2275_v29, %v9255_v8  ;;  %v4076_v48 = vsel %vm161_vm1, %v2209_v2, 0  ;;  %v9296_v29 = vsub.f32 %v2274_v37, %v9270_v25 }
 0x1bc   :  { %4007 = vmatpush.msra.mxu0 %v3868_v5  ;;  %4127 = vmatpush.msra.mxu3 %v4126_v6  ;;  %v4149_v5 = vsub.f32 %v9234_v56, %v4148_v53  ;;  %v4160_v6 = vand.u32 4294901760, %v9268_v30  ;;  %v9299_v2 = vand.u32 4294901760, %v4076_v48 }
 0x1bd   :  { %3901 = vmatpush.msrb.mxu1 %v3900_v3  ;;  %3958 = vmatpush.msrb.mxu2 %v9214_v42 }
 0x1be   :  { %3961 = vmatmul.f32.vlgmr.msrb.gmra.mxu2 %v9139_v19  ;;  %4011 = vmatpush.msra.mxu0 %v3874_v28  ;;  %v4155_v28 = vsub.f32 %v9253_v17, %v4154_v44  ;;  %v4166_v19 = vand.u32 4294901760, %v9284_v11  ;;  %v4150_v37 = vand.u32 4294901760, %v4149_v5  ;;  %v4161_v49 = vsub.f32 %v9268_v30, %v4160_v6 }
 0x1bf   :  { %4089 = vmatpush.msra.mxu2 %v9084_v39  ;;  %4133 = vmatpush.msra.mxu3 %v4132_v32  ;;  %v9316_v3 = vsub.f32 %v4076_v48, %v9299_v2 }
 0x1c0   :  { %3907 = vmatpush.msrb.mxu1 %v3906_v50  ;;  %4015 = vmatpush.msra.mxu0 %v3880_v7  ;;  %v4172_v7 = vand.u32 4294901760, %v9296_v29  ;;  %v4156_v55 = vand.u32 4294901760, %v4155_v28  ;;  %v4167_v27 = vsub.f32 %v9284_v11, %v4166_v19 }
 0x1c1   :  { %4091 = vmatpush.msra.mxu2 %v9125_v52  ;;  %4139 = vmatpush.msra.mxu3 %v4138_v51  ;;  %v4108_v45 = vand.u32 4294901760, %v9316_v3  ;;  %v9458_v51 = vand.u32 4294901760, %v4334_v0 }
 0x1c2   :  { %3913 = vmatpush.msrb.mxu1 %v3912_v40  ;;  %4019 = vmatpush.msra.mxu0 %v3886_v24  ;;  %v4162_v24 = vand.u32 4294901760, %v4161_v49  ;;  %v4173_v18 = vsub.f32 %v9296_v29, %v4172_v7  ;;  %v4333_v40 = vld [vmem:[%s10898_s0 + $0x10] sm:$0xff] }
 0x1c3   :  { %4093 = vmatpush.msra.mxu2 %v9149_v43  ;;  %4145 = vmatpush.msra.mxu3 %v4144_v58  ;;  %v4346_v58 = vld [vmem:[%s10898_s0 + $0x78] sm:$0xff] }
 0x1c4   :  { %3919 = vmatpush.msrb.mxu1 %v3918_v38  ;;  %4023 = vmatpush.msra.mxu0 %v3892_v20  ;;  %v4168_v20 = vand.u32 4294901760, %v4167_v27  ;;  %v4345_v27 = vld [vmem:[%s10898_s0 + $0x70] sm:$0xff] }
 0x1c5   :  { %3921 = vmatmul.f32.vlgmr.msrb.gmra.mxu1 %v9095_v59  ;;  %4095 = vmatpush.msra.mxu2 %v9165_v10 }
 0x1c6   :  { %4053 = vmatpush.msra.mxu1 %v9025_v21  ;;  %4151 = vmatpush.msra.mxu3 %v4150_v37  ;;  %v4174_v21 = vand.u32 4294901760, %v4173_v18 }
 0x1c7   :  { %4027 = vmatpush.msra.mxu0 %v3898_v35  ;;  %4097 = vmatpush.msra.mxu2 %v9198_v13  ;;  %v10950_v35 = vand.u32 4294901760, %v9163_v16 }
 0x1c8   :  { %4055 = vmatpush.msra.mxu1 %v9035_v4  ;;  %4157 = vmatpush.msra.mxu3 %v4156_v55  ;;  %v4109_v4 = vsub.f32 %v9316_v3, %v4108_v45 }
 0x1c9   :  { %4031 = vmatpush.msra.mxu0 %v3904_v46  ;;  %4099 = vmatpush.msra.mxu2 %v9217_v9  ;;  %v4348_v46 = vld [vmem:[%s10898_s0 + $0x88] sm:$0x1] }
 0x1ca   :  { %4057 = vmatpush.msra.mxu1 %v9051_v63  ;;  %4163 = vmatpush.msra.mxu3 %v4162_v24  ;;  %v2386_v63 = vpop.f32.mrf.mxu1 }
 0x1cb   :  { %4035 = vmatpush.msra.mxu0 %v3910_v31  ;;  %4101 = vmatpush.msra.mxu2 %v9236_v61  ;;  %v2387_v33 = vadd.f32 %v2386_v63, %v2320_v47 }
 0x1cc   :  { %4059 = vmatpush.msra.mxu1 %v9064_v12  ;;  %4169 = vmatpush.msra.mxu3 %v4168_v20  ;;  %v4110_v12 = vand.u32 4294901760, %v4109_v4  ;;  %v4331_v20 = vld [vmem:[%s10898_s0] sm:$0xff] }
 0x1cd   :  { %4039 = vmatpush.msra.mxu0 %v3916_v60  ;;  %4103 = vmatpush.msra.mxu2 %v9255_v8  ;;  %v4663_v60 = vsel %vm165_vm0, %v4348_v46, 0 }
 0x1ce   :  { %4061 = vmatpush.msra.mxu1 %v9076_v62  ;;  %4175 = vmatpush.msra.mxu3 %v4174_v21  ;;  %v4339_v62 = vld [vmem:[%s10898_s0 + $0x40] sm:$0x1]  ;;  %v9442_v50 = vand.u32 4294901760, %v4663_v60  ;;  %v9507_v21 = vand.u32 4294901760, %v4346_v58 }
 0x1cf   :  { %4041 = vmatmul.f32.vlgmr.msra.gmra.mxu0 %v9095_v59  ;;  %4177 = vmatmul.f32.vlgmr.msra.gmra.mxu3 %v9299_v2 }
 0x1d0   :  { %4190 = vmatpush.msrb.mxu0 %v9123_v15  ;;  %4309 = vmatpush.msrb.mxu3 %v9084_v39  ;;  %v10951_v15 = vand.u32 4294901760, %v9186_v34  ;;  %v9481_v38 = vsub.f32 %v4663_v60, %v9442_v50  ;;  %v4342_v60 = vld [vmem:[%s10898_s0 + $0x58] sm:$0xff] }
 0x1d1   :  { %4063 = vmatpush.msra.mxu1 %v9100_v54  ;;  %4105 = vmatpush.msra.mxu2 %v9270_v25  ;;  %v2426_v54 = vpop.f32.mrf.mxu2 }
 0x1d2   :  { %4111 = vmatmul.f32.vlgmr.msra.gmra.mxu2 %v4110_v12  ;;  %4193 = vmatpush.msrb.mxu0 %v9163_v16  ;;  %v2427_v57 = vadd.f32 %v2426_v54, %v2387_v33  ;;  %v2506_v16 = vpop.f32.mrf.mxu0  ;;  %v4708_v54 = vand.u32 4294901760, %v9481_v38 }
 0x1d3   :  { %4263 = vmatpush.msrb.mxu2 %v4124_v1  ;;  %4311 = vmatpush.msrb.mxu3 %v9125_v52  ;;  %v2458_v1 = vpop.f32.mrf.mxu3 }
 0x1d4   :  { %4065 = vmatpush.msra.mxu1 %v9132_v14  ;;  %4196 = vmatpush.msrb.mxu0 %v9186_v34  ;;  %v4407_v14 = vsel %vm165_vm0, %v4339_v62, 0  ;;  %v2459_v34 = vadd.f32 %v2458_v1, %v2427_v57  ;;  %v4344_v57 = vld [vmem:[%s10898_s0 + $0x68] sm:$0xff]  ;;  %v4709_v46 = vsub.f32 %v9481_v38, %v4708_v54 }
 0x1d5   :  { %4267 = vmatpush.msrb.mxu2 %v10950_v35  ;;  %4313 = vmatpush.msrb.mxu3 %v9149_v43  ;;  %v9383_v42 = vand.u32 4294901760, %v4407_v14  ;;  %v9523_v35 = vand.u32 4294901760, %v4345_v27 }
 0x1d6   :  { %4067 = vmatpush.msra.mxu1 %v9156_v41  ;;  %4199 = vmatpush.msrb.mxu0 %v9207_v36  ;;  %v4338_v41 = vld [vmem:[%s10898_s0 + $0x38] sm:$0xff]  ;;  %v2507_v36 = vadd.f32 %v2506_v16, %v2459_v34  ;;  %v9536_v16 = vand.u32 4294901760, %v4331_v20 }
 0x1d7   :  { %4271 = vmatpush.msrb.mxu2 %v10951_v15  ;;  %4315 = vmatpush.msrb.mxu3 %v9165_v10 }
 0x1d8   :  { %4069 = vmatpush.msra.mxu1 %v9178_v22  ;;  %4202 = vmatpush.msrb.mxu0 %v9234_v56  ;;  %v2536_v22 = vpop.f32.mrf.mxu1 }
 0x1d9   :  { %4071 = vmatmul.f32.vlgmr.msra.gmra.mxu1 %v9095_v59  ;;  %4275 = vmatpush.msrb.mxu2 %v4142_v23  ;;  %v4337_v59 = vld [vmem:[%s10898_s0 + $0x30] sm:$0xff]  ;;  %v2537_v31 = vadd.f32 %v2536_v22, %v2507_v36  ;;  %v2576_v5 = vpop.f32.mrf.mxu2  ;;  %v9544_v22 = vsub.f32 %v4346_v58, %v9507_v21 }
 0x1da   :  { %4229 = vmatpush.msrb.mxu1 %v9084_v39  ;;  %4317 = vmatpush.msrb.mxu3 %v9198_v13  ;;  %v9393_v39 = vand.u32 4294901760, %v4338_v41  ;;  %v9409_v56 = vand.u32 4294901760, %v4337_v59  ;;  %v2682_v37 = vpop.f32.mrf.mxu0 }
 0x1db   :  { %4205 = vmatpush.msrb.mxu0 %v9253_v17  ;;  %4279 = vmatpush.msrb.mxu2 %v4148_v53  ;;  %v4336_v53 = vld [vmem:[%s10898_s0 + $0x28] sm:$0xff]  ;;  %v4404_v17 = vsel %vm161_vm1, %v2537_v31, 0 }
 0x1dc   :  { %4231 = vmatpush.msrb.mxu1 %v9125_v52  ;;  %4319 = vmatpush.msrb.mxu3 %v9217_v9  ;;  %v9407_v52 = vsub.f32 %v4407_v14, %v9383_v42  ;;  %v9422_v23 = vand.u32 4294901760, %v4336_v53  ;;  %v9453_v48 = vand.u32 4294901760, %v4404_v17 }
 0x1dd   :  { %4208 = vmatpush.msrb.mxu0 %v9268_v30  ;;  %4283 = vmatpush.msrb.mxu2 %v4154_v44  ;;  %v4335_v44 = vld [vmem:[%s10898_s0 + $0x20] sm:$0xff] }
 0x1de   :  { %4233 = vmatpush.msrb.mxu1 %v9149_v43  ;;  %4321 = vmatpush.msrb.mxu3 %v9236_v61  ;;  %v9420_v43 = vsub.f32 %v4338_v41, %v9393_v39  ;;  %v9434_v30 = vand.u32 4294901760, %v4335_v44  ;;  %v4452_v32 = vand.u32 4294901760, %v9407_v52  ;;  %v9497_v24 = vsub.f32 %v4404_v17, %v9453_v48 }
 0x1df   :  { %4211 = vmatpush.msrb.mxu0 %v9284_v11  ;;  %4287 = vmatpush.msrb.mxu2 %v4160_v6  ;;  %v4347_v11 = vld [vmem:[%s10898_s0 + $0x80] sm:$0xff] }
 0x1e0   :  { %4235 = vmatpush.msrb.mxu1 %v9165_v10  ;;  %4323 = vmatpush.msrb.mxu3 %v9255_v8  ;;  %v9432_v10 = vsub.f32 %v4337_v59, %v9409_v56  ;;  %v4458_v26 = vand.u32 4294901760, %v9420_v43  ;;  %v4453_v6 = vsub.f32 %v9407_v52, %v4452_v32  ;;  %v9483_v28 = vand.u32 4294901760, %v4347_v11  ;;  %v2714_v4 = vpop.f32.mrf.mxu1  ;;  %v4343_v59 = vld [vmem:[%s10898_s0 + $0x60] sm:$0xff] }
 0x1e1   :  { %4214 = vmatpush.msrb.mxu0 %v9296_v29  ;;  %4291 = vmatpush.msrb.mxu2 %v4166_v19  ;;  %v2642_v19 = vpop.f32.mrf.mxu3  ;;  %v4436_v41 = vand.u32 4294901760, %v9497_v24  ;;  %v2762_v17 = vpop.f32.mrf.mxu2 }
 0x1e2   :  { %4237 = vmatpush.msrb.mxu1 %v9198_v13  ;;  %4325 = vmatpush.msrb.mxu3 %v9270_v25  ;;  %v9447_v13 = vsub.f32 %v4336_v53, %v9422_v23  ;;  %v4464_v29 = vand.u32 4294901760, %v9432_v10  ;;  %v4459_v49 = vsub.f32 %v9420_v43, %v4458_v26  ;;  %v2643_v18 = vadd.f32 %v2642_v19, %v2576_v5 }
 0x1e3   :  { %4217 = vmatmul.f32.vlgmr.msrb.gmra.mxu0 %v9316_v3  ;;  %4327 = vmatmul.f32.vlgmr.msrb.gmra.mxu3 %v9299_v2  ;;  %v4454_v63 = vand.u32 4294901760, %v4453_v6  ;;  %v9556_v53 = vand.u32 4294901760, %v4344_v57  ;;  %v9575_v5 = vand.u32 4294901760, %v4343_v59  ;;  %v4437_v6 = vsub.f32 %v9497_v24, %v4436_v41 }
 0x1e4   :  { %4417 = vmatpush.msra.mxu0 %v9383_v42  ;;  %4557 = vmatpush.msra.mxu3 %v9383_v42  ;;  %v4470_v55 = vand.u32 4294901760, %v9447_v13  ;;  %v4465_v12 = vsub.f32 %v9432_v10, %v4464_v29  ;;  %v2683_v62 = vadd.f32 %v2682_v37, %v2643_v18  ;;  %v4460_v15 = vand.u32 4294901760, %v4459_v49  ;;  %v4341_v37 = vld [vmem:[%s10898_s0 + $0x50] sm:$0xff] }
 0x1e5   :  { %4239 = vmatpush.msrb.mxu1 %v9217_v9  ;;  %4295 = vmatpush.msrb.mxu2 %v4172_v7  ;;  %v9469_v9 = vsub.f32 %v4335_v44, %v9434_v30  ;;  %v9490_v7 = vand.u32 4294901760, %v4333_v40  ;;  %v9565_v44 = vsub.f32 %v4345_v27, %v9523_v35  ;;  %v10919_v19 = vand.u32 4294901760, %v9544_v22 }
 0x1e6   :  { %4297 = vmatmul.f32.vlgmr.msrb.gmra.mxu2 %v9299_v2  ;;  %4419 = vmatpush.msra.mxu0 %v9393_v39  ;;  %v4332_v2 = vld [vmem:[%s10898_s0 + $0x8] sm:$0xff]  ;;  %v4471_v14 = vsub.f32 %v9447_v13, %v4470_v55  ;;  %v2715_v34 = vadd.f32 %v2714_v4, %v2683_v62  ;;  %v4466_v36 = vand.u32 4294901760, %v4465_v12  ;;  %v9592_v18 = vsub.f32 %v4344_v57, %v9556_v53 }
 0x1e7   :  { %4518 = vmatpush.msra.mxu2 %v9407_v52  ;;  %4559 = vmatpush.msra.mxu3 %v9393_v39  ;;  %v9514_v47 = vand.u32 4294901760, %v4332_v2  ;;  %v4476_v33 = vand.u32 4294901760, %v9469_v9  ;;  %v9534_v1 = vsub.f32 %v4333_v40, %v9490_v7  ;;  %v4710_v4 = vand.u32 4294901760, %v4709_v46  ;;  %v4340_v62 = vld [vmem:[%s10898_s0 + $0x48] sm:$0xff] }
 0x1e8   :  { %4241 = vmatpush.msrb.mxu1 %v9236_v61  ;;  %4421 = vmatpush.msra.mxu0 %v9409_v56  ;;  %v9502_v61 = vsub.f32 %v4334_v0, %v9458_v51  ;;  %v4472_v0 = vand.u32 4294901760, %v4471_v14  ;;  %v2763_v58 = vadd.f32 %v2762_v17, %v2715_v34  ;;  %v4726_v12 = vand.u32 4294901760, %v9565_v44 }
 0x1e9   :  { %4521 = vmatpush.msra.mxu2 %v9420_v43  ;;  %4561 = vmatpush.msra.mxu3 %v9409_v56  ;;  %v4477_v3 = vsub.f32 %v9469_v9, %v4476_v33  ;;  %v4488_v40 = vand.u32 4294901760, %v9534_v1  ;;  %v9611_v34 = vsub.f32 %v4343_v59, %v9575_v5 }
 0x1ea   :  { %4243 = vmatpush.msrb.mxu1 %v9255_v8  ;;  %4423 = vmatpush.msra.mxu0 %v9422_v23  ;;  %v9521_v8 = vsub.f32 %v4347_v11, %v9483_v28  ;;  %v9572_v11 = vsub.f32 %v4331_v20, %v9536_v16  ;;  %v9594_v20 = vand.u32 4294901760, %v4342_v60 }
 0x1eb   :  { %4524 = vmatpush.msra.mxu2 %v9432_v10  ;;  %4563 = vmatpush.msra.mxu3 %v9422_v23  ;;  %v4478_v49 = vand.u32 4294901760, %v4477_v3  ;;  %v4489_v57 = vsub.f32 %v9534_v1, %v4488_v40  ;;  %v4438_v3 = vand.u32 4294901760, %v4437_v6 }
 0x1ec   :  { %4245 = vmatpush.msrb.mxu1 %v9270_v25  ;;  %4425 = vmatpush.msra.mxu0 %v9434_v30  ;;  %v4482_v25 = vand.u32 4294901760, %v9502_v61  ;;  %v10918_v31 = vand.u32 4294901760, %v9521_v8  ;;  %v4500_v14 = vand.u32 4294901760, %v9572_v11  ;;  %v9626_v6 = vsub.f32 %v4342_v60, %v9594_v20 }
 0x1ed   :  { %4249 = vmatmul.f32.vlgmr.msrb.gmra.mxu1 %v4108_v45  ;;  %4527 = vmatpush.msra.mxu2 %v9447_v13  ;;  %v9554_v45 = vsub.f32 %v4332_v2, %v9514_v47 }
 0x1ee   :  { %4455 = vmatpush.msra.mxu1 %v4454_v63  ;;  %4565 = vmatpush.msra.mxu3 %v9434_v30  ;;  %v4483_v2 = vsub.f32 %v9502_v61, %v4482_v25  ;;  %v4715_v63 = vsub.f32 %v9521_v8, %v10918_v31  ;;  %v4732_v31 = vand.u32 4294901760, %v9592_v18  ;;  %v4501_v60 = vsub.f32 %v9572_v11, %v4500_v14 }
 0x1ef   :  { %4427 = vmatpush.msra.mxu0 %v9458_v51  ;;  %4530 = vmatpush.msra.mxu2 %v9469_v9  ;;  %v4494_v27 = vand.u32 4294901760, %v9554_v45 }
 0x1f0   :  { %4461 = vmatpush.msra.mxu1 %v4460_v15  ;;  %4567 = vmatpush.msra.mxu3 %v9458_v51  ;;  %v2792_v15 = vpop.f32.mrf.mxu3  ;;  %v4484_v17 = vand.u32 4294901760, %v4483_v2  ;;  %v4716_v2 = vand.u32 4294901760, %v4715_v63  ;;  %v4502_v43 = vand.u32 4294901760, %v4501_v60 }
 0x1f1   :  { %4429 = vmatpush.msra.mxu0 %v9490_v7  ;;  %4533 = vmatpush.msra.mxu2 %v9502_v61  ;;  %v2793_v46 = vadd.f32 %v2792_v15, %v2763_v58  ;;  %v4495_v59 = vsub.f32 %v9554_v45, %v4494_v27  ;;  %v9628_v58 = vand.u32 4294901760, %v4340_v62  ;;  %v4490_v15 = vand.u32 4294901760, %v4489_v57 }
 0x1f2   :  { %4467 = vmatpush.msra.mxu1 %v4466_v36  ;;  %4569 = vmatpush.msra.mxu3 %v9490_v7  ;;  %v9613_v36 = vand.u32 4294901760, %v4341_v37 }
 0x1f3   :  { %4431 = vmatpush.msra.mxu0 %v9514_v47  ;;  %4536 = vmatpush.msra.mxu2 %v9534_v1  ;;  %v4496_v52 = vand.u32 4294901760, %v4495_v59 }
 0x1f4   :  { %4473 = vmatpush.msra.mxu1 %v4472_v0  ;;  %4571 = vmatpush.msra.mxu3 %v9514_v47  ;;  %v4721_v0 = vsub.f32 %v9544_v22, %v10919_v19  ;;  %v4738_v19 = vand.u32 4294901760, %v9611_v34 }
 0x1f5   :  { %4433 = vmatpush.msra.mxu0 %v9536_v16  ;;  %4539 = vmatpush.msra.mxu2 %v9554_v45 }
 0x1f6   :  { %4479 = vmatpush.msra.mxu1 %v4478_v49  ;;  %4573 = vmatpush.msra.mxu3 %v9536_v16  ;;  %v4727_v49 = vsub.f32 %v9565_v44, %v4726_v12  ;;  %v4722_v63 = vand.u32 4294901760, %v4721_v0 }
 0x1f7   :  { %4439 = vmatmul.f32.vlgmr.msra.gmra.mxu0 %v4438_v3  ;;  %4577 = vmatmul.f32.vlgmr.msra.gmra.mxu3 %v4436_v41  ;;  %v9642_v3 = vsub.f32 %v4341_v37, %v9613_v36  ;;  %v4660_v41 = vsel %vm161_vm1, %v2793_v46, 0  ;;  %v9654_v37 = vsub.f32 %v4340_v62, %v9628_v58 }
 0x1f8   :  { %4591 = vmatpush.msrb.mxu0 %v4452_v32  ;;  %4711 = vmatpush.msrb.mxu3 %v4710_v4  ;;  %v4733_v32 = vsub.f32 %v9592_v18, %v4732_v31  ;;  %v4744_v4 = vand.u32 4294901760, %v9626_v6  ;;  %v4728_v57 = vand.u32 4294901760, %v4727_v49  ;;  %v9657_v46 = vand.u32 4294901760, %v4660_v41  ;;  %v4352_v49 = vld [vmem:[%s10898_s0 + $0xa8] sm:$0xff] }
 0x1f9   :  { %4485 = vmatpush.msra.mxu1 %v4484_v17  ;;  %4542 = vmatpush.msra.mxu2 %v9572_v11 }
 0x1fa   :  { %4545 = vmatmul.f32.vlgmr.msra.gmra.mxu2 %v9497_v24  ;;  %4595 = vmatpush.msrb.mxu0 %v4458_v26  ;;  %v4739_v26 = vsub.f32 %v9611_v34, %v4738_v19  ;;  %v4750_v24 = vand.u32 4294901760, %v9642_v3  ;;  %v4734_v62 = vand.u32 4294901760, %v4733_v32  ;;  %v4745_v10 = vsub.f32 %v9626_v6, %v4744_v4 }
 0x1fb   :  { %4673 = vmatpush.msrb.mxu2 %v9442_v50  ;;  %4717 = vmatpush.msrb.mxu3 %v4716_v2  ;;  %v9674_v17 = vsub.f32 %v4660_v41, %v9657_v46 }
 0x1fc   :  { %4491 = vmatpush.msra.mxu1 %v4490_v15  ;;  %4599 = vmatpush.msrb.mxu0 %v4464_v29  ;;  %v4756_v29 = vand.u32 4294901760, %v9654_v37  ;;  %v4740_v0 = vand.u32 4294901760, %v4739_v26  ;;  %v4751_v13 = vsub.f32 %v9642_v3, %v4750_v24 }
 0x1fd   :  { %4675 = vmatpush.msrb.mxu2 %v9483_v28  ;;  %4723 = vmatpush.msrb.mxu3 %v4722_v63  ;;  %v4692_v9 = vand.u32 4294901760, %v9674_v17  ;;  %v9816_v63 = vand.u32 4294901760, %v4352_v49 }
 0x1fe   :  { %4497 = vmatpush.msra.mxu1 %v4496_v52  ;;  %4603 = vmatpush.msrb.mxu0 %v4470_v55  ;;  %v4746_v55 = vand.u32 4294901760, %v4745_v10  ;;  %v4757_v59 = vsub.f32 %v9654_v37, %v4756_v29  ;;  %v4351_v52 = vld [vmem:[%s10898_s0 + $0xa0] sm:$0xff] }
 0x1ff   :  { %4677 = vmatpush.msrb.mxu2 %v9507_v21  ;;  %4729 = vmatpush.msrb.mxu3 %v4728_v57  ;;  %v4364_v57 = vld [vmem:[%s10898_s0 + $0x108] sm:$0xff] }
 0x200   :  { %4503 = vmatpush.msra.mxu1 %v4502_v43  ;;  %4607 = vmatpush.msrb.mxu0 %v4476_v33  ;;  %v4752_v33 = vand.u32 4294901760, %v4751_v13  ;;  %v4363_v13 = vld [vmem:[%s10898_s0 + $0x100] sm:$0xff] }
 0x201   :  { %4505 = vmatmul.f32.vlgmr.msra.gmra.mxu1 %v9453_v48  ;;  %4679 = vmatpush.msrb.mxu2 %v9523_v35 }
 0x202   :  { %4637 = vmatpush.msrb.mxu1 %v9383_v42  ;;  %4735 = vmatpush.msrb.mxu3 %v4734_v62  ;;  %v4758_v42 = vand.u32 4294901760, %v4757_v59 }
 0x203   :  { %4611 = vmatpush.msrb.mxu0 %v4482_v25  ;;  %4681 = vmatpush.msrb.mxu2 %v9556_v53  ;;  %v10952_v25 = vand.u32 4294901760, %v9521_v8 }
 0x204   :  { %4639 = vmatpush.msrb.mxu1 %v9393_v39  ;;  %4741 = vmatpush.msrb.mxu3 %v4740_v0  ;;  %v4693_v39 = vsub.f32 %v9674_v17, %v4692_v9 }
 0x205   :  { %4615 = vmatpush.msrb.mxu0 %v4488_v40  ;;  %4683 = vmatpush.msrb.mxu2 %v9575_v5  ;;  %v4366_v40 = vld [vmem:[%s10898_s0 + $0x118] sm:$0x1] }
 0x206   :  { %4641 = vmatpush.msrb.mxu1 %v9409_v56  ;;  %4747 = vmatpush.msrb.mxu3 %v4746_v55  ;;  %v2898_v56 = vpop.f32.mrf.mxu1  ;;  %v4694_v61 = vand.u32 4294901760, %v4693_v39 }
 0x207   :  { %4619 = vmatpush.msrb.mxu0 %v4494_v27  ;;  %4685 = vmatpush.msrb.mxu2 %v9594_v20 }
 0x208   :  { %4643 = vmatpush.msrb.mxu1 %v9422_v23  ;;  %4753 = vmatpush.msrb.mxu3 %v4752_v33  ;;  %v2832_v23 = vpop.f32.mrf.mxu0  ;;  %v4349_v33 = vld [vmem:[%s10898_s0 + $0x90] sm:$0xff] }
 0x209   :  { %4623 = vmatpush.msrb.mxu0 %v4500_v14  ;;  %4687 = vmatpush.msrb.mxu2 %v9613_v36  ;;  %v2899_v1 = vadd.f32 %v2898_v56, %v2832_v23  ;;  %v5175_v14 = vsel %vm165_vm0, %v4366_v40, 0 }
 0x20a   :  { %4645 = vmatpush.msrb.mxu1 %v9434_v30  ;;  %4759 = vmatpush.msrb.mxu3 %v4758_v42  ;;  %v4357_v30 = vld [vmem:[%s10898_s0 + $0xd0] sm:$0x1]  ;;  %v9800_v15 = vand.u32 4294901760, %v5175_v14  ;;  %v9865_v42 = vand.u32 4294901760, %v4364_v57 }
 0x20b   :  { %4625 = vmatmul.f32.vlgmr.msrb.gmra.mxu0 %v9453_v48  ;;  %4761 = vmatmul.f32.vlgmr.msrb.gmra.mxu3 %v9657_v46 }
 0x20c   :  { %4774 = vmatpush.msra.mxu0 %v9481_v38  ;;  %4893 = vmatpush.msra.mxu3 %v9442_v50  ;;  %v10953_v38 = vand.u32 4294901760, %v9544_v22  ;;  %v9839_v43 = vsub.f32 %v5175_v14, %v9800_v15  ;;  %v4360_v14 = vld [vmem:[%s10898_s0 + $0xe8] sm:$0xff] }
 0x20d   :  { %4647 = vmatpush.msrb.mxu1 %v9458_v51  ;;  %4689 = vmatpush.msrb.mxu2 %v9628_v58  ;;  %v2938_v51 = vpop.f32.mrf.mxu2 }
 0x20e   :  { %4695 = vmatmul.f32.vlgmr.msrb.gmra.mxu2 %v4694_v61  ;;  %4777 = vmatpush.msra.mxu0 %v9521_v8  ;;  %v2939_v45 = vadd.f32 %v2938_v51, %v2899_v1  ;;  %v5220_v51 = vand.u32 4294901760, %v9839_v43 }
 0x20f   :  { %4847 = vmatpush.msra.mxu2 %v4708_v54  ;;  %4895 = vmatpush.msra.mxu3 %v9483_v28  ;;  %v2970_v54 = vpop.f32.mrf.mxu3 }
 0x210   :  { %4649 = vmatpush.msrb.mxu1 %v9490_v7  ;;  %4780 = vmatpush.msra.mxu0 %v9544_v22  ;;  %v4919_v7 = vsel %vm165_vm0, %v4357_v30, 0  ;;  %v3018_v8 = vpop.f32.mrf.mxu0  ;;  %v2971_v22 = vadd.f32 %v2970_v54, %v2939_v45  ;;  %v4362_v45 = vld [vmem:[%s10898_s0 + $0xf8] sm:$0xff]  ;;  %v5221_v40 = vsub.f32 %v9839_v43, %v5220_v51 }
 0x211   :  { %4851 = vmatpush.msra.mxu2 %v10952_v25  ;;  %4897 = vmatpush.msra.mxu3 %v9507_v21  ;;  %v9741_v11 = vand.u32 4294901760, %v4919_v7  ;;  %v9881_v25 = vand.u32 4294901760, %v4363_v13 }
 0x212   :  { %4651 = vmatpush.msrb.mxu1 %v9514_v47  ;;  %4783 = vmatpush.msra.mxu0 %v9565_v44  ;;  %v4356_v47 = vld [vmem:[%s10898_s0 + $0xc8] sm:$0xff]  ;;  %v3019_v44 = vadd.f32 %v3018_v8, %v2971_v22  ;;  %v9894_v8 = vand.u32 4294901760, %v4349_v33 }
 0x213   :  { %4855 = vmatpush.msra.mxu2 %v10953_v38  ;;  %4899 = vmatpush.msra.mxu3 %v9523_v35 }
 0x214   :  { %4653 = vmatpush.msrb.mxu1 %v9536_v16  ;;  %4786 = vmatpush.msra.mxu0 %v9592_v18  ;;  %v3048_v16 = vpop.f32.mrf.mxu1 }
 0x215   :  { %4655 = vmatmul.f32.vlgmr.msrb.gmra.mxu1 %v9453_v48  ;;  %4859 = vmatpush.msra.mxu2 %v4726_v12  ;;  %v4355_v48 = vld [vmem:[%s10898_s0 + $0xc0] sm:$0xff]  ;;  %v3049_v27 = vadd.f32 %v3048_v16, %v3019_v44  ;;  %v3088_v32 = vpop.f32.mrf.mxu2  ;;  %v9902_v16 = vsub.f32 %v4364_v57, %v9865_v42 }
 0x216   :  { %4813 = vmatpush.msra.mxu1 %v9442_v50  ;;  %4901 = vmatpush.msra.mxu3 %v9556_v53  ;;  %v9751_v50 = vand.u32 4294901760, %v4356_v47  ;;  %v9767_v18 = vand.u32 4294901760, %v4355_v48 }
 0x217   :  { %4789 = vmatpush.msra.mxu0 %v9611_v34  ;;  %4863 = vmatpush.msra.mxu2 %v4732_v31  ;;  %v4354_v31 = vld [vmem:[%s10898_s0 + $0xb8] sm:$0xff]  ;;  %v4916_v34 = vsel %vm161_vm1, %v3049_v27, 0 }
 0x218   :  { %4815 = vmatpush.msra.mxu1 %v9483_v28  ;;  %4903 = vmatpush.msra.mxu3 %v9575_v5  ;;  %v9765_v28 = vsub.f32 %v4919_v7, %v9741_v11  ;;  %v9780_v12 = vand.u32 4294901760, %v4354_v31  ;;  %v9811_v41 = vand.u32 4294901760, %v4916_v34  ;;  %v3194_v62 = vpop.f32.mrf.mxu0 }
 0x219   :  { %4792 = vmatpush.msra.mxu0 %v9626_v6  ;;  %4867 = vmatpush.msra.mxu2 %v4738_v19  ;;  %v4353_v19 = vld [vmem:[%s10898_s0 + $0xb0] sm:$0xff] }
 0x21a   :  { %4817 = vmatpush.msra.mxu1 %v9507_v21  ;;  %4905 = vmatpush.msra.mxu3 %v9594_v20  ;;  %v9778_v21 = vsub.f32 %v4356_v47, %v9751_v50  ;;  %v9792_v6 = vand.u32 4294901760, %v4353_v19  ;;  %v4964_v2 = vand.u32 4294901760, %v9765_v28  ;;  %v9855_v55 = vsub.f32 %v4916_v34, %v9811_v41 }
 0x21b   :  { %4795 = vmatpush.msra.mxu0 %v9642_v3  ;;  %4871 = vmatpush.msra.mxu2 %v4744_v4  ;;  %v4365_v3 = vld [vmem:[%s10898_s0 + $0x110] sm:$0xff] }
 0x21c   :  { %4819 = vmatpush.msra.mxu1 %v9523_v35  ;;  %4907 = vmatpush.msra.mxu3 %v9613_v36  ;;  %v9790_v35 = vsub.f32 %v4355_v48, %v9767_v18  ;;  %v4970_v60 = vand.u32 4294901760, %v9778_v21  ;;  %v4965_v4 = vsub.f32 %v9765_v28, %v4964_v2  ;;  %v9841_v26 = vand.u32 4294901760, %v4365_v3  ;;  %v3226_v39 = vpop.f32.mrf.mxu1  ;;  %v4361_v48 = vld [vmem:[%s10898_s0 + $0xf0] sm:$0xff] }
 0x21d   :  { %4798 = vmatpush.msra.mxu0 %v9654_v37  ;;  %4875 = vmatpush.msra.mxu2 %v4750_v24  ;;  %v3154_v24 = vpop.f32.mrf.mxu3  ;;  %v4948_v47 = vand.u32 4294901760, %v9855_v55  ;;  %v3274_v34 = vpop.f32.mrf.mxu2 }
 0x21e   :  { %4821 = vmatpush.msra.mxu1 %v9556_v53  ;;  %4909 = vmatpush.msra.mxu3 %v9628_v58  ;;  %v9805_v53 = vsub.f32 %v4354_v31, %v9780_v12  ;;  %v4976_v37 = vand.u32 4294901760, %v9790_v35  ;;  %v4971_v10 = vsub.f32 %v9778_v21, %v4970_v60  ;;  %v3155_v59 = vadd.f32 %v3154_v24, %v3088_v32 }
 0x21f   :  { %4801 = vmatmul.f32.vlgmr.msra.gmra.mxu0 %v9674_v17  ;;  %4911 = vmatmul.f32.vlgmr.msra.gmra.mxu3 %v9657_v46  ;;  %v4966_v56 = vand.u32 4294901760, %v4965_v4  ;;  %v9914_v31 = vand.u32 4294901760, %v4362_v45  ;;  %v9933_v32 = vand.u32 4294901760, %v4361_v48  ;;  %v4949_v4 = vsub.f32 %v9855_v55, %v4948_v47 }
 0x220   :  { %4929 = vmatpush.msrb.mxu0 %v9741_v11  ;;  %5069 = vmatpush.msrb.mxu3 %v9741_v11  ;;  %v4982_v0 = vand.u32 4294901760, %v9805_v53  ;;  %v4977_v61 = vsub.f32 %v9790_v35, %v4976_v37  ;;  %v3195_v30 = vadd.f32 %v3194_v62, %v3155_v59  ;;  %v4972_v38 = vand.u32 4294901760, %v4971_v10  ;;  %v4359_v62 = vld [vmem:[%s10898_s0 + $0xe0] sm:$0xff] }
 0x221   :  { %4823 = vmatpush.msra.mxu1 %v9575_v5  ;;  %4879 = vmatpush.msra.mxu2 %v4756_v29  ;;  %v9827_v5 = vsub.f32 %v4353_v19, %v9792_v6  ;;  %v9848_v29 = vand.u32 4294901760, %v4351_v52  ;;  %v9923_v19 = vsub.f32 %v4363_v13, %v9881_v25  ;;  %v10921_v24 = vand.u32 4294901760, %v9902_v16 }
 0x222   :  { %4881 = vmatmul.f32.vlgmr.msra.gmra.mxu2 %v9657_v46  ;;  %4931 = vmatpush.msrb.mxu0 %v9751_v50  ;;  %v4350_v46 = vld [vmem:[%s10898_s0 + $0x98] sm:$0xff]  ;;  %v4983_v7 = vsub.f32 %v9805_v53, %v4982_v0  ;;  %v3227_v22 = vadd.f32 %v3226_v39, %v3195_v30  ;;  %v4978_v44 = vand.u32 4294901760, %v4977_v61  ;;  %v9950_v59 = vsub.f32 %v4362_v45, %v9914_v31 }
 0x223   :  { %5030 = vmatpush.msrb.mxu2 %v9765_v28  ;;  %5071 = vmatpush.msrb.mxu3 %v9751_v50  ;;  %v9872_v23 = vand.u32 4294901760, %v4350_v46  ;;  %v4988_v1 = vand.u32 4294901760, %v9827_v5  ;;  %v9892_v54 = vsub.f32 %v4351_v52, %v9848_v29  ;;  %v5222_v39 = vand.u32 4294901760, %v5221_v40  ;;  %v4358_v30 = vld [vmem:[%s10898_s0 + $0xd8] sm:$0xff] }
 0x224   :  { %4825 = vmatpush.msra.mxu1 %v9594_v20  ;;  %4933 = vmatpush.msrb.mxu0 %v9767_v18  ;;  %v9860_v20 = vsub.f32 %v4352_v49, %v9816_v63  ;;  %v4984_v49 = vand.u32 4294901760, %v4983_v7  ;;  %v3275_v57 = vadd.f32 %v3274_v34, %v3227_v22  ;;  %v5238_v61 = vand.u32 4294901760, %v9923_v19 }
 0x225   :  { %5033 = vmatpush.msrb.mxu2 %v9778_v21  ;;  %5073 = vmatpush.msrb.mxu3 %v9767_v18  ;;  %v4989_v17 = vsub.f32 %v9827_v5, %v4988_v1  ;;  %v5000_v52 = vand.u32 4294901760, %v9892_v54  ;;  %v9969_v22 = vsub.f32 %v4361_v48, %v9933_v32 }
 0x226   :  { %4827 = vmatpush.msra.mxu1 %v9613_v36  ;;  %4935 = vmatpush.msrb.mxu0 %v9780_v12  ;;  %v9879_v36 = vsub.f32 %v4365_v3, %v9841_v26  ;;  %v9930_v3 = vsub.f32 %v4349_v33, %v9894_v8  ;;  %v9952_v33 = vand.u32 4294901760, %v4360_v14 }
 0x227   :  { %5036 = vmatpush.msrb.mxu2 %v9790_v35  ;;  %5075 = vmatpush.msrb.mxu3 %v9780_v12  ;;  %v4990_v10 = vand.u32 4294901760, %v4989_v17  ;;  %v5001_v45 = vsub.f32 %v9892_v54, %v5000_v52  ;;  %v4950_v17 = vand.u32 4294901760, %v4949_v4 }
 0x228   :  { %4829 = vmatpush.msra.mxu1 %v9628_v58  ;;  %4937 = vmatpush.msrb.mxu0 %v9792_v6  ;;  %v4994_v58 = vand.u32 4294901760, %v9860_v20  ;;  %v10920_v27 = vand.u32 4294901760, %v9879_v36  ;;  %v5012_v7 = vand.u32 4294901760, %v9930_v3  ;;  %v9984_v4 = vsub.f32 %v4360_v14, %v9952_v33 }
 0x229   :  { %4833 = vmatmul.f32.vlgmr.msra.gmra.mxu1 %v4692_v9  ;;  %5039 = vmatpush.msrb.mxu2 %v9805_v53  ;;  %v9912_v9 = vsub.f32 %v4350_v46, %v9872_v23 }
 0x22a   :  { %4967 = vmatpush.msrb.mxu1 %v4966_v56  ;;  %5077 = vmatpush.msrb.mxu3 %v9792_v6  ;;  %v4995_v46 = vsub.f32 %v9860_v20, %v4994_v58  ;;  %v5227_v56 = vsub.f32 %v9879_v36, %v10920_v27  ;;  %v5244_v27 = vand.u32 4294901760, %v9950_v59  ;;  %v5013_v14 = vsub.f32 %v9930_v3, %v5012_v7 }
 0x22b   :  { %4939 = vmatpush.msrb.mxu0 %v9816_v63  ;;  %5042 = vmatpush.msrb.mxu2 %v9827_v5  ;;  %v5006_v13 = vand.u32 4294901760, %v9912_v9 }
 0x22c   :  { %4973 = vmatpush.msrb.mxu1 %v4972_v38  ;;  %5079 = vmatpush.msrb.mxu3 %v9816_v63  ;;  %v3304_v38 = vpop.f32.mrf.mxu3  ;;  %v4996_v34 = vand.u32 4294901760, %v4995_v46  ;;  %v5228_v46 = vand.u32 4294901760, %v5227_v56  ;;  %v5014_v21 = vand.u32 4294901760, %v5013_v14  ;;  %v4370_v14 = vld [vmem:[%s10898_s0 + $0x138] sm:$0xff] }
 0x22d   :  { %4941 = vmatpush.msrb.mxu0 %v9848_v29  ;;  %5045 = vmatpush.msrb.mxu2 %v9860_v20  ;;  %v3305_v40 = vadd.f32 %v3304_v38, %v3275_v57  ;;  %v5007_v48 = vsub.f32 %v9912_v9, %v5006_v13  ;;  %v9986_v57 = vand.u32 4294901760, %v4358_v30  ;;  %v5002_v38 = vand.u32 4294901760, %v5001_v45 }
 0x22e   :  { %4979 = vmatpush.msrb.mxu1 %v4978_v44  ;;  %5081 = vmatpush.msrb.mxu3 %v9848_v29  ;;  %v9971_v44 = vand.u32 4294901760, %v4359_v62 }
 0x22f   :  { %4943 = vmatpush.msrb.mxu0 %v9872_v23  ;;  %5048 = vmatpush.msrb.mxu2 %v9892_v54  ;;  %v5008_v28 = vand.u32 4294901760, %v5007_v48 }
 0x230   :  { %4985 = vmatpush.msrb.mxu1 %v4984_v49  ;;  %5083 = vmatpush.msrb.mxu3 %v9872_v23  ;;  %v5233_v49 = vsub.f32 %v9902_v16, %v10921_v24  ;;  %v5250_v24 = vand.u32 4294901760, %v9969_v22 }
 0x231   :  { %4945 = vmatpush.msrb.mxu0 %v9894_v8  ;;  %5051 = vmatpush.msrb.mxu2 %v9912_v9 }
 0x232   :  { %4991 = vmatpush.msrb.mxu1 %v4990_v10  ;;  %5085 = vmatpush.msrb.mxu3 %v9894_v8  ;;  %v5239_v10 = vsub.f32 %v9923_v19, %v5238_v61  ;;  %v5234_v56 = vand.u32 4294901760, %v5233_v49 }
 0x233   :  { %4951 = vmatmul.f32.vlgmr.msrb.gmra.mxu0 %v4950_v17  ;;  %5089 = vmatmul.f32.vlgmr.msrb.gmra.mxu3 %v4948_v47  ;;  %v10000_v17 = vsub.f32 %v4359_v62, %v9971_v44  ;;  %v5172_v47 = vsel %vm161_vm1, %v3305_v40, 0  ;;  %v10012_v62 = vsub.f32 %v4358_v30, %v9986_v57 }
 0x234   :  { %5103 = vmatpush.msra.mxu0 %v4964_v2  ;;  %5223 = vmatpush.msra.mxu3 %v5222_v39  ;;  %v5245_v2 = vsub.f32 %v9950_v59, %v5244_v27  ;;  %v5256_v39 = vand.u32 4294901760, %v9984_v4  ;;  %v5240_v45 = vand.u32 4294901760, %v5239_v10  ;;  %v10015_v40 = vand.u32 4294901760, %v5172_v47 }
 0x235   :  { %4997 = vmatpush.msrb.mxu1 %v4996_v34  ;;  %5054 = vmatpush.msrb.mxu2 %v9930_v3 }
 0x236   :  { %5057 = vmatmul.f32.vlgmr.msrb.gmra.mxu2 %v9855_v55  ;;  %5107 = vmatpush.msra.mxu0 %v4970_v60  ;;  %v5251_v60 = vsub.f32 %v9969_v22, %v5250_v24  ;;  %v5262_v55 = vand.u32 4294901760, %v10000_v17  ;;  %v5246_v30 = vand.u32 4294901760, %v5245_v2  ;;  %v5257_v35 = vsub.f32 %v9984_v4, %v5256_v39 }
 0x237   :  { %5185 = vmatpush.msra.mxu2 %v9800_v15  ;;  %5229 = vmatpush.msra.mxu3 %v5228_v46  ;;  %v10032_v34 = vsub.f32 %v5172_v47, %v10015_v40  ;;  %v10174_v2 = vand.u32 4294901760, %v4370_v14 }
 0x238   :  { %5003 = vmatpush.msrb.mxu1 %v5002_v38  ;;  %5111 = vmatpush.msra.mxu0 %v4976_v37  ;;  %v5268_v37 = vand.u32 4294901760, %v10012_v62  ;;  %v5252_v49 = vand.u32 4294901760, %v5251_v60  ;;  %v5263_v53 = vsub.f32 %v10000_v17, %v5262_v55 }
 0x239   :  { %5187 = vmatpush.msra.mxu2 %v9841_v26  ;;  %5235 = vmatpush.msra.mxu3 %v5234_v56  ;;  %v5204_v5 = vand.u32 4294901760, %v10032_v34  ;;  %v4383_v56 = vld [vmem:[%s10898_s0 + $0x1a0] sm:$0xff] }
 0x23a   :  { %5009 = vmatpush.msrb.mxu1 %v5008_v28  ;;  %5115 = vmatpush.msra.mxu0 %v4982_v0  ;;  %v5258_v0 = vand.u32 4294901760, %v5257_v35  ;;  %v5269_v48 = vsub.f32 %v10012_v62, %v5268_v37  ;;  %v10199_v35 = vand.u32 4294901760, %v4383_v56 }
 0x23b   :  { %5189 = vmatpush.msra.mxu2 %v9865_v42  ;;  %5241 = vmatpush.msra.mxu3 %v5240_v45 }
 0x23c   :  { %5015 = vmatpush.msrb.mxu1 %v5014_v21  ;;  %5119 = vmatpush.msra.mxu0 %v4988_v1  ;;  %v5264_v1 = vand.u32 4294901760, %v5263_v53 }
 0x23d   :  { %5017 = vmatmul.f32.vlgmr.msrb.gmra.mxu1 %v9811_v41  ;;  %5191 = vmatpush.msra.mxu2 %v9881_v25 }
 0x23e   :  { %5149 = vmatpush.msra.mxu1 %v9741_v11  ;;  %5247 = vmatpush.msra.mxu3 %v5246_v30  ;;  %v5270_v11 = vand.u32 4294901760, %v5269_v48  ;;  %v4381_v48 = vld [vmem:[%s10898_s0 + $0x190] sm:$0xff] }
 0x23f   :  { %5123 = vmatpush.msra.mxu0 %v4994_v58  ;;  %5193 = vmatpush.msra.mxu2 %v9914_v31  ;;  %v10954_v58 = vand.u32 4294901760, %v9879_v36 }
 0x240   :  { %5151 = vmatpush.msra.mxu1 %v9751_v50  ;;  %5253 = vmatpush.msra.mxu3 %v5252_v49  ;;  %v5205_v50 = vsub.f32 %v10032_v34, %v5204_v5 }
 0x241   :  { %5127 = vmatpush.msra.mxu0 %v5000_v52  ;;  %5195 = vmatpush.msra.mxu2 %v9933_v32  ;;  %v4384_v52 = vld [vmem:[%s10898_s0 + $0x1a8] sm:$0x1] }
 0x242   :  { %5153 = vmatpush.msra.mxu1 %v9767_v18  ;;  %5259 = vmatpush.msra.mxu3 %v5258_v0  ;;  %v3410_v18 = vpop.f32.mrf.mxu1  ;;  %v5206_v20 = vand.u32 4294901760, %v5205_v50  ;;  %v4367_v50 = vld [vmem:[%s10898_s0 + $0x120] sm:$0xff] }
 0x243   :  { %5131 = vmatpush.msra.mxu0 %v5006_v13  ;;  %5197 = vmatpush.msra.mxu2 %v9952_v33 }
 0x244   :  { %5155 = vmatpush.msra.mxu1 %v9780_v12  ;;  %5265 = vmatpush.msra.mxu3 %v5264_v1  ;;  %v3344_v12 = vpop.f32.mrf.mxu0 }
 0x245   :  { %5135 = vmatpush.msra.mxu0 %v5012_v7  ;;  %5199 = vmatpush.msra.mxu2 %v9971_v44  ;;  %v3411_v54 = vadd.f32 %v3410_v18, %v3344_v12 }
 0x246   :  { %5157 = vmatpush.msra.mxu1 %v9792_v6  ;;  %5271 = vmatpush.msra.mxu3 %v5270_v11  ;;  %v4375_v6 = vld [vmem:[%s10898_s0 + $0x160] sm:$0x1] }
 0x247   :  { %5137 = vmatmul.f32.vlgmr.msra.gmra.mxu0 %v9811_v41  ;;  %5273 = vmatmul.f32.vlgmr.msra.gmra.mxu3 %v10015_v40 }
 0x248   :  { %5286 = vmatpush.msrb.mxu0 %v9839_v43  ;;  %5405 = vmatpush.msrb.mxu3 %v9800_v15  ;;  %v10955_v43 = vand.u32 4294901760, %v9902_v16 }
 0x249   :  { %5159 = vmatpush.msra.mxu1 %v9816_v63  ;;  %5201 = vmatpush.msra.mxu2 %v9986_v57  ;;  %v3450_v63 = vpop.f32.mrf.mxu2 }
 0x24a   :  { %5207 = vmatmul.f32.vlgmr.msra.gmra.mxu2 %v5206_v20  ;;  %5289 = vmatpush.msrb.mxu0 %v9879_v36  ;;  %v3451_v9 = vadd.f32 %v3450_v63, %v3411_v54 }
 0x24b   :  { %5359 = vmatpush.msrb.mxu2 %v5220_v51  ;;  %5407 = vmatpush.msrb.mxu3 %v9841_v26  ;;  %v3482_v51 = vpop.f32.mrf.mxu3 }
 0x24c   :  { %5161 = vmatpush.msra.mxu1 %v9848_v29  ;;  %5292 = vmatpush.msrb.mxu0 %v9902_v16  ;;  %v5431_v29 = vsel %vm165_vm0, %v4375_v6, 0  ;;  %v3530_v36 = vpop.f32.mrf.mxu0  ;;  %v3483_v16 = vadd.f32 %v3482_v51, %v3451_v9 }
 0x24d   :  { %5363 = vmatpush.msrb.mxu2 %v10954_v58  ;;  %5409 = vmatpush.msrb.mxu3 %v9865_v42  ;;  %v10099_v3 = vand.u32 4294901760, %v5431_v29 }
 0x24e   :  { %5163 = vmatpush.msra.mxu1 %v9872_v23  ;;  %5295 = vmatpush.msrb.mxu0 %v9923_v19  ;;  %v4374_v23 = vld [vmem:[%s10898_s0 + $0x158] sm:$0xff]  ;;  %v3531_v19 = vadd.f32 %v3530_v36, %v3483_v16  ;;  %v10256_v16 = vand.u32 4294901760, %v4367_v50 }
 0x24f   :  { %5367 = vmatpush.msrb.mxu2 %v10955_v43  ;;  %5411 = vmatpush.msrb.mxu3 %v9881_v25  ;;  %v10243_v43 = vand.u32 4294901760, %v4381_v48 }
 0x250   :  { %5165 = vmatpush.msra.mxu1 %v9894_v8  ;;  %5298 = vmatpush.msrb.mxu0 %v9950_v59  ;;  %v3560_v8 = vpop.f32.mrf.mxu1 }
 0x251   :  { %5167 = vmatmul.f32.vlgmr.msra.gmra.mxu1 %v9811_v41  ;;  %5371 = vmatpush.msrb.mxu2 %v5238_v61  ;;  %v4373_v41 = vld [vmem:[%s10898_s0 + $0x150] sm:$0xff]  ;;  %v3561_v13 = vadd.f32 %v3560_v8, %v3531_v19  ;;  %v3600_v61 = vpop.f32.mrf.mxu2 }
 0x252   :  { %5325 = vmatpush.msrb.mxu1 %v9800_v15  ;;  %5413 = vmatpush.msrb.mxu3 %v9914_v31  ;;  %v10109_v15 = vand.u32 4294901760, %v4374_v23  ;;  %v10125_v59 = vand.u32 4294901760, %v4373_v41 }
 0x253   :  { %5301 = vmatpush.msrb.mxu0 %v9969_v22  ;;  %5375 = vmatpush.msrb.mxu2 %v5244_v27  ;;  %v4372_v27 = vld [vmem:[%s10898_s0 + $0x148] sm:$0xff]  ;;  %v5687_v22 = vsel %vm165_vm0, %v4384_v52, 0  ;;  %v5428_v46 = vsel %vm161_vm1, %v3561_v13, 0 }
 0x254   :  { %5327 = vmatpush.msrb.mxu1 %v9841_v26  ;;  %5415 = vmatpush.msrb.mxu3 %v9933_v32  ;;  %v10123_v26 = vsub.f32 %v5431_v29, %v10099_v3  ;;  %v10138_v7 = vand.u32 4294901760, %v4372_v27  ;;  %v10169_v28 = vand.u32 4294901760, %v5428_v46  ;;  %v3706_v45 = vpop.f32.mrf.mxu0  ;;  %v4380_v29 = vld [vmem:[%s10898_s0 + $0x188] sm:$0xff] }
 0x255   :  { %5304 = vmatpush.msrb.mxu0 %v9984_v4  ;;  %5379 = vmatpush.msrb.mxu2 %v5250_v24  ;;  %v4371_v24 = vld [vmem:[%s10898_s0 + $0x140] sm:$0xff]  ;;  %v3666_v4 = vpop.f32.mrf.mxu3 }
 0x256   :  { %5329 = vmatpush.msrb.mxu1 %v9865_v42  ;;  %5417 = vmatpush.msrb.mxu3 %v9952_v33  ;;  %v10136_v42 = vsub.f32 %v4374_v23, %v10109_v15  ;;  %v10150_v10 = vand.u32 4294901760, %v4371_v24  ;;  %v5476_v38 = vand.u32 4294901760, %v10123_v26  ;;  %v10215_v1 = vsub.f32 %v5428_v46, %v10169_v28 }
 0x257   :  { %5307 = vmatpush.msrb.mxu0 %v10000_v17  ;;  %5383 = vmatpush.msrb.mxu2 %v5256_v39  ;;  %v10158_v17 = vand.u32 4294901760, %v5687_v22  ;;  %v4369_v39 = vld [vmem:[%s10898_s0 + $0x130] sm:$0xff]  ;;  %v3667_v11 = vadd.f32 %v3666_v4, %v3600_v61  ;;  %v10280_v61 = vand.u32 4294901760, %v4380_v29  ;;  %v10289_v46 = vsub.f32 %v4381_v48, %v10243_v43 }
 0x258   :  { %5331 = vmatpush.msrb.mxu1 %v9881_v25  ;;  %5419 = vmatpush.msrb.mxu3 %v9971_v44  ;;  %v10148_v25 = vsub.f32 %v4373_v41, %v10125_v59  ;;  %v5482_v47 = vand.u32 4294901760, %v10136_v42  ;;  %v3738_v21 = vpop.f32.mrf.mxu1  ;;  %v5477_v60 = vsub.f32 %v10123_v26, %v5476_v38  ;;  %v10208_v53 = vand.u32 4294901760, %v4369_v39 }
 0x259   :  { %5310 = vmatpush.msrb.mxu0 %v10012_v62  ;;  %5387 = vmatpush.msrb.mxu2 %v5262_v55  ;;  %v4382_v55 = vld [vmem:[%s10898_s0 + $0x198] sm:$0xff]  ;;  %v10197_v30 = vsub.f32 %v5687_v22, %v10158_v17  ;;  %v3707_v58 = vadd.f32 %v3706_v45, %v3667_v11  ;;  %v5460_v8 = vand.u32 4294901760, %v10215_v1  ;;  %v10298_v45 = vsub.f32 %v4367_v50, %v10256_v16  ;;  %v4377_v11 = vld [vmem:[%s10898_s0 + $0x170] sm:$0xff] }
 0x25a   :  { %5333 = vmatpush.msrb.mxu1 %v9914_v31  ;;  %5421 = vmatpush.msrb.mxu3 %v9986_v57  ;;  %v10163_v31 = vsub.f32 %v4372_v27, %v10138_v7  ;;  %v10931_v62 = vand.u32 4294901760, %v10148_v25  ;;  %v5483_v49 = vsub.f32 %v10136_v42, %v5482_v47  ;;  %v10225_v18 = vand.u32 4294901760, %v4382_v55  ;;  %v4379_v27 = vld [vmem:[%s10898_s0 + $0x180] sm:$0xff] }
 0x25b   :  { %5313 = vmatmul.f32.vlgmr.msrb.gmra.mxu0 %v10032_v34  ;;  %5423 = vmatmul.f32.vlgmr.msrb.gmra.mxu3 %v10015_v40  ;;  %v5478_v12 = vand.u32 4294901760, %v5477_v60  ;;  %v10922_v9 = vand.u32 4294901760, %v10197_v30  ;;  %v10254_v23 = vsub.f32 %v4369_v39, %v10208_v53  ;;  %v3739_v41 = vadd.f32 %v3738_v21, %v3707_v58 }
 0x25c   :  { %5441 = vmatpush.msra.mxu0 %v10099_v3  ;;  %5581 = vmatpush.msra.mxu3 %v10099_v3  ;;  %v10927_v0 = vand.u32 4294901760, %v10163_v31  ;;  %v5489_v54 = vsub.f32 %v10148_v25, %v10931_v62  ;;  %v5484_v51 = vand.u32 4294901760, %v5483_v49  ;;  %v10264_v19 = vsub.f32 %v4382_v55, %v10225_v18  ;;  %v10269_v52 = vpop.f32.mrf.mxu0 }
 0x25d   :  { %5335 = vmatpush.msrb.mxu1 %v9933_v32  ;;  %5391 = vmatpush.msrb.mxu2 %v5268_v37  ;;  %v10185_v32 = vsub.f32 %v4371_v24, %v10150_v10  ;;  %v10201_v37 = vpop.f32.mrf.mxu2  ;;  %v10227_v20 = vpop.f32.mrf.mxu3  ;;  %v5733_v22 = vsub.f32 %v10197_v30, %v10922_v9  ;;  %v10926_v21 = vand.u32 4294901760, %v10254_v23  ;;  %v10301_v60 = vand.u32 4294901760, %v4379_v27 }
 0x25e   :  { %5393 = vmatmul.f32.vlgmr.msrb.gmra.mxu2 %v10015_v40  ;;  %5443 = vmatpush.msra.mxu0 %v10109_v15  ;;  %v4368_v40 = vld [vmem:[%s10898_s0 + $0x128] sm:$0xff]  ;;  %v5495_v36 = vsub.f32 %v10163_v31, %v10927_v0  ;;  %v5490_v34 = vand.u32 4294901760, %v5489_v54  ;;  %v5461_v55 = vsub.f32 %v10215_v1, %v5460_v8  ;;  %v10928_v48 = vand.u32 4294901760, %v10264_v19 }
 0x25f   :  { %5542 = vmatpush.msra.mxu2 %v10123_v26  ;;  %5583 = vmatpush.msra.mxu3 %v10109_v15  ;;  %v10234_v6 = vand.u32 4294901760, %v4368_v40  ;;  %v10925_v63 = vand.u32 4294901760, %v10185_v32  ;;  %v10321_v54 = vsub.f32 %v4380_v29, %v10280_v61  ;;  %v5513_v29 = vsub.f32 %v10254_v23, %v10926_v21 }
 0x260   :  { %5337 = vmatpush.msrb.mxu1 %v9952_v33  ;;  %5445 = vmatpush.msra.mxu0 %v10125_v59  ;;  %v10220_v33 = vsub.f32 %v4370_v14, %v10174_v2  ;;  %v10271_v13 = vpop.f32.mrf.mxu1  ;;  %v4378_v14 = vld [vmem:[%s10898_s0 + $0x178] sm:$0xff]  ;;  %v5496_v39 = vand.u32 4294901760, %v5495_v36  ;;  %v10342_v9 = vand.u32 4294901760, %v4377_v11 }
 0x261   :  { %5545 = vmatpush.msra.mxu2 %v10136_v42  ;;  %5585 = vmatpush.msra.mxu3 %v10125_v59  ;;  %v10278_v24 = vsub.f32 %v4368_v40, %v10234_v6  ;;  %v3787_v40 = vadd.f32 %v10201_v37, %v3739_v41  ;;  %v10323_v58 = vand.u32 4294901760, %v4378_v14  ;;  %v10930_v41 = vand.u32 4294901760, %v10289_v46 }
 0x262   :  { %5339 = vmatpush.msrb.mxu1 %v9971_v44  ;;  %5447 = vmatpush.msra.mxu0 %v10138_v7  ;;  %v10241_v44 = vsub.f32 %v4383_v56, %v10199_v35  ;;  %v10956_v42 = vand.u32 4294901760, %v10148_v25 }
 0x263   :  { %5548 = vmatpush.msra.mxu2 %v10148_v25  ;;  %5587 = vmatpush.msra.mxu3 %v10138_v7 }
 0x264   :  { %5341 = vmatpush.msrb.mxu1 %v9986_v57  ;;  %5449 = vmatpush.msra.mxu0 %v10150_v10  ;;  %v10924_v57 = vand.u32 4294901760, %v10220_v33  ;;  %v10923_v4 = vand.u32 4294901760, %v10241_v44  ;;  %v10350_v21 = vpop.f32.mrf.mxu0 }
 0x265   :  { %5345 = vmatmul.f32.vlgmr.msrb.gmra.mxu1 %v5204_v5  ;;  %5551 = vmatpush.msra.mxu2 %v10163_v31  ;;  %v5501_v5 = vsub.f32 %v10185_v32, %v10925_v63  ;;  %v10294_v56 = vpop.f32.mrf.mxu2  ;;  %v10316_v50 = vpop.f32.mrf.mxu3  ;;  %v5745_v63 = vsub.f32 %v10264_v19, %v10928_v48 }
 0x266   :  { %5479 = vmatpush.msra.mxu1 %v5478_v12  ;;  %5589 = vmatpush.msra.mxu3 %v10150_v10  ;;  %v5507_v49 = vsub.f32 %v10220_v33, %v10924_v57  ;;  %v10929_v12 = vand.u32 4294901760, %v10278_v24  ;;  %v5739_v36 = vsub.f32 %v10241_v44, %v10923_v4  ;;  %v5462_v4 = vand.u32 4294901760, %v5461_v55 }
 0x267   :  { %5451 = vmatpush.msra.mxu0 %v10174_v2  ;;  %5554 = vmatpush.msra.mxu2 %v10185_v32  ;;  %v5502_v37 = vand.u32 4294901760, %v5501_v5  ;;  %v5524_v5 = vand.u32 4294901760, %v10298_v45  ;;  %v3817_v57 = vadd.f32 %v10227_v20, %v3787_v40  ;;  %v10360_v55 = vsub.f32 %v4378_v14, %v10323_v58 }
 0x268   :  { %5485 = vmatpush.msra.mxu1 %v5484_v51  ;;  %5591 = vmatpush.msra.mxu3 %v10174_v2  ;;  %v5734_v51 = vand.u32 4294901760, %v5733_v22  ;;  %v10340_v22 = vsub.f32 %v4379_v27, %v10301_v60  ;;  %v10352_v0 = vpop.f32.mrf.mxu1  ;;  %v5519_v20 = vsub.f32 %v10278_v24, %v10929_v12  ;;  %v5756_v27 = vand.u32 4294901760, %v10321_v54 }
 0x269   :  { %5453 = vmatpush.msra.mxu0 %v10208_v53  ;;  %5557 = vmatpush.msra.mxu2 %v10220_v33  ;;  %v5514_v12 = vand.u32 4294901760, %v5513_v29  ;;  %v5525_v14 = vsub.f32 %v10298_v45, %v5524_v5 }
 0x26a   :  { %5491 = vmatpush.msra.mxu1 %v5490_v34  ;;  %5593 = vmatpush.msra.mxu3 %v10208_v53  ;;  %v4376_v34 = vld [vmem:[%s10898_s0 + $0x168] sm:$0xff]  ;;  %v5520_v26 = vand.u32 4294901760, %v5519_v20 }
 0x26b   :  { %5455 = vmatpush.msra.mxu0 %v10234_v6  ;;  %5560 = vmatpush.msra.mxu2 %v10254_v23  ;;  %v10362_v40 = vand.u32 4294901760, %v4376_v34 }
 0x26c   :  { %5497 = vmatpush.msra.mxu1 %v5496_v39  ;;  %5595 = vmatpush.msra.mxu3 %v10234_v6  ;;  %v5508_v39 = vand.u32 4294901760, %v5507_v49  ;;  %v5740_v49 = vand.u32 4294901760, %v5739_v36  ;;  %v5684_v36 = vsel %vm161_vm1, %v3817_v57, 0 }
 0x26d   :  { %5457 = vmatpush.msra.mxu0 %v10256_v16  ;;  %5563 = vmatpush.msra.mxu2 %v10278_v24  ;;  %v10369_v48 = vpop.f32.mrf.mxu2  ;;  %v10382_v62 = vpop.f32.mrf.mxu3  ;;  %v10392_v57 = vsub.f32 %v4376_v34, %v10362_v40 }
 0x26e   :  { %5503 = vmatpush.msra.mxu1 %v5502_v37  ;;  %5597 = vmatpush.msra.mxu3 %v10256_v16  ;;  %v5751_v37 = vsub.f32 %v10289_v46, %v10930_v41  ;;  %v5746_v41 = vand.u32 4294901760, %v5745_v63  ;;  %v10404_v34 = vpop.f32.mrf.mxu0 }
 0x26f   :  { %5463 = vmatmul.f32.vlgmr.msra.gmra.mxu0 %v5462_v4  ;;  %5601 = vmatmul.f32.vlgmr.msra.gmra.mxu3 %v5460_v8  ;;  %v5762_v4 = vand.u32 4294901760, %v10340_v22  ;;  %v10378_v8 = vsub.f32 %v4377_v11, %v10342_v9  ;;  %v5768_v11 = vand.u32 4294901760, %v10360_v55 }
 0x270   :  { %5615 = vmatpush.msrb.mxu0 %v5476_v38  ;;  %5735 = vmatpush.msrb.mxu3 %v5734_v51  ;;  %v5757_v38 = vsub.f32 %v10321_v54, %v5756_v27  ;;  %v5752_v63 = vand.u32 4294901760, %v5751_v37  ;;  %v10395_v51 = vand.u32 4294901760, %v5684_v36  ;;  %v10411_v20 = vpop.f32.mrf.mxu1  ;;  %v10958_v37 = vand.u32 4294901760, %v10185_v32 }
 0x271   :  { %5509 = vmatpush.msra.mxu1 %v5508_v39  ;;  %5566 = vmatpush.msra.mxu2 %v10298_v45  ;;  %v5774_v29 = vand.u32 4294901760, %v10378_v8  ;;  %v10957_v39 = vand.u32 4294901760, %v10163_v31  ;;  %v5769_v25 = vsub.f32 %v10360_v55, %v5768_v11  ;;  %v10963_v45 = vand.u32 4294901760, %v10241_v44 }
 0x272   :  { %5569 = vmatmul.f32.vlgmr.msra.gmra.mxu2 %v10215_v1  ;;  %5619 = vmatpush.msrb.mxu0 %v5482_v47  ;;  %v5526_v47 = vand.u32 4294901760, %v5525_v14  ;;  %v5763_v1 = vsub.f32 %v10340_v22, %v5762_v4 }
 0x273   :  { %5697 = vmatpush.msrb.mxu2 %v10158_v17  ;;  %5741 = vmatpush.msrb.mxu3 %v5740_v49  ;;  %v5780_v49 = vand.u32 4294901760, %v10392_v57 }
 0x274   :  { %5515 = vmatpush.msra.mxu1 %v5514_v12  ;;  %5623 = vmatpush.msrb.mxu0 %v10956_v42  ;;  %v5758_v12 = vand.u32 4294901760, %v5757_v38  ;;  %v5764_v31 = vand.u32 4294901760, %v5763_v1  ;;  %v5770_v38 = vand.u32 4294901760, %v5769_v25 }
 0x275   :  { %5699 = vmatpush.msrb.mxu2 %v10199_v35  ;;  %5747 = vmatpush.msrb.mxu3 %v5746_v41  ;;  %v10416_v41 = vsub.f32 %v5684_v36, %v10395_v51  ;;  %v10420_v14 = vpop.f32.mrf.mxu2  ;;  %v10428_v36 = vpop.f32.mrf.mxu3  ;;  %v5781_v32 = vsub.f32 %v10392_v57, %v5780_v49 }
 0x276   :  { %5521 = vmatpush.msra.mxu1 %v5520_v26  ;;  %5627 = vmatpush.msrb.mxu0 %v10957_v39  ;;  %v5775_v26 = vsub.f32 %v10378_v8, %v5774_v29  ;;  %v4440_v39 = vpop.f32.mrf.mxu0 }
 0x277   :  { %5701 = vmatpush.msrb.mxu2 %v10225_v18  ;;  %5753 = vmatpush.msrb.mxu3 %v5752_v63  ;;  %v10959_v63 = vand.u32 4294901760, %v10220_v33  ;;  %v5716_v42 = vand.u32 4294901760, %v10416_v41  ;;  %v5782_v1 = vand.u32 4294901760, %v5781_v32 }
 0x278   :  { %5527 = vmatpush.msra.mxu1 %v5526_v47  ;;  %5631 = vmatpush.msrb.mxu0 %v10958_v37  ;;  %v5776_v47 = vand.u32 4294901760, %v5775_v26 }
 0x279   :  { %5529 = vmatmul.f32.vlgmr.msra.gmra.mxu1 %v10169_v28  ;;  %5703 = vmatpush.msrb.mxu2 %v10243_v43 }
 0x27a   :  { %5661 = vmatpush.msrb.mxu1 %v10099_v3  ;;  %5759 = vmatpush.msrb.mxu3 %v5758_v12  ;;  %v10960_v3 = vand.u32 4294901760, %v10254_v23  ;;  %v10961_v12 = vand.u32 4294901760, %v10278_v24  ;;  %v3923_v24 = vadd.f32 %v10271_v13, %v10269_v52 }
 0x27b   :  { %5635 = vmatpush.msrb.mxu0 %v10959_v63  ;;  %5705 = vmatpush.msrb.mxu2 %v10280_v61 }
 0x27c   :  { %5663 = vmatpush.msrb.mxu1 %v10109_v15  ;;  %5765 = vmatpush.msrb.mxu3 %v5764_v31  ;;  %v5717_v15 = vsub.f32 %v10416_v41, %v5716_v42  ;;  %v3963_v52 = vadd.f32 %v10294_v56, %v3923_v24  ;;  %v4179_v24 = vadd.f32 %v10382_v62, %v10369_v48 }
 0x27d   :  { %5639 = vmatpush.msrb.mxu0 %v10960_v3  ;;  %5707 = vmatpush.msrb.mxu2 %v10301_v60  ;;  %v4546_v23 = vpop.f32.mrf.mxu2  ;;  %v4578_v37 = vpop.f32.mrf.mxu3 }
 0x27e   :  { %5665 = vmatpush.msrb.mxu1 %v10125_v59  ;;  %5771 = vmatpush.msrb.mxu3 %v5770_v38  ;;  %v4506_v33 = vpop.f32.mrf.mxu1  ;;  %v5718_v31 = vand.u32 4294901760, %v5717_v15 }
 0x27f   :  { %5643 = vmatpush.msrb.mxu0 %v10961_v12  ;;  %5709 = vmatpush.msrb.mxu2 %v10323_v58  ;;  %v4507_v25 = vadd.f32 %v4506_v33, %v4440_v39  ;;  %v4401_v33 = vld [vmem:[%s10898_s0 + $0x230] sm:$0xff] }
 0x280   :  { %5667 = vmatpush.msrb.mxu1 %v10138_v7  ;;  %5777 = vmatpush.msrb.mxu3 %v5776_v47 }
 0x281   :  { %5647 = vmatpush.msrb.mxu0 %v5524_v5  ;;  %5711 = vmatpush.msrb.mxu2 %v10342_v9  ;;  %v4547_v59 = vadd.f32 %v4546_v23, %v4507_v25 }
 0x282   :  { %5669 = vmatpush.msrb.mxu1 %v10150_v10  ;;  %5783 = vmatpush.msrb.mxu3 %v5782_v1  ;;  %v10962_v10 = vand.u32 4294901760, %v10197_v30  ;;  %v4388_v1 = vld [vmem:[%s10898_s0 + $0x1c8] sm:$0xff] }
 0x283   :  { %5649 = vmatmul.f32.vlgmr.msrb.gmra.mxu0 %v10169_v28  ;;  %5785 = vmatmul.f32.vlgmr.msrb.gmra.mxu3 %v10395_v51  ;;  %v4579_v7 = vadd.f32 %v4578_v37, %v4547_v59  ;;  %v10576_v25 = vand.u32 4294901760, %v4388_v1 }
 0x284   :  { %5798 = vmatpush.msra.mxu0 %v10197_v30  ;;  %5917 = vmatpush.msra.mxu3 %v10158_v17  ;;  %v3995_v30 = vadd.f32 %v10316_v50, %v3963_v52 }
 0x285   :  { %5671 = vmatpush.msrb.mxu1 %v10174_v2  ;;  %5713 = vmatpush.msrb.mxu2 %v10362_v40  ;;  %v4393_v2 = vld [vmem:[%s10898_s0 + $0x1f0] sm:$0x1]  ;;  %v10617_v48 = vsub.f32 %v4388_v1, %v10576_v25  ;;  %v4396_v1 = vld [vmem:[%s10898_s0 + $0x208] sm:$0xff] }
 0x286   :  { %5719 = vmatmul.f32.vlgmr.msrb.gmra.mxu2 %v5718_v31  ;;  %5801 = vmatpush.msra.mxu0 %v10241_v44  ;;  %v5943_v5 = vsel %vm165_vm0, %v4393_v2, 0  ;;  %v4043_v26 = vadd.f32 %v10350_v21, %v3995_v30  ;;  %v10965_v44 = vand.u32 4294901760, %v10289_v46 }
 0x287   :  { %5871 = vmatpush.msra.mxu2 %v10962_v10  ;;  %5919 = vmatpush.msra.mxu3 %v10199_v35  ;;  %v10493_v21 = vand.u32 4294901760, %v5943_v5  ;;  %v4399_v10 = vld [vmem:[%s10898_s0 + $0x220] sm:$0xff] }
 0x288   :  { %5673 = vmatpush.msrb.mxu1 %v10208_v53  ;;  %5804 = vmatpush.msra.mxu0 %v10264_v19  ;;  %v4626_v13 = vpop.f32.mrf.mxu0  ;;  %v10964_v53 = vand.u32 4294901760, %v10264_v19  ;;  %v4073_v19 = vadd.f32 %v10352_v0, %v4043_v26 }
 0x289   :  { %5875 = vmatpush.msra.mxu2 %v10963_v45  ;;  %5921 = vmatpush.msra.mxu3 %v10225_v18  ;;  %v4627_v56 = vadd.f32 %v4626_v13, %v4579_v7 }
 0x28a   :  { %5675 = vmatpush.msrb.mxu1 %v10234_v6  ;;  %5807 = vmatpush.msra.mxu0 %v10289_v46  ;;  %v4392_v6 = vld [vmem:[%s10898_s0 + $0x1e8] sm:$0xff]  ;;  %v5940_v50 = vsel %vm161_vm1, %v4073_v19, 0 }
 0x28b   :  { %5879 = vmatpush.msra.mxu2 %v10964_v53  ;;  %5923 = vmatpush.msra.mxu3 %v10243_v43  ;;  %v10503_v0 = vand.u32 4294901760, %v4392_v6  ;;  %v10537_v47 = vand.u32 4294901760, %v5940_v50 }
 0x28c   :  { %5677 = vmatpush.msrb.mxu1 %v10256_v16  ;;  %5810 = vmatpush.msra.mxu0 %v10321_v54 }
 0x28d   :  { %5679 = vmatmul.f32.vlgmr.msrb.gmra.mxu1 %v10169_v28  ;;  %5883 = vmatpush.msra.mxu2 %v10965_v44  ;;  %v4391_v28 = vld [vmem:[%s10898_s0 + $0x1e0] sm:$0xff]  ;;  %v10533_v32 = vsub.f32 %v4392_v6, %v10503_v0  ;;  %v10571_v12 = vsub.f32 %v5940_v50, %v10537_v47  ;;  %v10643_v44 = vand.u32 4294901760, %v4399_v10  ;;  %v4398_v6 = vld [vmem:[%s10898_s0 + $0x218] sm:$0xff] }
 0x28e   :  { %5837 = vmatpush.msra.mxu1 %v10158_v17  ;;  %5925 = vmatpush.msra.mxu3 %v10280_v61  ;;  %v4390_v17 = vld [vmem:[%s10898_s0 + $0x1d8] sm:$0xff]  ;;  %v4762_v16 = vpop.f32.mrf.mxu3  ;;  %v10517_v54 = vand.u32 4294901760, %v4391_v28 }
 0x28f   :  { %5813 = vmatpush.msra.mxu0 %v10340_v22  ;;  %5887 = vmatpush.msra.mxu2 %v5756_v27  ;;  %v10535_v63 = vand.u32 4294901760, %v4390_v17  ;;  %v5972_v62 = vand.u32 4294901760, %v10571_v12 }
 0x290   :  { %5839 = vmatpush.msra.mxu1 %v10199_v35  ;;  %5927 = vmatpush.msra.mxu3 %v10301_v60  ;;  %v10515_v35 = vsub.f32 %v5943_v5, %v10493_v21  ;;  %v4219_v5 = vadd.f32 %v10404_v34, %v4179_v24 }
 0x291   :  { %5816 = vmatpush.msra.mxu0 %v10360_v55  ;;  %5891 = vmatpush.msra.mxu2 %v5762_v4  ;;  %v4696_v46 = vpop.f32.mrf.mxu2  ;;  %v4402_v4 = vld [vmem:[%s10898_s0 + $0x238] sm:$0x1] }
 0x292   :  { %5841 = vmatpush.msra.mxu1 %v10225_v18  ;;  %5929 = vmatpush.msra.mxu3 %v10323_v58  ;;  %v4656_v27 = vpop.f32.mrf.mxu1  ;;  %v4763_v22 = vadd.f32 %v4762_v16, %v4696_v46  ;;  %v4389_v18 = vld [vmem:[%s10898_s0 + $0x1d0] sm:$0xff]  ;;  %v6199_v55 = vsel %vm165_vm0, %v4402_v4, 0  ;;  %v5988_v3 = vand.u32 4294901760, %v10515_v35  ;;  %v10659_v16 = vsub.f32 %v10571_v12, %v5972_v62 }
 0x293   :  { %5819 = vmatpush.msra.mxu0 %v10378_v8  ;;  %5895 = vmatpush.msra.mxu2 %v5768_v11  ;;  %v10528_v38 = vadd.f32 %v4656_v27, %v4627_v56  ;;  %v10548_v11 = vand.u32 4294901760, %v4389_v18  ;;  %v5994_v8 = vand.u32 4294901760, %v10533_v32  ;;  %v10565_v39 = vand.u32 4294901760, %v6199_v55  ;;  %v4397_v27 = vld [vmem:[%s10898_s0 + $0x210] sm:$0xff] }
 0x294   :  { %5843 = vmatpush.msra.mxu1 %v10243_v43  ;;  %5931 = vmatpush.msra.mxu3 %v10342_v9  ;;  %v10546_v43 = vsub.f32 %v4391_v28, %v10517_v54  ;;  %v5989_v15 = vsub.f32 %v10515_v35, %v5988_v3  ;;  %v4251_v46 = vadd.f32 %v10411_v20, %v4219_v5 }
 0x295   :  { %5822 = vmatpush.msra.mxu0 %v10392_v57  ;;  %5899 = vmatpush.msra.mxu2 %v5774_v29  ;;  %v4387_v29 = vld [vmem:[%s10898_s0 + $0x1c0] sm:$0xff]  ;;  %v10584_v23 = vsub.f32 %v4389_v18, %v10548_v11  ;;  %v5995_v37 = vsub.f32 %v10533_v32, %v5994_v8  ;;  %v10608_v31 = vsub.f32 %v6199_v55, %v10565_v39 }
 0x296   :  { %5845 = vmatpush.msra.mxu1 %v10280_v61  ;;  %5933 = vmatpush.msra.mxu3 %v10362_v40  ;;  %v10559_v61 = vsub.f32 %v4390_v17, %v10535_v63  ;;  %v6000_v59 = vand.u32 4294901760, %v10546_v43  ;;  %v10592_v57 = vand.u32 4294901760, %v4387_v29  ;;  %v5990_v45 = vand.u32 4294901760, %v5989_v15 }
 0x297   :  { %5825 = vmatmul.f32.vlgmr.msra.gmra.mxu0 %v10416_v41  ;;  %5935 = vmatmul.f32.vlgmr.msra.gmra.mxu3 %v10395_v51  ;;  %v10936_v53 = vand.u32 4294901760, %v10584_v23  ;;  %v5996_v34 = vand.u32 4294901760, %v5995_v37  ;;  %v10933_v17 = vand.u32 4294901760, %v10608_v31  ;;  %v10686_v55 = vsub.f32 %v4399_v10, %v10643_v44  ;;  %v4395_v10 = vld [vmem:[%s10898_s0 + $0x200] sm:$0xff] }
 0x298   :  { %5953 = vmatpush.msrb.mxu0 %v10493_v21  ;;  %6093 = vmatpush.msrb.mxu3 %v10493_v21  ;;  %v6006_v7 = vand.u32 4294901760, %v10559_v61  ;;  %v6001_v56 = vsub.f32 %v10546_v43, %v6000_v59  ;;  %v10638_v26 = vsub.f32 %v4387_v29, %v10592_v57  ;;  %v4299_v24 = vadd.f32 %v10420_v14, %v4251_v46  ;;  %v4394_v46 = vld [vmem:[%s10898_s0 + $0x1f8] sm:$0xff] }
 0x299   :  { %5847 = vmatpush.msra.mxu1 %v10301_v60  ;;  %5903 = vmatpush.msra.mxu2 %v5780_v49  ;;  %v4400_v60 = vld [vmem:[%s10898_s0 + $0x228] sm:$0xff]  ;;  %v10597_v49 = vand.u32 4294901760, %v4401_v33  ;;  %v6013_v20 = vsub.f32 %v10584_v23, %v10936_v53  ;;  %v10752_v53 = vand.u32 4294901760, %v4394_v46 }
 0x29a   :  { %5905 = vmatmul.f32.vlgmr.msra.gmra.mxu2 %v10395_v51  ;;  %5955 = vmatpush.msrb.mxu0 %v10503_v0  ;;  %v4386_v51 = vld [vmem:[%s10898_s0 + $0x1b8] sm:$0xff]  ;;  %v10622_v2 = vand.u32 4294901760, %v4400_v60  ;;  %v6007_v19 = vsub.f32 %v10559_v61, %v6006_v7  ;;  %v10935_v18 = vand.u32 4294901760, %v10638_v26 }
 0x29b   :  { %6054 = vmatpush.msrb.mxu2 %v10515_v35  ;;  %6095 = vmatpush.msrb.mxu3 %v10503_v0  ;;  %v10631_v30 = vand.u32 4294901760, %v4386_v51 }
 0x29c   :  { %5849 = vmatpush.msra.mxu1 %v10323_v58  ;;  %5957 = vmatpush.msrb.mxu0 %v10517_v54  ;;  %v4802_v52 = vpop.f32.mrf.mxu0  ;;  %v4385_v58 = vld [vmem:[%s10898_s0 + $0x1b0] sm:$0xff]  ;;  %v10667_v50 = vsub.f32 %v4400_v60, %v10622_v2  ;;  %v6008_v29 = vand.u32 4294901760, %v6007_v19  ;;  %v10698_v60 = vand.u32 4294901760, %v4397_v27  ;;  %v6025_v19 = vsub.f32 %v10638_v26, %v10935_v18  ;;  %s6529_s0 = smov [#allocation3]  }
 0x29d   :  { %6057 = vmatpush.msrb.mxu2 %v10533_v32  ;;  %6097 = vmatpush.msrb.mxu3 %v10517_v54  ;;  %v10624_v13 = vadd.f32 %v4802_v52, %v4763_v22  ;;  %v10653_v28 = vand.u32 4294901760, %v4385_v58  ;;  %v6002_v22 = vand.u32 4294901760, %v6001_v56  ;;  %v10677_v41 = vsub.f32 %v4386_v51, %v10631_v30  ;;  %s6487_s20 = sshll.u32 %s6529_s0, 4  ;;  %s6488_s20 = int_to_ptr.vmem [resolvable:$true] %s6487_s20 }
 0x29e   :  { %5851 = vmatpush.msra.mxu1 %v10342_v9  ;;  %5959 = vmatpush.msrb.mxu0 %v10535_v63  ;;  %v10641_v9 = vsub.f32 %v4401_v33, %v10597_v49  ;;  %v6245_v33 = vsub.f32 %v10608_v31, %v10933_v17  ;;  %v5974_v51 = vand.u32 4294901760, %v10659_v16  ;;  %v6256_v52 = vand.u32 4294901760, %v10667_v50 }
 0x29f   :  { %6060 = vmatpush.msrb.mxu2 %v10546_v43  ;;  %6099 = vmatpush.msrb.mxu3 %v10535_v63  ;;  %v10696_v15 = vsub.f32 %v4385_v58, %v10653_v28  ;;  %v6014_v58 = vand.u32 4294901760, %v6013_v20  ;;  %v6030_v14 = vand.u32 4294901760, %v10677_v41  ;;  %v10716_v56 = vand.u32 4294901760, %v4396_v1 }
 0x2a0   :  { %5853 = vmatpush.msra.mxu1 %v10362_v40  ;;  %5961 = vmatpush.msrb.mxu0 %v10548_v11  ;;  %v10934_v40 = vand.u32 4294901760, %v10617_v48  ;;  %v10932_v4 = vand.u32 4294901760, %v10641_v9  ;;  %v6262_v16 = vand.u32 4294901760, %v10686_v55  ;;  %v4329_v18 = vadd.f32 %v10428_v36, %v4299_v24 }
 0x2a1   :  { %5857 = vmatmul.f32.vlgmr.msra.gmra.mxu1 %v5716_v42  ;;  %6063 = vmatpush.msrb.mxu2 %v10559_v61  ;;  %v10679_v42 = vand.u32 4294901760, %v4398_v6  ;;  %v6036_v20 = vand.u32 4294901760, %v10696_v15  ;;  %v10750_v24 = vsub.f32 %v4396_v1, %v10716_v56 }
 0x2a2   :  { %5991 = vmatpush.msrb.mxu1 %v5990_v45  ;;  %6101 = vmatpush.msrb.mxu3 %v10548_v11  ;;  %v6019_v37 = vsub.f32 %v10617_v48, %v10934_v40  ;;  %v10736_v40 = vand.u32 4294901760, %v4395_v10  ;;  %v4912_v36 = vpop.f32.mrf.mxu3 }
 0x2a3   :  { %5963 = vmatpush.msrb.mxu0 %v10576_v25  ;;  %6066 = vmatpush.msrb.mxu2 %v10584_v23  ;;  %v10714_v45 = vsub.f32 %v4398_v6, %v10679_v42  ;;  %v6037_v1 = vsub.f32 %v10696_v15, %v6036_v20 }
 0x2a4   :  { %5997 = vmatpush.msrb.mxu1 %v5996_v34  ;;  %6103 = vmatpush.msrb.mxu3 %v10576_v25  ;;  %v6251_v34 = vsub.f32 %v10641_v9, %v10932_v4  ;;  %v10734_v4 = vsub.f32 %v4397_v27, %v10698_v60  ;;  %v6031_v27 = vsub.f32 %v10677_v41, %v6030_v14 }
 0x2a5   :  { %5965 = vmatpush.msrb.mxu0 %v10592_v57  ;;  %6069 = vmatpush.msrb.mxu2 %v10617_v48  ;;  %v4882_v17 = vpop.f32.mrf.mxu2 }
 0x2a6   :  { %6003 = vmatpush.msrb.mxu1 %v6002_v22  ;;  %6105 = vmatpush.msrb.mxu3 %v10592_v57  ;;  %v4834_v5 = vpop.f32.mrf.mxu1  ;;  %v6246_v22 = vand.u32 4294901760, %v6245_v33  ;;  %v6032_v35 = vand.u32 4294901760, %v6031_v27  ;;  %v10966_v27 = vand.u32 4294901760, %v10584_v23  ;;  %v10967_v23 = vand.u32 4294901760, %v10617_v48 }
 0x2a7   :  { %5967 = vmatpush.msrb.mxu0 %v10631_v30  ;;  %6072 = vmatpush.msrb.mxu2 %v10638_v26  ;;  %v4835_v6 = vadd.f32 %v4834_v5, %v10624_v13  ;;  %v6020_v13 = vand.u32 4294901760, %v6019_v37  ;;  %v6268_v5 = vand.u32 4294901760, %v10714_v45  ;;  %v6026_v37 = vand.u32 4294901760, %v6025_v19 }
 0x2a8   :  { %6009 = vmatpush.msrb.mxu1 %v6008_v29  ;;  %6107 = vmatpush.msrb.mxu3 %v10631_v30  ;;  %v6257_v29 = vsub.f32 %v10667_v50, %v6256_v52 }
 0x2a9   :  { %5969 = vmatpush.msrb.mxu0 %v10653_v28  ;;  %6075 = vmatpush.msrb.mxu2 %v10677_v41  ;;  %v4883_v33 = vadd.f32 %v4882_v17, %v4835_v6  ;;  %v6252_v17 = vand.u32 4294901760, %v6251_v34  ;;  %v6196_v34 = vsel %vm161_vm1, %v4329_v18, 0 }
 0x2aa   :  { %6015 = vmatpush.msrb.mxu1 %v6014_v58  ;;  %6109 = vmatpush.msrb.mxu3 %v10653_v28  ;;  %v6263_v58 = vsub.f32 %v10686_v55, %v6262_v16  ;;  %v6258_v19 = vand.u32 4294901760, %v6257_v29  ;;  %v10785_v32 = vand.u32 4294901760, %v6196_v34 }
 0x2ab   :  { %5975 = vmatmul.f32.vlgmr.msrb.gmra.mxu0 %v5974_v51  ;;  %6113 = vmatmul.f32.vlgmr.msrb.gmra.mxu3 %v5972_v62  ;;  %v4913_v6 = vadd.f32 %v4912_v36, %v4883_v33  ;;  %v6274_v51 = vand.u32 4294901760, %v10734_v4  ;;  %v10766_v62 = vsub.f32 %v4395_v10, %v10736_v40  ;;  %v6280_v10 = vand.u32 4294901760, %v10750_v24 }
 0x2ac   :  { %6127 = vmatpush.msra.mxu0 %v5988_v3  ;;  %6247 = vmatpush.msra.mxu3 %v6246_v22  ;;  %v6269_v3 = vsub.f32 %v10714_v45, %v6268_v5  ;;  %v10778_v22 = vsub.f32 %v4394_v46, %v10752_v53  ;;  %v6264_v18 = vand.u32 4294901760, %v6263_v58  ;;  %v10802_v29 = vsub.f32 %v6196_v34, %v10785_v32 }
 0x2ad   :  { %6021 = vmatpush.msrb.mxu1 %v6020_v13  ;;  %6078 = vmatpush.msrb.mxu2 %v10696_v15  ;;  %v6459_v33 = vrot.slane %v4913_v6, 7  ;;  %v6275_v46 = vsub.f32 %v10734_v4, %v6274_v51  ;;  %v6286_v13 = vand.u32 4294901760, %v10766_v62  ;;  %v6281_v43 = vsub.f32 %v10750_v24, %v6280_v10 }
 0x2ae   :  { %6081 = vmatmul.f32.vlgmr.msrb.gmra.mxu2 %v10571_v12  ;;  %6131 = vmatpush.msra.mxu0 %v5994_v8  ;;  %v6038_v8 = vand.u32 4294901760, %v6037_v1  ;;  %v10968_v6 = vand.u32 4294901760, %v10638_v26 }
 0x2af   :  { %6209 = vmatpush.msra.mxu2 %v10565_v39  ;;  %6253 = vmatpush.msra.mxu3 %v6252_v17  ;;  %v10783_v12 = vsel %vm6460_vm2, %v6459_v33, %v10528_v38  ;;  %v6270_v38 = vand.u32 4294901760, %v6269_v3  ;;  %v6276_v36 = vand.u32 4294901760, %v6275_v46  ;;  %v6287_v61 = vsub.f32 %v10766_v62, %v6286_v13 }
 0x2b0   :  { %6027 = vmatpush.msrb.mxu1 %v6026_v37  ;;  %6135 = vmatpush.msra.mxu0 %v6000_v59  ;;  %v6292_v59 = vand.u32 4294901760, %v10778_v22  ;;  %v6228_v37 = vand.u32 4294901760, %v10802_v29 }
 0x2b1   :  { %6211 = vmatpush.msra.mxu2 %v10597_v49  ;;  %6259 = vmatpush.msra.mxu3 %v6258_v19  ;;  %v6288_v58 = vand.u32 4294901760, %v6287_v61 }
 0x2b2   :  { %6033 = vmatpush.msrb.mxu1 %v6032_v35  ;;  %6139 = vmatpush.msra.mxu0 %v6006_v7  ;;  %v6282_v7 = vand.u32 4294901760, %v6281_v43  ;;  %v6293_v17 = vsub.f32 %v10778_v22, %v6292_v59 }
 0x2b3   :  { %6213 = vmatpush.msra.mxu2 %v10622_v2  ;;  %6265 = vmatpush.msra.mxu3 %v6264_v18 }
 0x2b4   :  { %6039 = vmatpush.msrb.mxu1 %v6038_v8  ;;  %6143 = vmatpush.msra.mxu0 %v10966_v27 }
 0x2b5   :  { %6041 = vmatmul.f32.vlgmr.msrb.gmra.mxu1 %v10537_v47  ;;  %6215 = vmatpush.msra.mxu2 %v10643_v44 }
 0x2b6   :  { %6173 = vmatpush.msra.mxu1 %v10493_v21  ;;  %6271 = vmatpush.msra.mxu3 %v6270_v38  ;;  %v6294_v21 = vand.u32 4294901760, %v6293_v17 }
 0x2b7   :  { %6147 = vmatpush.msra.mxu0 %v10967_v23  ;;  %6217 = vmatpush.msra.mxu2 %v10679_v42 }
 0x2b8   :  { %6175 = vmatpush.msra.mxu1 %v10503_v0  ;;  %6277 = vmatpush.msra.mxu3 %v6276_v36  ;;  %v6229_v0 = vsub.f32 %v10802_v29, %v6228_v37 }
 0x2b9   :  { %6151 = vmatpush.msra.mxu0 %v10968_v6  ;;  %6219 = vmatpush.msra.mxu2 %v10698_v60 }
 0x2ba   :  { %6177 = vmatpush.msra.mxu1 %v10517_v54  ;;  %6283 = vmatpush.msra.mxu3 %v6282_v7  ;;  %v6230_v54 = vand.u32 4294901760, %v6229_v0 }
 0x2bb   :  { %6155 = vmatpush.msra.mxu0 %v6030_v14  ;;  %6221 = vmatpush.msra.mxu2 %v10716_v56 }
 0x2bc   :  { %6179 = vmatpush.msra.mxu1 %v10535_v63  ;;  %6289 = vmatpush.msra.mxu3 %v6288_v58  ;;  %v10969_v63 = vand.u32 4294901760, %v10608_v31 }
 0x2bd   :  { %6159 = vmatpush.msra.mxu0 %v6036_v20  ;;  %6223 = vmatpush.msra.mxu2 %v10736_v40 }
 0x2be   :  { %6181 = vmatpush.msra.mxu1 %v10548_v11  ;;  %6295 = vmatpush.msra.mxu3 %v6294_v21  ;;  %v10970_v11 = vand.u32 4294901760, %v10641_v9 }
 0x2bf   :  { %6161 = vmatmul.f32.vlgmr.msra.gmra.mxu0 %v10537_v47  ;;  %6297 = vmatmul.f32.vlgmr.msra.gmra.mxu3 %v10785_v32 }
 0x2c0   :  { %6310 = vmatpush.msrb.mxu0 %v10608_v31  ;;  %6429 = vmatpush.msrb.mxu3 %v10565_v39 }
 0x2c1   :  { %6183 = vmatpush.msra.mxu1 %v10576_v25  ;;  %6225 = vmatpush.msra.mxu2 %v10752_v53  ;;  %v5058_v25 = vpop.f32.mrf.mxu2 }
 0x2c2   :  { %6231 = vmatmul.f32.vlgmr.msra.gmra.mxu2 %v6230_v54  ;;  %6313 = vmatpush.msrb.mxu0 %v10641_v9 }
 0x2c3   :  { %6383 = vmatpush.msrb.mxu2 %v10969_v63  ;;  %6431 = vmatpush.msrb.mxu3 %v10597_v49 }
 0x2c4   :  { %6185 = vmatpush.msra.mxu1 %v10592_v57  ;;  %6316 = vmatpush.msrb.mxu0 %v10667_v50  ;;  %v5090_v57 = vpop.f32.mrf.mxu3 }
 0x2c5   :  { %6387 = vmatpush.msrb.mxu2 %v10970_v11  ;;  %6433 = vmatpush.msrb.mxu3 %v10622_v2 }
 0x2c6   :  { %6187 = vmatpush.msra.mxu1 %v10631_v30  ;;  %6319 = vmatpush.msrb.mxu0 %v10686_v55 }
 0x2c7   :  { %6391 = vmatpush.msrb.mxu2 %v6256_v52  ;;  %6435 = vmatpush.msrb.mxu3 %v10643_v44 }
 0x2c8   :  { %6189 = vmatpush.msra.mxu1 %v10653_v28  ;;  %6322 = vmatpush.msrb.mxu0 %v10714_v45 }
 0x2c9   :  { %6191 = vmatmul.f32.vlgmr.msra.gmra.mxu1 %v10537_v47  ;;  %6395 = vmatpush.msrb.mxu2 %v6262_v16  ;;  %v4952_v47 = vpop.f32.mrf.mxu0 }
 0x2ca   :  { %6349 = vmatpush.msrb.mxu1 %v10565_v39  ;;  %6437 = vmatpush.msrb.mxu3 %v10679_v42  ;;  %v5018_v39 = vpop.f32.mrf.mxu1 }
 0x2cb   :  { %6325 = vmatpush.msrb.mxu0 %v10734_v4  ;;  %6399 = vmatpush.msrb.mxu2 %v6268_v5 }
 0x2cc   :  { %6351 = vmatpush.msrb.mxu1 %v10597_v49  ;;  %6439 = vmatpush.msrb.mxu3 %v10698_v60 }
 0x2cd   :  { %6328 = vmatpush.msrb.mxu0 %v10750_v24  ;;  %6403 = vmatpush.msrb.mxu2 %v6274_v51  ;;  %v5208_v48 = vpop.f32.mrf.mxu2 }
 0x2ce   :  { %6353 = vmatpush.msrb.mxu1 %v10622_v2  ;;  %6441 = vmatpush.msrb.mxu3 %v10716_v56  ;;  %v5274_v2 = vpop.f32.mrf.mxu3 }
 0x2cf   :  { %6331 = vmatpush.msrb.mxu0 %v10766_v62  ;;  %6407 = vmatpush.msrb.mxu2 %v6280_v10  ;;  %v5275_v20 = vadd.f32 %v5274_v2, %v5208_v48 }
 0x2d0   :  { %6355 = vmatpush.msrb.mxu1 %v10643_v44  ;;  %6443 = vmatpush.msrb.mxu3 %v10736_v40 }
 0x2d1   :  { %6334 = vmatpush.msrb.mxu0 %v10778_v22  ;;  %6411 = vmatpush.msrb.mxu2 %v6286_v13  ;;  %v5138_v49 = vpop.f32.mrf.mxu0 }
 0x2d2   :  { %6357 = vmatpush.msrb.mxu1 %v10679_v42  ;;  %6445 = vmatpush.msrb.mxu3 %v10752_v53  ;;  %v5168_v31 = vpop.f32.mrf.mxu1 }
 0x2d3   :  { %6337 = vmatmul.f32.vlgmr.msrb.gmra.mxu0 %v10802_v29  ;;  %6447 = vmatmul.f32.vlgmr.msrb.gmra.mxu3 %v10785_v32 }
 0x2d4   :  { %6359 = vmatpush.msrb.mxu1 %v10698_v60  ;;  %6415 = vmatpush.msrb.mxu2 %v6292_v59 }
 0x2d5   :  { %6417 = vmatmul.f32.vlgmr.msrb.gmra.mxu2 %v10785_v32 }
 0x2d6   :  { %6361 = vmatpush.msrb.mxu1 %v10716_v56  ;;  %v5019_v56 = vadd.f32 %v5018_v39, %v4952_v47 }
 0x2d8   :  { %6363 = vmatpush.msrb.mxu1 %v10736_v40  ;;  %v5059_v62 = vadd.f32 %v5058_v25, %v5019_v56 }
 0x2d9   :  { %v5314_v30 = vpop.f32.mrf.mxu0 }
 0x2da   :  { %6365 = vmatpush.msrb.mxu1 %v10752_v53  ;;  %v5315_v1 = vadd.f32 %v5314_v30, %v5275_v20  ;;  %v5091_v18 = vadd.f32 %v5090_v57, %v5059_v62 }
 0x2db   :  { %6369 = vmatmul.f32.vlgmr.msrb.gmra.mxu1 %v6228_v37 }
 0x2dc   :  { %v5139_v13 = vadd.f32 %v5138_v49, %v5091_v18 }
 0x2de   :  { %v5424_v44 = vpop.f32.mrf.mxu3  ;;  %v5169_v29 = vadd.f32 %v5168_v31, %v5139_v13 }
 0x2e0   :  { %v6462_v0 = vrot.slane %v5169_v29, 6 }
 0x2e1   :  { %v5394_v9 = vpop.f32.mrf.mxu2 }
 0x2e2   :  { %v5346_v26 = vpop.f32.mrf.mxu1  ;;  %v6464_v31 = vsel %vm6463_vm3, %v6462_v0, %v10783_v12 }
 0x2e3   :  { %v5347_v35 = vadd.f32 %v5346_v26, %v5315_v1 }
 0x2e5   :  { %v5395_v46 = vadd.f32 %v5394_v9, %v5347_v35 }
 0x2e7   :  { %v5425_v17 = vadd.f32 %v5424_v44, %v5395_v46 }
 0x2e9   :  { %v6465_v11 = vrot.slane %v5425_v17, 5 }
 0x2eb   :  { %v6467_v30 = vsel %vm6466_vm4, %v6465_v11, %v6464_v31 }
 0x2ec   :  { %v5464_v28 = vpop.f32.mrf.mxu0 }
 0x2f2   :  { %v5602_v41 = vpop.f32.mrf.mxu3 }
 0x2f5   :  { %v5570_v40 = vpop.f32.mrf.mxu2 }
 0x2f6   :  { %v5530_v50 = vpop.f32.mrf.mxu1 }
 0x2f7   :  { %v5531_v5 = vadd.f32 %v5530_v50, %v5464_v28 }
 0x2f9   :  { %v5571_v10 = vadd.f32 %v5570_v40, %v5531_v5 }
 0x2fb   :  { %v5603_v38 = vadd.f32 %v5602_v41, %v5571_v10 }
 0x300   :  { %v5650_v53 = vpop.f32.mrf.mxu0 }
 0x301   :  { %v5651_v27 = vadd.f32 %v5650_v53, %v5603_v38 }
 0x306   :  { %v5786_v55 = vpop.f32.mrf.mxu3 }
 0x309   :  { %v5720_v4 = vpop.f32.mrf.mxu2 }
 0x30a   :  { %v5680_v42 = vpop.f32.mrf.mxu1  ;;  %v5787_v51 = vadd.f32 %v5786_v55, %v5720_v4 }
 0x30b   :  { %v5681_v37 = vadd.f32 %v5680_v42, %v5651_v27 }
 0x30d   :  { %v6468_v39 = vrot.slane %v5681_v37, 4 }
 0x30f   :  { %v6470_v9 = vsel %vm6469_vm5, %v6468_v39, %v6467_v30 }
 0x314   :  { %v5826_v15 = vpop.f32.mrf.mxu0 }
 0x315   :  { %v5827_v3 = vadd.f32 %v5826_v15, %v5787_v51 }
 0x31a   :  { %v5936_v14 = vpop.f32.mrf.mxu3 }
 0x31d   :  { %v5906_v52 = vpop.f32.mrf.mxu2 }
 0x31e   :  { %v5858_v60 = vpop.f32.mrf.mxu1 }
 0x31f   :  { %v5859_v22 = vadd.f32 %v5858_v60, %v5827_v3 }
 0x321   :  { %v5907_v59 = vadd.f32 %v5906_v52, %v5859_v22 }
 0x323   :  { %v5937_v6 = vadd.f32 %v5936_v14, %v5907_v59 }
 0x325   :  { %v6471_v57 = vrot.slane %v5937_v6, 3 }
 0x327   :  { %v6473_v44 = vsel %vm6472_vm6, %v6471_v57, %v6470_v9 }
 0x328   :  { %v5976_v45 = vpop.f32.mrf.mxu0 }
 0x32e   :  { %v6114_v34 = vpop.f32.mrf.mxu3 }
 0x331   :  { %v6082_v24 = vpop.f32.mrf.mxu2 }
 0x332   :  { %v6042_v16 = vpop.f32.mrf.mxu1 }
 0x333   :  { %v6043_v19 = vadd.f32 %v6042_v16, %v5976_v45 }
 0x335   :  { %v6083_v32 = vadd.f32 %v6082_v24, %v6043_v19 }
 0x337   :  { %v6115_v36 = vadd.f32 %v6114_v34, %v6083_v32 }
 0x33c   :  { %v6162_v33 = vpop.f32.mrf.mxu0 }
 0x33d   :  { %v6163_v58 = vadd.f32 %v6162_v33, %v6115_v36 }
 0x342   :  { %v6298_v61 = vpop.f32.mrf.mxu3 }
 0x345   :  { %v6232_v43 = vpop.f32.mrf.mxu2 }
 0x346   :  { %v6192_v8 = vpop.f32.mrf.mxu1  ;;  %v6299_v23 = vadd.f32 %v6298_v61, %v6232_v43 }
 0x347   :  { %v6193_v54 = vadd.f32 %v6192_v8, %v6163_v58 }
 0x349   :  { %v6474_v48 = vrot.slane %v6193_v54, 2 }
 0x34b   :  { %v6476_v50 = vsel %vm6475_vm7, %v6474_v48, %v6473_v44 }
 0x350   :  { %v6338_v7 = vpop.f32.mrf.mxu0 }
 0x351   :  { %v6339_v21 = vadd.f32 %v6338_v7, %v6299_v23 }
 0x356   :  { %v6448_v2 = vpop.f32.mrf.mxu3 }
 0x358   :  { %v6370_v63 = vpop.f32.mrf.mxu1  ;;  %v6418_v25 = vpop.f32.mrf.mxu2 }
 0x359   :  { %v6371_v47 = vadd.f32 %v6370_v63, %v6339_v21 }
 0x35b   :  { %v6419_v49 = vadd.f32 %v6418_v25, %v6371_v47 }
 0x35d   :  { %v6449_v26 = vadd.f32 %v6448_v2, %v6419_v49 }
 0x35f   :  { %v6477_v28 = vrot.slane %v6449_v26, 1 }
 0x361   :  { %v6479_v12 = vsel %vm6478_vm8, %v6477_v28, %v6476_v50 }
 0x362   :  { %6481 = vst.msk [vmem:[#allocation3] sm:$0xff] %vm161_vm1, %v6479_v12 }
 0x363   :  { %6492 = dma.vmem_to_hbm [thread:$0]  %s6488_s20, 128, %s6490_s22, [#allocation4]  }
 0x364   :  { %6527 = dma.done.wait [#allocation4], 128  }
 0x365   :  { %6528 = vsyncadd [#allocation4], 4294967168 }
 0x366   :  { %6497 = vsyncpa [#allocation4], 1 }

</bundles_post_ra>
